<compile_context>
chip_gen: v5e
topology: v5e:2x2
jax: 0.10.0
libtpu: 0.0.40
codegen_flags: <defaults>
</compile_context>

<pallas_src>
import functools
import math

import jax
import jax.numpy as jnp
from jax.experimental import pallas as pl
from jax.experimental.pallas import tpu as pltpu


# ----------------------------------------------------------------------------
# Fused kernel: whole dis.forward for one graph per grid step
# ----------------------------------------------------------------------------
def _dis_kernel(h_ref, adj_ref, w_ref, b_ref, y_ref, *, offs, dims, n):
    heads = dims["heads"]
    x = h_ref[0]                                        # (N, in_dim) f32
    adj = adj_ref[0].astype(jnp.float32)                # (N, N), adj[dst, src]
    # adj tiled along lanes once; shared by both attention layers' (N, heads*N) tiles.
    adj_t = jnp.concatenate([adj] * heads, axis=1)      # (N, heads*N)

    def mm(a, name):
        # a @ W + b from the packed weight/bias slabs (static-offset slices).
        c0, c1, k = offs[name]
        w = w_ref[0:k, c0:c1]
        b = b_ref[0:1, c0:c1]
        return jnp.dot(a, w, preferred_element_type=jnp.float32) + b

    def graph_attention(x, name, dim):
        head_dim = dim // heads
        qkv = mm(x, name)                               # (N, 3*dim) = [Q/sqrt(d) | K | V]
        q = qkv[:, 0:dim]                               # Q already pre-scaled at init
        k = qkv[:, dim:2 * dim]
        v = qkv[:, 2 * dim:3 * dim]

        # Lane-packed heads: stack per-head column-masked K and [V | ones] along the
        # sublane axis so ONE score matmul and ONE wV/z matmul serve all heads.
        col = jax.lax.broadcasted_iota(jnp.int32, (1, dim), 1)
        k_blk, vz_blk = [], []
        for hh in range(heads):
            lo = hh * head_dim
            m = ((col >= lo) & (col < lo + head_dim)).astype(jnp.float32)     # (1, dim)
            k_blk.append(k * m)                                               # (N, dim)
            vz_blk.append(jnp.concatenate([v * m, jnp.broadcast_to(m, (n, dim))],
                                          axis=1))                            # (N, 2*dim)
        k_pack = jnp.concatenate(k_blk, axis=0)          # (heads*N, dim)
        vz_pack = jnp.concatenate(vz_blk, axis=0)        # (heads*N, 2*dim)

        # score[:, hh*N + j] = Q_h[i] . K_h[j] / sqrt(head_dim)
        s = jax.lax.dot_general(q.astype(jnp.bfloat16), k_pack.astype(jnp.bfloat16),
                                (((1,), (1,)), ((), ())),
                                preferred_element_type=jnp.float32)           # (N, heads*N)
        e = jnp.exp(jnp.clip(s, -5.0, 5.0)) * adj_t                           # masked scores

        # wV and z (z rides along as extra columns, already broadcast per head block).
        wvz = jnp.dot(e.astype(jnp.bfloat16), vz_pack.astype(jnp.bfloat16),
                      preferred_element_type=jnp.float32)                     # (N, 2*dim)
        wv = wvz[:, 0:dim]
        z = wvz[:, dim:2 * dim]
        has_edge = z > 0.0
        # Exact divide to match the reference; NaN -> 0 for nodes with no in-edges.
        return jnp.where(has_edge, wv / jnp.where(has_edge, z, 1.0), 0.0)     # (N, dim)

    def batchnorm(x):
        # BatchNorm1d, training-mode batch stats, weight=1 / bias=0 (PyTorch default
        # init), eps=1e-5, biased variance.  Running-stat updates not modeled.
        mu = jnp.mean(x, axis=0, keepdims=True)
        var = jnp.mean((x - mu) * (x - mu), axis=0, keepdims=True)
        return (x - mu) * jax.lax.rsqrt(var + 1e-5)

    hidden, out_dim = dims["hidden"], dims["out"]

    # embedding_h
    h = mm(x, "emb")

    # GraphTransformerLayer 1 (residual=False; self.O defined but unused in forward()).
    h = batchnorm(graph_attention(h, "l1_qkv", hidden))
    h = batchnorm(mm(jnp.maximum(mm(h, "l1_f1"), 0.0), "l1_f2"))

    # GraphTransformerLayer 2 (residual=False).
    h = batchnorm(graph_attention(h, "l2_qkv", out_dim))
    h = batchnorm(mm(jnp.maximum(mm(h, "l2_f1"), 0.0), "l2_f2"))

    # out2: Linear(out_dim, 1) -> Sigmoid -> clamp(1e-5, 1 - 1e-5)
    logit = mm(h, "cls")                                 # (N, 1)
    y = 1.0 / (1.0 + jnp.exp(-logit))
    y_ref[0] = jnp.clip(y, 1e-5, 1.0 - 1e-5)


# ----------------------------------------------------------------------------
# Wrapper: batch-of-graphs parallel grid, 4 operands total
# ----------------------------------------------------------------------------
def dis_forward(params, adj, h):
    """dis.forward(g, h) for a batch of B graphs.

    adj: (B, N, N), adj[b, dst, src] = 1 iff edge src -> dst in graph b.
    h:   (B, N, 4*FM) node features.
    Returns (B, N, 1) in [1e-5, 1 - 1e-5].
    """
    b, n, in_dim = h.shape
    dims = params["dims"]
    heads = dims["heads"]
    wbuf, bbuf = params["wbuf"], params["bbuf"]
    kmax, ctot = wbuf.shape

    # VMEM ceiling guard: the per-step working set is dominated by the lane-packed
    # (N, heads*N) score tiles + (N, N) adj.  v7x has 64 MiB VMEM/TC (default scoped
    # limit 32 MiB on every generation), so the "everything resident" assumption breaks
    # ~2x earlier there.  For larger graphs, tile the dst-node dimension and compute
    # BatchNorm statistics in two passes.
    # TODO(synk): dst-node grid axis + two-pass BatchNorm for graphs where this trips.
    approx_vmem_bytes = 4 * n * n * (3 * heads + 4) + 8 * wbuf.size
    assert approx_vmem_bytes < 24 * 1024 * 1024, \
        "graph too large for the fused single-step design; tile the dst-node dimension"

    kernel = functools.partial(_dis_kernel, offs=params["offs"], dims=dims, n=n)
    return pl.pallas_call(
        kernel,
        out_shape=jax.ShapeDtypeStruct((b, n, 1), jnp.float32),
        grid=(b,),
        in_specs=[
            pl.BlockSpec((1, n, in_dim), lambda i: (i, 0, 0)),   # per-graph features
            pl.BlockSpec((1, n, n), lambda i: (i, 0, 0)),        # per-graph adjacency
            pl.BlockSpec((kmax, ctot), lambda i: (0, 0)),        # packed weights (resident)
            pl.BlockSpec((1, ctot), lambda i: (0, 0)),           # packed biases  (resident)
        ],
        out_specs=pl.BlockSpec((1, n, 1), lambda i: (i, 0, 0)),
        compiler_params=pltpu.CompilerParams(
            # Batch-of-graphs axis is embarrassingly parallel -> uses both TCs on v7x
            # and amortizes launch / DMA-prologue overhead on v5e / v6e.
            dimension_semantics=("parallel",),
        ),
    )(h.astype(jnp.float32), adj.astype(jnp.bfloat16), wbuf, bbuf)


# ----------------------------------------------------------------------------
# Deterministic parameter init (weights pre-transposed, Q pre-scaled, all packed
# into two flat buffers so the kernel sees exactly 4 operands)
# ----------------------------------------------------------------------------
def init_params(key, FM, heads=4):
    assert FM % 4 == 0
    in_dim, hidden, out_dim = FM * 4, FM * 2, FM
    keys = iter(jax.random.split(key, 64))

    def lin(k_in, n_out, scale=0.1):
        # Stored (K, N) so the kernel never transposes weights.
        w = scale * jax.random.normal(next(keys), (k_in, n_out), jnp.float32)
        b = scale * jax.random.normal(next(keys), (1, n_out), jnp.float32)
        return w, b

    def qkv(k_in, n_out):
        wq, bq = lin(k_in, n_out)
        wk, bk = lin(k_in, n_out)
        wv, bv = lin(k_in, n_out)
        # Pre-scale the Q block by 1/sqrt(head_dim): the reference clamps the already
        # scaled score, so this is exactly equivalent and removes a full (N, heads*N)
        # VPU multiply per attention layer.
        inv = 1.0 / math.sqrt(n_out // heads)
        return (jnp.concatenate([wq * inv, wk, wv], axis=1),
                jnp.concatenate([bq * inv, bk, bv], axis=1))

    mats = {
        "emb":    lin(in_dim, hidden),
        "l1_qkv": qkv(hidden, hidden),
        "l1_f1":  lin(hidden, hidden * 2),
        "l1_f2":  lin(hidden * 2, hidden),
        "l2_qkv": qkv(hidden, out_dim),
        "l2_f1":  lin(out_dim, out_dim * 2),
        "l2_f2":  lin(out_dim * 2, out_dim),
        "cls":    lin(out_dim, 1),
        # NOTE: GraphTransformerLayer.O is defined but never used in forward().
    }
    names = ["emb", "l1_qkv", "l1_f1", "l1_f2", "l2_qkv", "l2_f1", "l2_f2", "cls"]
    k_max = max(mats[nm][0].shape[0] for nm in names)
    c_tot = sum(mats[nm][0].shape[1] for nm in names)
    wbuf = jnp.zeros((k_max, c_tot), jnp.float32)
    bbuf = jnp.zeros((1, c_tot), jnp.float32)
    offs, c = {}, 0
    for nm in names:
        w, b = mats[nm]
        k, nn = w.shape
        wbuf = wbuf.at[0:k, c:c + nn].set(w)
        bbuf = bbuf.at[:, c:c + nn].set(b)
        offs[nm] = (c, c + nn, k)
        c += nn
    return {
        "wbuf": wbuf, "bbuf": bbuf, "offs": offs,
        "dims": {"in": in_dim, "hidden": hidden, "out": out_dim, "heads": heads},
    }


# ----------------------------------------------------------------------------
if __name__ == "__main__":
    FM = 16          # -> in_dim_node = 64, hidden_dim = 32, out_dim = 16, heads = 4
    N = 64           # nodes per graph
    B = 2            # batch of graphs -> parallel grid axis
    key = jax.random.PRNGKey(0)
    kp, kh, ka = jax.random.split(key, 3)

    params = init_params(kp, FM)
    h = jax.random.normal(kh, (B, N, FM * 4), jnp.float32)
    # Deterministic random directed graphs: adj[b, dst, src] = 1 iff edge src -> dst.
    adj = (jax.random.uniform(ka, (B, N, N)) < 0.25).astype(jnp.float32)

    y = dis_forward(params, adj, h)
    jax.block_until_ready(y)

    assert y.shape == (B, N, 1)
    assert bool(jnp.all(jnp.isfinite(y)))
    assert bool(jnp.all((y >= 1e-5) & (y <= 1.0 - 1e-5)))
    print("KERNEL_OK")
</pallas_src>

<mosaic_0001>
module attributes {stable_mosaic.version = 11 : i64} {
  func.func @_dis_kernel(%arg0: i32, %arg1: memref<1x64x64xf32, #tpu.memory_space<vmem>>, %arg2: memref<1x64x64xbf16, #tpu.memory_space<vmem>>, %arg3: memref<64x321xf32, #tpu.memory_space<vmem>>, %arg4: memref<1x321xf32, #tpu.memory_space<vmem>>, %arg5: memref<1x64x1xf32, #tpu.memory_space<vmem>>) attributes {dimension_semantics = [#tpu.dimension_semantics<parallel>], iteration_bounds = array<i64: 2>, scalar_prefetch = 0 : i64, scratch_operands = 0 : i64, tpu.core_type = #tpu.core_type<tc>, window_params = [{transform_indices = @transform_0, window_bounds = array<i64: 1, 64, 64>}, {transform_indices = @transform_1, window_bounds = array<i64: 1, 64, 64>}, {pipeline_mode = #tpu.pipeline_mode<synchronous>, transform_indices = @transform_2, window_bounds = array<i64: 64, 321>}, {pipeline_mode = #tpu.pipeline_mode<synchronous>, transform_indices = @transform_3, window_bounds = array<i64: 1, 321>}, {transform_indices = @transform_4, window_bounds = array<i64: 1, 64, 1>}]} {
    %c0 = arith.constant 0 : index
    %c0_0 = arith.constant 0 : index
    %c0_1 = arith.constant 0 : index
    %0 = vector.load %arg1[%c0, %c0_0, %c0_1] : memref<1x64x64xf32, #tpu.memory_space<vmem>>, vector<1x64x64xf32>
    %1 = vector.shape_cast %0 : vector<1x64x64xf32> to vector<64x64xf32>
    %c0_2 = arith.constant 0 : index
    %c0_3 = arith.constant 0 : index
    %c0_4 = arith.constant 0 : index
    %2 = vector.load %arg2[%c0_2, %c0_3, %c0_4] : memref<1x64x64xbf16, #tpu.memory_space<vmem>>, vector<1x64x64xbf16>
    %3 = vector.shape_cast %2 : vector<1x64x64xbf16> to vector<64x64xbf16>
    %4 = arith.extf %3 : vector<64x64xbf16> to vector<64x64xf32>
    %5 = tpu.concatenate %4, %4, %4, %4 in 1 : vector<64x64xf32>, vector<64x64xf32>, vector<64x64xf32>, vector<64x64xf32> -> vector<64x256xf32>
    %c0_5 = arith.constant 0 : index
    %c0_6 = arith.constant 0 : index
    %6 = vector.load %arg3[%c0_5, %c0_6] : memref<64x321xf32, #tpu.memory_space<vmem>>, vector<64x32xf32>
    %c0_7 = arith.constant 0 : index
    %c0_8 = arith.constant 0 : index
    %7 = vector.load %arg4[%c0_7, %c0_8] : memref<1x321xf32, #tpu.memory_space<vmem>>, vector<1x32xf32>
    %cst = arith.constant dense<0.000000e+00> : vector<64x32xf32>
    %8 = tpu.matmul %1, %6, %cst {dimension_numbers = #tpu.dot_dimension_numbers<[1], [0], [0], [1], [0, 0, 1, 1], [], []>} : vector<64x64xf32>, vector<64x32xf32>, vector<64x32xf32> -> vector<64x32xf32>
    %9 = vector.broadcast %7 : vector<1x32xf32> to vector<64x32xf32>
    %10 = arith.addf %8, %9 : vector<64x32xf32>
    %c0_9 = arith.constant 0 : index
    %c32 = arith.constant 32 : index
    %11 = vector.load %arg3[%c0_9, %c32] : memref<64x321xf32, #tpu.memory_space<vmem>>, vector<32x96xf32>
    %c0_10 = arith.constant 0 : index
    %c32_11 = arith.constant 32 : index
    %12 = vector.load %arg4[%c0_10, %c32_11] : memref<1x321xf32, #tpu.memory_space<vmem>>, vector<1x96xf32>
    %cst_12 = arith.constant dense<0.000000e+00> : vector<64x96xf32>
    %13 = tpu.matmul %10, %11, %cst_12 {dimension_numbers = #tpu.dot_dimension_numbers<[1], [0], [0], [1], [0, 0, 1, 1], [], []>} : vector<64x32xf32>, vector<32x96xf32>, vector<64x96xf32> -> vector<64x96xf32>
    %14 = vector.broadcast %12 : vector<1x96xf32> to vector<64x96xf32>
    %15 = arith.addf %13, %14 : vector<64x96xf32>
    %16 = vector.extract_strided_slice %15 {offsets = [0, 0], sizes = [64, 32], strides = [1, 1]} : vector<64x96xf32> to vector<64x32xf32>
    %17 = vector.extract_strided_slice %15 {offsets = [0, 32], sizes = [64, 32], strides = [1, 1]} : vector<64x96xf32> to vector<64x32xf32>
    %18 = vector.extract_strided_slice %15 {offsets = [0, 64], sizes = [64, 32], strides = [1, 1]} : vector<64x96xf32> to vector<64x32xf32>
    %19 = tpu.iota {dimensions = array<i32: 1>} : vector<1x32xi32>
    %c0_i32 = arith.constant 0 : i32
    %20 = vector.broadcast %c0_i32 : i32 to vector<1x32xi32>
    %21 = arith.cmpi sge, %19, %20 : vector<1x32xi32>
    %c8_i32 = arith.constant 8 : i32
    %22 = vector.broadcast %c8_i32 : i32 to vector<1x32xi32>
    %23 = arith.cmpi slt, %19, %22 : vector<1x32xi32>
    %24 = arith.andi %21, %23 : vector<1x32xi1>
    %25 = arith.extui %24 : vector<1x32xi1> to vector<1x32xi32>
    %26 = arith.sitofp %25 : vector<1x32xi32> to vector<1x32xf32>
    %27 = vector.broadcast %26 : vector<1x32xf32> to vector<64x32xf32>
    %28 = arith.mulf %17, %27 : vector<64x32xf32>
    %29 = vector.broadcast %26 : vector<1x32xf32> to vector<64x32xf32>
    %30 = arith.mulf %18, %29 : vector<64x32xf32>
    %31 = vector.shape_cast %26 : vector<1x32xf32> to vector<1x32xf32>
    %32 = vector.broadcast %31 : vector<1x32xf32> to vector<64x32xf32>
    %33 = tpu.concatenate %30, %32 in 1 : vector<64x32xf32>, vector<64x32xf32> -> vector<64x64xf32>
    %c8_i32_13 = arith.constant 8 : i32
    %34 = vector.broadcast %c8_i32_13 : i32 to vector<1x32xi32>
    %35 = arith.cmpi sge, %19, %34 : vector<1x32xi32>
    %c16_i32 = arith.constant 16 : i32
    %36 = vector.broadcast %c16_i32 : i32 to vector<1x32xi32>
    %37 = arith.cmpi slt, %19, %36 : vector<1x32xi32>
    %38 = arith.andi %35, %37 : vector<1x32xi1>
    %39 = arith.extui %38 : vector<1x32xi1> to vector<1x32xi32>
    %40 = arith.sitofp %39 : vector<1x32xi32> to vector<1x32xf32>
    %41 = vector.broadcast %40 : vector<1x32xf32> to vector<64x32xf32>
    %42 = arith.mulf %17, %41 : vector<64x32xf32>
    %43 = vector.broadcast %40 : vector<1x32xf32> to vector<64x32xf32>
    %44 = arith.mulf %18, %43 : vector<64x32xf32>
    %45 = vector.shape_cast %40 : vector<1x32xf32> to vector<1x32xf32>
    %46 = vector.broadcast %45 : vector<1x32xf32> to vector<64x32xf32>
    %47 = tpu.concatenate %44, %46 in 1 : vector<64x32xf32>, vector<64x32xf32> -> vector<64x64xf32>
    %c16_i32_14 = arith.constant 16 : i32
    %48 = vector.broadcast %c16_i32_14 : i32 to vector<1x32xi32>
    %49 = arith.cmpi sge, %19, %48 : vector<1x32xi32>
    %c24_i32 = arith.constant 24 : i32
    %50 = vector.broadcast %c24_i32 : i32 to vector<1x32xi32>
    %51 = arith.cmpi slt, %19, %50 : vector<1x32xi32>
    %52 = arith.andi %49, %51 : vector<1x32xi1>
    %53 = arith.extui %52 : vector<1x32xi1> to vector<1x32xi32>
    %54 = arith.sitofp %53 : vector<1x32xi32> to vector<1x32xf32>
    %55 = vector.broadcast %54 : vector<1x32xf32> to vector<64x32xf32>
    %56 = arith.mulf %17, %55 : vector<64x32xf32>
    %57 = vector.broadcast %54 : vector<1x32xf32> to vector<64x32xf32>
    %58 = arith.mulf %18, %57 : vector<64x32xf32>
    %59 = vector.shape_cast %54 : vector<1x32xf32> to vector<1x32xf32>
    %60 = vector.broadcast %59 : vector<1x32xf32> to vector<64x32xf32>
    %61 = tpu.concatenate %58, %60 in 1 : vector<64x32xf32>, vector<64x32xf32> -> vector<64x64xf32>
    %c24_i32_15 = arith.constant 24 : i32
    %62 = vector.broadcast %c24_i32_15 : i32 to vector<1x32xi32>
    %63 = arith.cmpi sge, %19, %62 : vector<1x32xi32>
    %c32_i32 = arith.constant 32 : i32
    %64 = vector.broadcast %c32_i32 : i32 to vector<1x32xi32>
    %65 = arith.cmpi slt, %19, %64 : vector<1x32xi32>
    %66 = arith.andi %63, %65 : vector<1x32xi1>
    %67 = arith.extui %66 : vector<1x32xi1> to vector<1x32xi32>
    %68 = arith.sitofp %67 : vector<1x32xi32> to vector<1x32xf32>
    %69 = vector.broadcast %68 : vector<1x32xf32> to vector<64x32xf32>
    %70 = arith.mulf %17, %69 : vector<64x32xf32>
    %71 = vector.broadcast %68 : vector<1x32xf32> to vector<64x32xf32>
    %72 = arith.mulf %18, %71 : vector<64x32xf32>
    %73 = vector.shape_cast %68 : vector<1x32xf32> to vector<1x32xf32>
    %74 = vector.broadcast %73 : vector<1x32xf32> to vector<64x32xf32>
    %75 = tpu.concatenate %72, %74 in 1 : vector<64x32xf32>, vector<64x32xf32> -> vector<64x64xf32>
    %76 = tpu.concatenate %28, %42, %56, %70 in 0 : vector<64x32xf32>, vector<64x32xf32>, vector<64x32xf32>, vector<64x32xf32> -> vector<256x32xf32>
    %77 = tpu.concatenate %33, %47, %61, %75 in 0 : vector<64x64xf32>, vector<64x64xf32>, vector<64x64xf32>, vector<64x64xf32> -> vector<256x64xf32>
    %78 = arith.truncf %16 : vector<64x32xf32> to vector<64x32xbf16>
    %79 = arith.truncf %76 : vector<256x32xf32> to vector<256x32xbf16>
    %cst_16 = arith.constant dense<0.000000e+00> : vector<64x256xf32>
    %80 = tpu.matmul %78, %79, %cst_16 {dimension_numbers = #tpu.dot_dimension_numbers<[1], [1], [0], [0], [0, 0, 1, 0], [], []>} : vector<64x32xbf16>, vector<256x32xbf16>, vector<64x256xf32> -> vector<64x256xf32>
    %cst_17 = arith.constant -5.000000e+00 : f32
    %cst_18 = arith.constant 5.000000e+00 : f32
    %81 = vector.broadcast %cst_17 : f32 to vector<64x256xf32>
    %82 = arith.maximumf %81, %80 : vector<64x256xf32>
    %83 = vector.broadcast %cst_18 : f32 to vector<64x256xf32>
    %84 = arith.minimumf %83, %82 : vector<64x256xf32>
    %85 = math.exp %84 : vector<64x256xf32>
    %86 = arith.mulf %85, %5 : vector<64x256xf32>
    %87 = arith.truncf %86 : vector<64x256xf32> to vector<64x256xbf16>
    %88 = arith.truncf %77 : vector<256x64xf32> to vector<256x64xbf16>
    %cst_19 = arith.constant dense<0.000000e+00> : vector<64x64xf32>
    %89 = tpu.matmul %87, %88, %cst_19 {dimension_numbers = #tpu.dot_dimension_numbers<[1], [0], [0], [1], [0, 0, 1, 1], [], []>} : vector<64x256xbf16>, vector<256x64xbf16>, vector<64x64xf32> -> vector<64x64xf32>
    %90 = vector.extract_strided_slice %89 {offsets = [0, 0], sizes = [64, 32], strides = [1, 1]} : vector<64x64xf32> to vector<64x32xf32>
    %91 = vector.extract_strided_slice %89 {offsets = [0, 32], sizes = [64, 32], strides = [1, 1]} : vector<64x64xf32> to vector<64x32xf32>
    %cst_20 = arith.constant 0.000000e+00 : f32
    %92 = vector.broadcast %cst_20 : f32 to vector<64x32xf32>
    %93 = arith.cmpf ogt, %91, %92 : vector<64x32xf32>
    %cst_21 = arith.constant 1.000000e+00 : f32
    %94 = vector.broadcast %cst_21 : f32 to vector<64x32xf32>
    %95 = arith.select %93, %91, %94 : vector<64x32xi1>, vector<64x32xf32>
    %96 = arith.divf %90, %95 : vector<64x32xf32>
    %cst_22 = arith.constant 0.000000e+00 : f32
    %97 = vector.broadcast %cst_22 : f32 to vector<64x32xf32>
    %98 = arith.select %93, %96, %97 : vector<64x32xi1>, vector<64x32xf32>
    %cst_23 = arith.constant dense<0.000000e+00> : vector<32xf32>
    %99 = vector.multi_reduction <add>, %98, %cst_23 [0] : vector<64x32xf32> to vector<32xf32>
    %100 = vector.shape_cast %99 : vector<32xf32> to vector<1x32xf32>
    %cst_24 = arith.constant 6.400000e+01 : f32
    %101 = vector.broadcast %cst_24 : f32 to vector<1x32xf32>
    %102 = arith.divf %100, %101 : vector<1x32xf32>
    %103 = vector.broadcast %102 : vector<1x32xf32> to vector<64x32xf32>
    %104 = arith.subf %98, %103 : vector<64x32xf32>
    %105 = vector.broadcast %102 : vector<1x32xf32> to vector<64x32xf32>
    %106 = arith.subf %98, %105 : vector<64x32xf32>
    %107 = arith.mulf %104, %106 : vector<64x32xf32>
    %cst_25 = arith.constant dense<0.000000e+00> : vector<32xf32>
    %108 = vector.multi_reduction <add>, %107, %cst_25 [0] : vector<64x32xf32> to vector<32xf32>
    %109 = vector.shape_cast %108 : vector<32xf32> to vector<1x32xf32>
    %cst_26 = arith.constant 6.400000e+01 : f32
    %110 = vector.broadcast %cst_26 : f32 to vector<1x32xf32>
    %111 = arith.divf %109, %110 : vector<1x32xf32>
    %112 = vector.broadcast %102 : vector<1x32xf32> to vector<64x32xf32>
    %113 = arith.subf %98, %112 : vector<64x32xf32>
    %cst_27 = arith.constant 9.99999974E-6 : f32
    %114 = vector.broadcast %cst_27 : f32 to vector<1x32xf32>
    %115 = arith.addf %111, %114 : vector<1x32xf32>
    %116 = math.rsqrt %115 : vector<1x32xf32>
    %117 = vector.broadcast %116 : vector<1x32xf32> to vector<64x32xf32>
    %118 = arith.mulf %113, %117 : vector<64x32xf32>
    %c0_28 = arith.constant 0 : index
    %c128 = arith.constant 128 : index
    %119 = vector.load %arg3[%c0_28, %c128] : memref<64x321xf32, #tpu.memory_space<vmem>>, vector<32x64xf32>
    %c0_29 = arith.constant 0 : index
    %c128_30 = arith.constant 128 : index
    %120 = vector.load %arg4[%c0_29, %c128_30] : memref<1x321xf32, #tpu.memory_space<vmem>>, vector<1x64xf32>
    %cst_31 = arith.constant dense<0.000000e+00> : vector<64x64xf32>
    %121 = tpu.matmul %118, %119, %cst_31 {dimension_numbers = #tpu.dot_dimension_numbers<[1], [0], [0], [1], [0, 0, 1, 1], [], []>} : vector<64x32xf32>, vector<32x64xf32>, vector<64x64xf32> -> vector<64x64xf32>
    %122 = vector.broadcast %120 : vector<1x64xf32> to vector<64x64xf32>
    %123 = arith.addf %121, %122 : vector<64x64xf32>
    %cst_32 = arith.constant 0.000000e+00 : f32
    %124 = vector.broadcast %cst_32 : f32 to vector<64x64xf32>
    %125 = arith.maximumf %123, %124 : vector<64x64xf32>
    %c0_33 = arith.constant 0 : index
    %c192 = arith.constant 192 : index
    %126 = vector.load %arg3[%c0_33, %c192] : memref<64x321xf32, #tpu.memory_space<vmem>>, vector<64x32xf32>
    %c0_34 = arith.constant 0 : index
    %c192_35 = arith.constant 192 : index
    %127 = vector.load %arg4[%c0_34, %c192_35] : memref<1x321xf32, #tpu.memory_space<vmem>>, vector<1x32xf32>
    %cst_36 = arith.constant dense<0.000000e+00> : vector<64x32xf32>
    %128 = tpu.matmul %125, %126, %cst_36 {dimension_numbers = #tpu.dot_dimension_numbers<[1], [0], [0], [1], [0, 0, 1, 1], [], []>} : vector<64x64xf32>, vector<64x32xf32>, vector<64x32xf32> -> vector<64x32xf32>
    %129 = vector.broadcast %127 : vector<1x32xf32> to vector<64x32xf32>
    %130 = arith.addf %128, %129 : vector<64x32xf32>
    %cst_37 = arith.constant dense<0.000000e+00> : vector<32xf32>
    %131 = vector.multi_reduction <add>, %130, %cst_37 [0] : vector<64x32xf32> to vector<32xf32>
    %132 = vector.shape_cast %131 : vector<32xf32> to vector<1x32xf32>
    %cst_38 = arith.constant 6.400000e+01 : f32
    %133 = vector.broadcast %cst_38 : f32 to vector<1x32xf32>
    %134 = arith.divf %132, %133 : vector<1x32xf32>
    %135 = vector.broadcast %134 : vector<1x32xf32> to vector<64x32xf32>
    %136 = arith.subf %130, %135 : vector<64x32xf32>
    %137 = vector.broadcast %134 : vector<1x32xf32> to vector<64x32xf32>
    %138 = arith.subf %130, %137 : vector<64x32xf32>
    %139 = arith.mulf %136, %138 : vector<64x32xf32>
    %cst_39 = arith.constant dense<0.000000e+00> : vector<32xf32>
    %140 = vector.multi_reduction <add>, %139, %cst_39 [0] : vector<64x32xf32> to vector<32xf32>
    %141 = vector.shape_cast %140 : vector<32xf32> to vector<1x32xf32>
    %cst_40 = arith.constant 6.400000e+01 : f32
    %142 = vector.broadcast %cst_40 : f32 to vector<1x32xf32>
    %143 = arith.divf %141, %142 : vector<1x32xf32>
    %144 = vector.broadcast %134 : vector<1x32xf32> to vector<64x32xf32>
    %145 = arith.subf %130, %144 : vector<64x32xf32>
    %cst_41 = arith.constant 9.99999974E-6 : f32
    %146 = vector.broadcast %cst_41 : f32 to vector<1x32xf32>
    %147 = arith.addf %143, %146 : vector<1x32xf32>
    %148 = math.rsqrt %147 : vector<1x32xf32>
    %149 = vector.broadcast %148 : vector<1x32xf32> to vector<64x32xf32>
    %150 = arith.mulf %145, %149 : vector<64x32xf32>
    %c0_42 = arith.constant 0 : index
    %c224 = arith.constant 224 : index
    %151 = vector.load %arg3[%c0_42, %c224] : memref<64x321xf32, #tpu.memory_space<vmem>>, vector<32x48xf32>
    %c0_43 = arith.constant 0 : index
    %c224_44 = arith.constant 224 : index
    %152 = vector.load %arg4[%c0_43, %c224_44] : memref<1x321xf32, #tpu.memory_space<vmem>>, vector<1x48xf32>
    %cst_45 = arith.constant dense<0.000000e+00> : vector<64x48xf32>
    %153 = tpu.matmul %150, %151, %cst_45 {dimension_numbers = #tpu.dot_dimension_numbers<[1], [0], [0], [1], [0, 0, 1, 1], [], []>} : vector<64x32xf32>, vector<32x48xf32>, vector<64x48xf32> -> vector<64x48xf32>
    %154 = vector.broadcast %152 : vector<1x48xf32> to vector<64x48xf32>
    %155 = arith.addf %153, %154 : vector<64x48xf32>
    %156 = vector.extract_strided_slice %155 {offsets = [0, 0], sizes = [64, 16], strides = [1, 1]} : vector<64x48xf32> to vector<64x16xf32>
    %157 = vector.extract_strided_slice %155 {offsets = [0, 16], sizes = [64, 16], strides = [1, 1]} : vector<64x48xf32> to vector<64x16xf32>
    %158 = vector.extract_strided_slice %155 {offsets = [0, 32], sizes = [64, 16], strides = [1, 1]} : vector<64x48xf32> to vector<64x16xf32>
    %159 = tpu.iota {dimensions = array<i32: 1>} : vector<1x16xi32>
    %c0_i32_46 = arith.constant 0 : i32
    %160 = vector.broadcast %c0_i32_46 : i32 to vector<1x16xi32>
    %161 = arith.cmpi sge, %159, %160 : vector<1x16xi32>
    %c4_i32 = arith.constant 4 : i32
    %162 = vector.broadcast %c4_i32 : i32 to vector<1x16xi32>
    %163 = arith.cmpi slt, %159, %162 : vector<1x16xi32>
    %164 = arith.andi %161, %163 : vector<1x16xi1>
    %165 = arith.extui %164 : vector<1x16xi1> to vector<1x16xi32>
    %166 = arith.sitofp %165 : vector<1x16xi32> to vector<1x16xf32>
    %167 = vector.broadcast %166 : vector<1x16xf32> to vector<64x16xf32>
    %168 = arith.mulf %157, %167 : vector<64x16xf32>
    %169 = vector.broadcast %166 : vector<1x16xf32> to vector<64x16xf32>
    %170 = arith.mulf %158, %169 : vector<64x16xf32>
    %171 = vector.shape_cast %166 : vector<1x16xf32> to vector<1x16xf32>
    %172 = vector.broadcast %171 : vector<1x16xf32> to vector<64x16xf32>
    %173 = tpu.concatenate %170, %172 in 1 : vector<64x16xf32>, vector<64x16xf32> -> vector<64x32xf32>
    %c4_i32_47 = arith.constant 4 : i32
    %174 = vector.broadcast %c4_i32_47 : i32 to vector<1x16xi32>
    %175 = arith.cmpi sge, %159, %174 : vector<1x16xi32>
    %c8_i32_48 = arith.constant 8 : i32
    %176 = vector.broadcast %c8_i32_48 : i32 to vector<1x16xi32>
    %177 = arith.cmpi slt, %159, %176 : vector<1x16xi32>
    %178 = arith.andi %175, %177 : vector<1x16xi1>
    %179 = arith.extui %178 : vector<1x16xi1> to vector<1x16xi32>
    %180 = arith.sitofp %179 : vector<1x16xi32> to vector<1x16xf32>
    %181 = vector.broadcast %180 : vector<1x16xf32> to vector<64x16xf32>
    %182 = arith.mulf %157, %181 : vector<64x16xf32>
    %183 = vector.broadcast %180 : vector<1x16xf32> to vector<64x16xf32>
    %184 = arith.mulf %158, %183 : vector<64x16xf32>
    %185 = vector.shape_cast %180 : vector<1x16xf32> to vector<1x16xf32>
    %186 = vector.broadcast %185 : vector<1x16xf32> to vector<64x16xf32>
    %187 = tpu.concatenate %184, %186 in 1 : vector<64x16xf32>, vector<64x16xf32> -> vector<64x32xf32>
    %c8_i32_49 = arith.constant 8 : i32
    %188 = vector.broadcast %c8_i32_49 : i32 to vector<1x16xi32>
    %189 = arith.cmpi sge, %159, %188 : vector<1x16xi32>
    %c12_i32 = arith.constant 12 : i32
    %190 = vector.broadcast %c12_i32 : i32 to vector<1x16xi32>
    %191 = arith.cmpi slt, %159, %190 : vector<1x16xi32>
    %192 = arith.andi %189, %191 : vector<1x16xi1>
    %193 = arith.extui %192 : vector<1x16xi1> to vector<1x16xi32>
    %194 = arith.sitofp %193 : vector<1x16xi32> to vector<1x16xf32>
    %195 = vector.broadcast %194 : vector<1x16xf32> to vector<64x16xf32>
    %196 = arith.mulf %157, %195 : vector<64x16xf32>
    %197 = vector.broadcast %194 : vector<1x16xf32> to vector<64x16xf32>
    %198 = arith.mulf %158, %197 : vector<64x16xf32>
    %199 = vector.shape_cast %194 : vector<1x16xf32> to vector<1x16xf32>
    %200 = vector.broadcast %199 : vector<1x16xf32> to vector<64x16xf32>
    %201 = tpu.concatenate %198, %200 in 1 : vector<64x16xf32>, vector<64x16xf32> -> vector<64x32xf32>
    %c12_i32_50 = arith.constant 12 : i32
    %202 = vector.broadcast %c12_i32_50 : i32 to vector<1x16xi32>
    %203 = arith.cmpi sge, %159, %202 : vector<1x16xi32>
    %c16_i32_51 = arith.constant 16 : i32
    %204 = vector.broadcast %c16_i32_51 : i32 to vector<1x16xi32>
    %205 = arith.cmpi slt, %159, %204 : vector<1x16xi32>
    %206 = arith.andi %203, %205 : vector<1x16xi1>
    %207 = arith.extui %206 : vector<1x16xi1> to vector<1x16xi32>
    %208 = arith.sitofp %207 : vector<1x16xi32> to vector<1x16xf32>
    %209 = vector.broadcast %208 : vector<1x16xf32> to vector<64x16xf32>
    %210 = arith.mulf %157, %209 : vector<64x16xf32>
    %211 = vector.broadcast %208 : vector<1x16xf32> to vector<64x16xf32>
    %212 = arith.mulf %158, %211 : vector<64x16xf32>
    %213 = vector.shape_cast %208 : vector<1x16xf32> to vector<1x16xf32>
    %214 = vector.broadcast %213 : vector<1x16xf32> to vector<64x16xf32>
    %215 = tpu.concatenate %212, %214 in 1 : vector<64x16xf32>, vector<64x16xf32> -> vector<64x32xf32>
    %216 = tpu.concatenate %168, %182, %196, %210 in 0 : vector<64x16xf32>, vector<64x16xf32>, vector<64x16xf32>, vector<64x16xf32> -> vector<256x16xf32>
    %217 = tpu.concatenate %173, %187, %201, %215 in 0 : vector<64x32xf32>, vector<64x32xf32>, vector<64x32xf32>, vector<64x32xf32> -> vector<256x32xf32>
    %218 = arith.truncf %156 : vector<64x16xf32> to vector<64x16xbf16>
    %219 = arith.truncf %216 : vector<256x16xf32> to vector<256x16xbf16>
    %cst_52 = arith.constant dense<0.000000e+00> : vector<64x256xf32>
    %220 = tpu.matmul %218, %219, %cst_52 {dimension_numbers = #tpu.dot_dimension_numbers<[1], [1], [0], [0], [0, 0, 1, 0], [], []>} : vector<64x16xbf16>, vector<256x16xbf16>, vector<64x256xf32> -> vector<64x256xf32>
    %cst_53 = arith.constant -5.000000e+00 : f32
    %cst_54 = arith.constant 5.000000e+00 : f32
    %221 = vector.broadcast %cst_53 : f32 to vector<64x256xf32>
    %222 = arith.maximumf %221, %220 : vector<64x256xf32>
    %223 = vector.broadcast %cst_54 : f32 to vector<64x256xf32>
    %224 = arith.minimumf %223, %222 : vector<64x256xf32>
    %225 = math.exp %224 : vector<64x256xf32>
    %226 = arith.mulf %225, %5 : vector<64x256xf32>
    %227 = arith.truncf %226 : vector<64x256xf32> to vector<64x256xbf16>
    %228 = arith.truncf %217 : vector<256x32xf32> to vector<256x32xbf16>
    %cst_55 = arith.constant dense<0.000000e+00> : vector<64x32xf32>
    %229 = tpu.matmul %227, %228, %cst_55 {dimension_numbers = #tpu.dot_dimension_numbers<[1], [0], [0], [1], [0, 0, 1, 1], [], []>} : vector<64x256xbf16>, vector<256x32xbf16>, vector<64x32xf32> -> vector<64x32xf32>
    %230 = vector.extract_strided_slice %229 {offsets = [0, 0], sizes = [64, 16], strides = [1, 1]} : vector<64x32xf32> to vector<64x16xf32>
    %231 = vector.extract_strided_slice %229 {offsets = [0, 16], sizes = [64, 16], strides = [1, 1]} : vector<64x32xf32> to vector<64x16xf32>
    %cst_56 = arith.constant 0.000000e+00 : f32
    %232 = vector.broadcast %cst_56 : f32 to vector<64x16xf32>
    %233 = arith.cmpf ogt, %231, %232 : vector<64x16xf32>
    %cst_57 = arith.constant 1.000000e+00 : f32
    %234 = vector.broadcast %cst_57 : f32 to vector<64x16xf32>
    %235 = arith.select %233, %231, %234 : vector<64x16xi1>, vector<64x16xf32>
    %236 = arith.divf %230, %235 : vector<64x16xf32>
    %cst_58 = arith.constant 0.000000e+00 : f32
    %237 = vector.broadcast %cst_58 : f32 to vector<64x16xf32>
    %238 = arith.select %233, %236, %237 : vector<64x16xi1>, vector<64x16xf32>
    %cst_59 = arith.constant dense<0.000000e+00> : vector<16xf32>
    %239 = vector.multi_reduction <add>, %238, %cst_59 [0] : vector<64x16xf32> to vector<16xf32>
    %240 = vector.shape_cast %239 : vector<16xf32> to vector<1x16xf32>
    %cst_60 = arith.constant 6.400000e+01 : f32
    %241 = vector.broadcast %cst_60 : f32 to vector<1x16xf32>
    %242 = arith.divf %240, %241 : vector<1x16xf32>
    %243 = vector.broadcast %242 : vector<1x16xf32> to vector<64x16xf32>
    %244 = arith.subf %238, %243 : vector<64x16xf32>
    %245 = vector.broadcast %242 : vector<1x16xf32> to vector<64x16xf32>
    %246 = arith.subf %238, %245 : vector<64x16xf32>
    %247 = arith.mulf %244, %246 : vector<64x16xf32>
    %cst_61 = arith.constant dense<0.000000e+00> : vector<16xf32>
    %248 = vector.multi_reduction <add>, %247, %cst_61 [0] : vector<64x16xf32> to vector<16xf32>
    %249 = vector.shape_cast %248 : vector<16xf32> to vector<1x16xf32>
    %cst_62 = arith.constant 6.400000e+01 : f32
    %250 = vector.broadcast %cst_62 : f32 to vector<1x16xf32>
    %251 = arith.divf %249, %250 : vector<1x16xf32>
    %252 = vector.broadcast %242 : vector<1x16xf32> to vector<64x16xf32>
    %253 = arith.subf %238, %252 : vector<64x16xf32>
    %cst_63 = arith.constant 9.99999974E-6 : f32
    %254 = vector.broadcast %cst_63 : f32 to vector<1x16xf32>
    %255 = arith.addf %251, %254 : vector<1x16xf32>
    %256 = math.rsqrt %255 : vector<1x16xf32>
    %257 = vector.broadcast %256 : vector<1x16xf32> to vector<64x16xf32>
    %258 = arith.mulf %253, %257 : vector<64x16xf32>
    %c0_64 = arith.constant 0 : index
    %c272 = arith.constant 272 : index
    %259 = vector.load %arg3[%c0_64, %c272] : memref<64x321xf32, #tpu.memory_space<vmem>>, vector<16x32xf32>
    %c0_65 = arith.constant 0 : index
    %c272_66 = arith.constant 272 : index
    %260 = vector.load %arg4[%c0_65, %c272_66] : memref<1x321xf32, #tpu.memory_space<vmem>>, vector<1x32xf32>
    %cst_67 = arith.constant dense<0.000000e+00> : vector<64x32xf32>
    %261 = tpu.matmul %258, %259, %cst_67 {dimension_numbers = #tpu.dot_dimension_numbers<[1], [0], [0], [1], [0, 0, 1, 1], [], []>} : vector<64x16xf32>, vector<16x32xf32>, vector<64x32xf32> -> vector<64x32xf32>
    %262 = vector.broadcast %260 : vector<1x32xf32> to vector<64x32xf32>
    %263 = arith.addf %261, %262 : vector<64x32xf32>
    %cst_68 = arith.constant 0.000000e+00 : f32
    %264 = vector.broadcast %cst_68 : f32 to vector<64x32xf32>
    %265 = arith.maximumf %263, %264 : vector<64x32xf32>
    %c0_69 = arith.constant 0 : index
    %c304 = arith.constant 304 : index
    %266 = vector.load %arg3[%c0_69, %c304] : memref<64x321xf32, #tpu.memory_space<vmem>>, vector<32x16xf32>
    %c0_70 = arith.constant 0 : index
    %c304_71 = arith.constant 304 : index
    %267 = vector.load %arg4[%c0_70, %c304_71] : memref<1x321xf32, #tpu.memory_space<vmem>>, vector<1x16xf32>
    %cst_72 = arith.constant dense<0.000000e+00> : vector<64x16xf32>
    %268 = tpu.matmul %265, %266, %cst_72 {dimension_numbers = #tpu.dot_dimension_numbers<[1], [0], [0], [1], [0, 0, 1, 1], [], []>} : vector<64x32xf32>, vector<32x16xf32>, vector<64x16xf32> -> vector<64x16xf32>
    %269 = vector.broadcast %267 : vector<1x16xf32> to vector<64x16xf32>
    %270 = arith.addf %268, %269 : vector<64x16xf32>
    %cst_73 = arith.constant dense<0.000000e+00> : vector<16xf32>
    %271 = vector.multi_reduction <add>, %270, %cst_73 [0] : vector<64x16xf32> to vector<16xf32>
    %272 = vector.shape_cast %271 : vector<16xf32> to vector<1x16xf32>
    %cst_74 = arith.constant 6.400000e+01 : f32
    %273 = vector.broadcast %cst_74 : f32 to vector<1x16xf32>
    %274 = arith.divf %272, %273 : vector<1x16xf32>
    %275 = vector.broadcast %274 : vector<1x16xf32> to vector<64x16xf32>
    %276 = arith.subf %270, %275 : vector<64x16xf32>
    %277 = vector.broadcast %274 : vector<1x16xf32> to vector<64x16xf32>
    %278 = arith.subf %270, %277 : vector<64x16xf32>
    %279 = arith.mulf %276, %278 : vector<64x16xf32>
    %cst_75 = arith.constant dense<0.000000e+00> : vector<16xf32>
    %280 = vector.multi_reduction <add>, %279, %cst_75 [0] : vector<64x16xf32> to vector<16xf32>
    %281 = vector.shape_cast %280 : vector<16xf32> to vector<1x16xf32>
    %cst_76 = arith.constant 6.400000e+01 : f32
    %282 = vector.broadcast %cst_76 : f32 to vector<1x16xf32>
    %283 = arith.divf %281, %282 : vector<1x16xf32>
    %284 = vector.broadcast %274 : vector<1x16xf32> to vector<64x16xf32>
    %285 = arith.subf %270, %284 : vector<64x16xf32>
    %cst_77 = arith.constant 9.99999974E-6 : f32
    %286 = vector.broadcast %cst_77 : f32 to vector<1x16xf32>
    %287 = arith.addf %283, %286 : vector<1x16xf32>
    %288 = math.rsqrt %287 : vector<1x16xf32>
    %289 = vector.broadcast %288 : vector<1x16xf32> to vector<64x16xf32>
    %290 = arith.mulf %285, %289 : vector<64x16xf32>
    %c0_78 = arith.constant 0 : index
    %c320 = arith.constant 320 : index
    %291 = vector.load %arg3[%c0_78, %c320] : memref<64x321xf32, #tpu.memory_space<vmem>>, vector<16x1xf32>
    %c0_79 = arith.constant 0 : index
    %c320_80 = arith.constant 320 : index
    %292 = vector.load %arg4[%c0_79, %c320_80] : memref<1x321xf32, #tpu.memory_space<vmem>>, vector<1x1xf32>
    %cst_81 = arith.constant dense<0.000000e+00> : vector<64x1xf32>
    %293 = tpu.matmul %290, %291, %cst_81 {dimension_numbers = #tpu.dot_dimension_numbers<[1], [0], [0], [1], [0, 0, 1, 1], [], []>} : vector<64x16xf32>, vector<16x1xf32>, vector<64x1xf32> -> vector<64x1xf32>
    %294 = vector.broadcast %292 : vector<1x1xf32> to vector<64x1xf32>
    %295 = arith.addf %293, %294 : vector<64x1xf32>
    %cst_82 = arith.constant 0.000000e+00 : f32
    %296 = vector.broadcast %cst_82 : f32 to vector<64x1xf32>
    %297 = arith.subf %296, %295 : vector<64x1xf32>
    %298 = math.exp %297 : vector<64x1xf32>
    %cst_83 = arith.constant 1.000000e+00 : f32
    %299 = vector.broadcast %cst_83 : f32 to vector<64x1xf32>
    %300 = arith.addf %299, %298 : vector<64x1xf32>
    %cst_84 = arith.constant 1.000000e+00 : f32
    %301 = vector.broadcast %cst_84 : f32 to vector<64x1xf32>
    %302 = arith.divf %301, %300 : vector<64x1xf32>
    %cst_85 = arith.constant 9.99999974E-6 : f32
    %cst_86 = arith.constant 0.999989986 : f32
    %303 = vector.broadcast %cst_85 : f32 to vector<64x1xf32>
    %304 = arith.maximumf %303, %302 : vector<64x1xf32>
    %305 = vector.broadcast %cst_86 : f32 to vector<64x1xf32>
    %306 = arith.minimumf %305, %304 : vector<64x1xf32>
    %c0_87 = arith.constant 0 : index
    %c0_88 = arith.constant 0 : index
    %c0_89 = arith.constant 0 : index
    %307 = vector.load %arg5[%c0_87, %c0_88, %c0_89] : memref<1x64x1xf32, #tpu.memory_space<vmem>>, vector<1x64x1xf32>
    %308 = vector.shape_cast %307 : vector<1x64x1xf32> to vector<64x1xf32>
    %309 = vector.shape_cast %306 : vector<64x1xf32> to vector<1x64x1xf32>
    tpu.vector_store %arg5[%c0_87, %c0_88, %c0_89], %309 {strides = array<i32>} : memref<1x64x1xf32, #tpu.memory_space<vmem>>, vector<1x64x1xf32>,
    return
  }
  func.func @transform_0(%arg0: i32) -> (i32, i32, i32) {
    %c0_i32 = arith.constant 0 : i32
    %c0_i32_0 = arith.constant 0 : i32
    %c0_i32_1 = arith.constant 0 : i32
    return %arg0, %c0_i32, %c0_i32_0 : i32, i32, i32
  }
  func.func @transform_1(%arg0: i32) -> (i32, i32, i32) {
    %c0_i32 = arith.constant 0 : i32
    %c0_i32_0 = arith.constant 0 : i32
    %c0_i32_1 = arith.constant 0 : i32
    return %arg0, %c0_i32, %c0_i32_0 : i32, i32, i32
  }
  func.func @transform_2(%arg0: i32) -> (i32, i32) {
    %c0_i32 = arith.constant 0 : i32
    %c0_i32_0 = arith.constant 0 : i32
    %c0_i32_1 = arith.constant 0 : i32
    return %c0_i32, %c0_i32_0 : i32, i32
  }
  func.func @transform_3(%arg0: i32) -> (i32, i32) {
    %c0_i32 = arith.constant 0 : i32
    %c0_i32_0 = arith.constant 0 : i32
    %c0_i32_1 = arith.constant 0 : i32
    return %c0_i32, %c0_i32_0 : i32, i32
  }
  func.func @transform_4(%arg0: i32) -> (i32, i32, i32) {
    %c0_i32 = arith.constant 0 : i32
    %c0_i32_0 = arith.constant 0 : i32
    %c0_i32_1 = arith.constant 0 : i32
    return %arg0, %c0_i32, %c0_i32_0 : i32, i32, i32
  }
}

</mosaic_0001>

<bundles_post_ra>
// kernel: tpu_custom_call.1
= control target key start
LH: loop header
LB: loop body
LE: loop exit
PB: predicated region body
PF: predicated region fallthrough
CT: control target
= control target key end

     0   :  { %s5577_s0 = inlined_call_operand.hbm [shape: f32[2,64,64], index: 0, kind: input, shape index: {}]   ;;  %s5578_s1 = inlined_call_operand.hbm [shape: bf16[2,64,64], index: 1, kind: input, shape index: {}]   ;;  %s5579_s2 = inlined_call_operand.hbm [shape: f32[64,321], index: 2, kind: input, shape index: {}]   ;;  %s5580_s3 = inlined_call_operand.hbm [shape: f32[1,321], index: 3, kind: input, shape index: {}]   ;;  %s5581_s4 = inlined_call_operand.vmem [shape: f32[2,64,1], index: 4, kind: output, shape index: {}]  }
   0x1   :  { %5588 = sst [smem:[#allocation13_spill]] %s5577_s0 }
   0x2   :  { %9 = vsyncpa [#allocation3], 0 }
   0x3   :  { %11 = vsyncpa [#allocation3 + $0x1], 0 }
   0x4   :  { %12 = vsyncpa [#allocation5], 0 }
   0x5   :  { %14 = vsyncpa [#allocation5 + $0x1], 0 }
   0x6   :  { %15 = vsyncpa [#allocation8], 0  ;;  %s4260_s15 = smov 0   ;;  %s4262_s16 = smov 0  }
   0x7   :  { %s4264_s17 = smov 0   ;;  %s4266_s18 = smov 0  }
   0x8 LB: > { %s4279_s19 = sadd.s32 4294967295, %s4217_s18   ;;  %p41_p0 = scmp.ne.s32.totalorder %s4209_s16, %s4205_s15  ;;  %s4217_s18 = sphi %s4266_s18, %s5685_s18   ;;  %s4213_s17 = sphi %s4264_s17, %s5684_s17   ;;  %s4209_s16 = sphi %s4262_s16, %s5683_s16   ;;  %s4205_s15 = sphi %s4260_s15, %s5682_s15  }
   0x9   : > { %p42_p1 = scmp.eq.s32.totalorder %s4279_s19, 0  ;;  %p3370_p2 = scmp.ge.s32.totalorder %s4217_s18, 1 }
   0xa   : > { %p146_p3 = scmp.lt.s32.totalorder %s4217_s18, 3  ;;  %s157_s23 = sshll.u32 %s5579_s2, 4  ;;  %s158_s23 = int_to_ptr.hbm [resolvable:$true] %s157_s23 }
   0xb   : > { %p4287_p4 = por %p42_p1, %p41_p0  ;;  %s4219_s25 = smov [#allocation6]  }
   0xc   : > { %p4294_p5 = pnand %p3370_p2, %p146_p3  ;;  %s159_s26 = sshll.u32 %s4219_s25, 4  ;;  %s160_s26 = int_to_ptr.vmem [resolvable:$true] %s159_s26 }
   0xd   : > { %s172_s29 = sshll.u32 %s5580_s3, 4  ;;  %s4220_s30 = smov 384   ;;  %s173_s29 = int_to_ptr.hbm [resolvable:$true] %s172_s29 }
   0xe   : > { %p3549_p6 = pneg %p4294_p5  ;;  %s4221_s5 = smov 24  }
   0xf   : > { %s4222_s6 = smov [#allocation7]   ;;  %s4306_s8 = sadd.s32 1, %s4217_s18  }
  0x10   : > { %p3550_p7 = pnand %p3549_p6, %p42_p1  ;;  %s174_s7 = sshll.u32 %s4222_s6, 4  ;;  %s175_s7 = int_to_ptr.vmem [resolvable:$true] %s174_s7 }
  0x11   : > { %s28_s9 = sadd.s32 1, %s4213_s17  ;;  %s25_s10 = ssub.s32 %s4217_s18, %s4306_s8 }
  0x12   : > { %3552 = dma.hbm_to_vmem [thread:$0]  (!%p3550_p7), %s158_s23, 3072, %s160_s26, [#allocation5], %s4220_s30, %s4220_s30, %s4221_s5  }
  0x13   : > { %3555 = dma.hbm_to_vmem [thread:$0]  (!%p3550_p7), %s173_s29, 48, %s175_s7, [#allocation8]  }
  0x14   : > { %p35_p8 = scmp.ne.s32.totalorder %s4213_s17, %s4209_s16  ;;  %p26_p9 = scmp.eq.s32.totalorder %s25_s10, 0 }
  0x15   : > { %p36_p10 = scmp.eq.s32.totalorder %s4217_s18, 0  ;;  %p3565_p11 = scmp.lt.s32.totalorder %s4217_s18, 2 }
  0x16   : > { %s4316_s11 = sand.u32 1, %s4213_s17   ;;  %s3509_s14 = sshll.u32 %s4217_s18, 6 }
  0x17   : > { %s4319_s12 = scalar_select %p26_p9, %s4213_s17, %s28_s9  }
  0x18   : > { %p37_p12 = por %p36_p10, %p35_p8  ;;  %s3374_s13 = sshll.u32 %s4316_s11, 6 }
  0x19   : > { %s5591_s0 = sld [smem:[#allocation13_spill]]  ;;  %s189_s25 = scalar_lea.vmem [#allocation2], %s3374_s13 }
  0x1a   : > { %s197_s26 = sshll.u32 %s189_s25, 4  ;;  %p4326_p13 = pnand %p3565_p11, %p37_p12  ;;  %s198_s26 = int_to_ptr.vmem [resolvable:$true] %s197_s26 }
  0x1b   : > { %s207_s28 = sand.u32 1, %s4217_s18   ;;  %s186_s29 = scalar_lea.sflag [#allocation3], %s4316_s11 }
  0x1c   : > { %p4115_p2 = pneg %p4326_p13 }
  0x1f   : > { %s194_s22 = scalar_lea.hbm %s5591_s0, %s3509_s14  ;;  %s4118_s9 = scalar_lea.hbm %s5591_s0, 128 }
  0x20   : > { %s195_s23 = sshll.u32 %s194_s22, 4  ;;  %s196_s23 = int_to_ptr.hbm [resolvable:$true] %s195_s23 }
  0x21   : > { %s4111_s30 = sshra.s32 %s196_s23, 4  ;;  %s4112_s30 = int_to_ptr.hbm [resolvable:$true] %s4111_s30 }
  0x22   : > { %s4113_s5 = scalar_lea.hbm %s4112_s30, 64  ;;  %p4119_p7 = scmp.lt.s32.totalorder %s4112_s30, %s5591_s0 }
  0x23   : > { %p4114_p0 = scmp.ne.s32.totalorder %s4112_s30, %s4113_s5  ;;  %p4120_p8 = scmp.lt.s32.totalorder %s4118_s9, %s4113_s5 }
  0x25   : > { %p4116_p3 = pnand %p4115_p2, %p4114_p0  ;;  %p4121_p9 = por %p4120_p8, %p4119_p7 }
  0x27   : > { %p4117_p6 = pneg %p4116_p3 }
  0x29   : > { %p4122_p10 = pnand %p4121_p9, %p4117_p6 }
  0x2b   : > { %4125 = shalt.err (!%p4122_p10)
}
  0x2c   : > { %s4223_s14 = smov 128   ;;  %s4224_s15 = smov 8  }
  0x2d   : > { %3559 = dma.hbm_to_vmem [thread:$0]  (!%p4326_p13), %s196_s23, 1024, %s198_s26, %s186_s29, %s4223_s14, %s4223_s14, %s4224_s15  }
  0x2e   : > { %s3377_s21 = sshll.u32 %s4316_s11, 5  ;;  %s3510_s22 = sshll.u32 %s4217_s18, 5 }
  0x2f   : > { %s216_s7 = scalar_lea.hbm %s5578_s1, %s3510_s22  ;;  %s211_s30 = scalar_lea.vmem [#allocation4], %s3377_s21 }
  0x30   : > { %s217_s10 = sshll.u32 %s216_s7, 4  ;;  %s219_s5 = sshll.u32 %s211_s30, 4  ;;  %s218_s10 = int_to_ptr.hbm [resolvable:$true] %s217_s10  ;;  %s220_s5 = int_to_ptr.vmem [resolvable:$true] %s219_s5 }
  0x31   : > { %s208_s9 = scalar_lea.sflag [#allocation5], %s207_s28  ;;  %s4141_s13 = sshra.s32 %s218_s10, 4  ;;  %s4142_s13 = int_to_ptr.hbm [resolvable:$true] %s4141_s13 }
  0x32   : > { %s4143_s0 = scalar_lea.hbm %s4142_s13, 32  ;;  %s4148_s23 = scalar_lea.hbm %s5578_s1, 64 }
  0x33   : > { %p4144_p11 = scmp.ne.s32.totalorder %s4142_s13, %s4143_s0  ;;  %p4149_p3 = scmp.lt.s32.totalorder %s4142_s13, %s5578_s1 }
  0x34   : > { %p4150_p6 = scmp.lt.s32.totalorder %s4148_s23, %s4143_s0 }
  0x35   : > { %p4146_p12 = pnand %p4144_p11, %p4115_p2 }
  0x36   : > { %p4151_p7 = por %p4150_p6, %p4149_p3 }
  0x37   : > { %p4147_p0 = pneg %p4146_p12 }
  0x39   : > { %p4152_p8 = pnand %p4151_p7, %p4147_p0 }
  0x3b   : > { %4155 = shalt.err (!%p4152_p8)
}
  0x3c   : > { %s4225_s28 = smov 64   ;;  %s4226_s14 = smov 4  }
  0x3d   : > { %3562 = dma.hbm_to_vmem [thread:$0]  (!%p4326_p13), %s218_s10, 512, %s220_s5, %s208_s9, %s4225_s28, %s4225_s28, %s4226_s14  }
  0x3e   : > { %231 = sbr.rel (%p4294_p5) target bundleno = 3479 (0xd97), region = 36  ;;  %s233_s15 = sand.u32 (!%p4294_p5), 1, %s4209_s16  }
  0x3f   : > { %s3381_s21 = sshll.u32 (!%p4294_p5), %s233_s15, 6  ;;  %s234_s22 = scalar_lea.sflag (!%p4294_p5), [#allocation3], %s233_s15 }
  0x40   : > { %s4364_s25 = scalar_lea.vmem (!%p4294_p5), [#allocation2], %s3381_s21 }
  0x43   : > { %4188 = dma.done.wait (%p4287_p4), %s234_s22, 1024  }
  0x44   : > { %4190 = vsyncadd (%p4287_p4), %s234_s22, 4294966272  ;;  %s243_s0 = sand.u32 1, %s4279_s19   ;;  %s3382_s27 = sshll.u32 %s233_s15, 5 }
  0x45   : > { %s244_s6 = scalar_lea.sflag [#allocation5], %s243_s0  ;;  %s4371_s7 = scalar_lea.vmem [#allocation4], %s3382_s27 }
  0x46   : > { %4192 = dma.done.wait (%p4287_p4), %s244_s6, 512  }
  0x47   : > { %4194 = vsyncadd (%p4287_p4), %s244_s6, 4294966784 }
  0x48   : > { %4196 = dma.done.wait (%p42_p1), [#allocation5], 3072  }
  0x49   : > { %4198 = vsyncadd (%p42_p1), [#allocation5], 4294964224 }
  0x4a   : > { %4200 = dma.done.wait (%p42_p1), [#allocation8], 48  }
  0x4b   : > { %4202 = vsyncadd (%p42_p1), [#allocation8], 4294967248  ;;  %v365_v0 = vld [vmem:[#allocation6 + $0xa8] sm:$0xff]  ;;  %v364_v1 = vld [vmem:[#allocation6 + $0x90] sm:$0xff]  ;;  %s4227_s20 = smov 96   ;;  %vm5585_vm0 = vcmask 523264   ;;  %v524_v19 = vlaneseq }
  0x4c   : > { %402 = vmatpush.msra.mxu0 %v365_v0  ;;  %v361_v2 = vld [vmem:[#allocation6 + $0x48] sm:$0xff]  ;;  %v360_v3 = vld [vmem:[#allocation6 + $0x30] sm:$0xff]  ;;  %v363_v4 = vld [vmem:[#allocation6 + $0x78] sm:$0xff]  ;;  %v4228_v24 = vmov 0.0   ;;  %s4229_s24 = smov 32   ;;  %vm5586_vm7 = vcmask 261120  }
  0x4d   : > { %v3616_v5 = vpack.i.bf16 %v360_v3, %v361_v2  ;;  %v362_v6 = vld [vmem:[#allocation6 + $0x60] sm:$0xff]  ;;  %v359_v7 = vld [vmem:[#allocation6 + $0x18] sm:$0xff]  ;;  %v294_v11 = vld [vmem:[%s4364_s25 + $0x8] sm:$0xff]  ;;  %v4404_v20 = vand.u32 127, %v524_v19  ;;  %s4230_s10 = smov 64   ;;  %s4232_s30 = smov 16  }
  0x4e   : > { %403 = vmatpush.msra.mxu0 %v364_v1  ;;  %v358_v8 = vld [vmem:[#allocation6] sm:$0xff]  ;;  %v295_v12 = vld [vmem:[%s4364_s25 + $0x10] sm:$0xff]  ;;  %v296_v13 = vld [vmem:[%s4364_s25 + $0x18] sm:$0xff]  ;;  %s4233_s5 = smov 112   ;;  %s4234_s9 = smov 80  }
  0x4f   : > { %3617 = vrot.lane.b32.xlu0 %v3616_v5, %s4227_s20  ;;  %v3621_v9 = vpack.i.bf16 %v358_v8, %v359_v7  ;;  %v293_v10 = vld [vmem:[%s4364_s25] sm:$0xff]  ;;  %v298_v15 = vld [vmem:[%s4364_s25 + $0x28] sm:$0xff]  ;;  %v299_v16 = vld [vmem:[%s4364_s25 + $0x30] sm:$0xff]  ;;  %vm5583_vm1 = vcmp.ge.s32.totalorder %v4404_v20, 8  ;;  %vm5582_vm2 = vcmp.lt.s32.totalorder %v4404_v20, 16  ;;  %vm730_vm3 = vcmp.ge.s32.totalorder %v4404_v20, 24 }
  0x50   : > { %404 = vmatpush.msra.mxu0 %v363_v4  ;;  %v297_v14 = vld [vmem:[%s4364_s25 + $0x20] sm:$0xff]  ;;  %v300_v17 = vld [vmem:[%s4364_s25 + $0x38] sm:$0xff]  ;;  %vm731_vm4 = vcmp.lt.s32.totalorder %v4404_v20, 32  ;;  %vm596_vm5 = vmand %vm5583_vm1, %vm5582_vm2  ;;  %vm662_vm8 = vcmp.ge.s32.totalorder %v4404_v20, 16  ;;  %vm663_vm9 = vcmp.lt.s32.totalorder %v4404_v20, 24  ;;  %vm5584_vm10 = vcmp.lt.s32.totalorder %v4404_v20, 8 }
  0x51   : > { %v3906_v18 = vld [vmem:[#allocation7] ss:$0 sm:$0xff]  ;;  %v3404_v25 = vsel %vm596_vm5, 1.0, %v4228_v24  ;;  %vm732_vm6 = vmand %vm730_vm3, %vm731_vm4  ;;  %v3403_v33 = vsel %vm5584_vm10, 1.0, %v4228_v24  ;;  %p288_p1 = scmp.lt.s32.totalorder %s4279_s19, 1 }
  0x52   : > { %405 = vmatpush.msra.mxu0 %v362_v6  ;;  %455 = vrot.lane.b32.xlu1 %v3906_v18, %s4227_s20  ;;  %v3406_v26 = vsel %vm732_vm6, 1.0, %v4228_v24  ;;  %vm664_vm11 = vmand %vm662_vm8, %vm663_vm9 }
  0x53   : > { %v4416_v27 = vpack.i.bf16 %v3406_v26, %v3404_v25  ;;  %v3405_v34 = vsel %vm664_vm11, 1.0, %v4228_v24  ;;  %s5687_s19 = smov (!%p288_p1, %s4279_s19), 1 }
  0x54   : > { %406 = vmatpush.msra.mxu0 %v361_v2  ;;  %v4428_v35 = vpack.i.bf16 %v3405_v34, %v3403_v33  ;;  %s3511_s13 = sshll.u32 %s5687_s19, 6 }
  0x55   : > { %s5513_s19 = scalar_lea.vmem %s5581_s4, %s3511_s13 }
  0x56   : > { %407 = vmatpush.msra.mxu0 %v360_v3  ;;  %3632 = vrot.lane.b32.xlu2 %v4428_v35, %s4229_s24 }
  0x57   : > { %3622 = vrot.lane.b32.xlu0 %v3621_v9, %s4227_s20 }
  0x58   : > { %408 = vmatpush.msra.mxu0 %v359_v7 }
  0x5a   : > { %409 = vmatpush.msra.mxu0 %v358_v8  ;;  %3627 = vrot.lane.b32.xlu1 %v4416_v27, %s4229_s24 }
  0x5b   : > { %3387 = vmatmul.msk.f32.vlgmr.msra.gmra.mxu0 %vm5585_vm0, %v293_v10 }
  0x63   : > { %3388 = vmatmul.msk.f32.gmra.mxu0 %vm5585_vm0, %v294_v11 }
  0x6b   : > { %3389 = vmatmul.msk.f32.gmra.mxu0 %vm5585_vm0, %v295_v12 }
  0x73   : > { %3390 = vmatmul.msk.f32.gmra.mxu0 %vm5585_vm0, %v296_v13 }
  0x7b   : > { %3391 = vmatmul.msk.f32.gmra.mxu0 %vm5585_vm0, %v297_v14 }
  0x83   : > { %3392 = vmatmul.msk.f32.gmra.mxu0 %vm5585_vm0, %v298_v15 }
  0x8b   : > { %3393 = vmatmul.msk.f32.gmra.mxu0 %vm5585_vm0, %v299_v16 }
  0x93   : > { %3394 = vmatmul.msk.f32.gmra.mxu0 %vm5585_vm0, %v300_v17 }
  0xb0   : > { %v3633_v7 = vpop.permute.xlu2 %3632 }
  0xb1   : > { %v4463_v10 = vunpack.i.l.bf16 %v3633_v7 }
  0xc1   : > { %v3618_v21 = vpop.permute.xlu0 %3617 }
  0xc2   : > { %v3619_v22 = vunpack.i.l.bf16 %v3618_v21  ;;  %v3620_v23 = vunpack.i.h.bf16 %v3618_v21 }
  0xc4   : > { %495 = vmatpush.msra.mxu1 %v3619_v22  ;;  %v456_v54 = vpop.permute.xlu1 %455  ;;  %v4481_v22 = vunpack.i.h.bf16 %v3633_v7 }
  0xc6   : > { %496 = vmatpush.msra.mxu1 %v3620_v23 }
  0xc9   : > { %v3623_v28 = vpop.permute.xlu0 %3622 }
  0xca   : > { %v3624_v29 = vunpack.i.l.bf16 %v3623_v28  ;;  %v3625_v30 = vunpack.i.h.bf16 %v3623_v28 }
  0xcc   : > { %497 = vmatpush.msra.mxu1 %v3624_v29  ;;  %v3628_v56 = vpop.permute.xlu1 %3627 }
  0xcd   : > { %v4441_v59 = vunpack.i.l.bf16 %v3628_v56  ;;  %v4451_v1 = vunpack.i.h.bf16 %v3628_v56 }
  0xce   : > { %498 = vmatpush.msra.mxu1 %v3625_v30 }
  0xd8   : > { %v411_v31 = vpop.f32.mrf.mxu0 }
  0xd9   : > { %v412_v32 = vadd.f32 %v3906_v18, %v411_v31 }
  0xdb   : > { %3395 = vmatmul.msk.f32.vlgmr.msra.gmra.mxu1 %vm5586_vm7, %v412_v32 }
  0xe0   : > { %v414_v36 = vpop.f32.mrf.mxu0 }
  0xe1   : > { %v415_v37 = vadd.f32 %v3906_v18, %v414_v36 }
  0xe3   : > { %3396 = vmatmul.msk.f32.gmra.mxu1 %vm5586_vm7, %v415_v37 }
  0xe8   : > { %v417_v38 = vpop.f32.mrf.mxu0 }
  0xe9   : > { %v418_v39 = vadd.f32 %v3906_v18, %v417_v38 }
  0xeb   : > { %3397 = vmatmul.msk.f32.gmra.mxu1 %vm5586_vm7, %v418_v39 }
  0xf0   : > { %v420_v40 = vpop.f32.mrf.mxu0 }
  0xf1   : > { %v421_v41 = vadd.f32 %v3906_v18, %v420_v40 }
  0xf3   : > { %3398 = vmatmul.msk.f32.gmra.mxu1 %vm5586_vm7, %v421_v41 }
  0xf8   : > { %v423_v42 = vpop.f32.mrf.mxu0 }
  0xf9   : > { %v424_v43 = vadd.f32 %v3906_v18, %v423_v42 }
  0xfb   : > { %3399 = vmatmul.msk.f32.gmra.mxu1 %vm5586_vm7, %v424_v43 }
 0x100   : > { %v426_v44 = vpop.f32.mrf.mxu0 }
 0x101   : > { %v427_v45 = vadd.f32 %v3906_v18, %v426_v44 }
 0x103   : > { %3400 = vmatmul.msk.f32.gmra.mxu1 %vm5586_vm7, %v427_v45 }
 0x108   : > { %v429_v46 = vpop.f32.mrf.mxu0 }
 0x109   : > { %v430_v47 = vadd.f32 %v3906_v18, %v429_v46 }
 0x10b   : > { %3401 = vmatmul.msk.f32.gmra.mxu1 %vm5586_vm7, %v430_v47 }
 0x110   : > { %v432_v48 = vpop.f32.mrf.mxu0 }
 0x111   : > { %v433_v49 = vadd.f32 %v3906_v18, %v432_v48 }
 0x113   : > { %3402 = vmatmul.msk.f32.gmra.mxu1 %vm5586_vm7, %v433_v49 }
 0x158   : > { %v500_v50 = vpop.f32.mrf.mxu1 }
 0x159   : > { %v4498_v36 = vadd.f32 %v500_v50, %v456_v54 }
 0x15b   : > { %v739_v40 = vmul.f32 %v4451_v1, %v4498_v36  ;;  %v603_v41 = vmul.f32 %v4441_v59, %v4498_v36  ;;  %v535_v42 = vmul.f32 %v4463_v10, %v4498_v36 }
 0x160   : > { %v503_v51 = vpop.f32.mrf.mxu1 }
 0x161   : > { %v4496_v31 = vadd.f32 %v503_v51, %v456_v54 }
 0x163   : > { %v740_v37 = vmul.f32 %v4451_v1, %v4496_v31  ;;  %v604_v38 = vmul.f32 %v4441_v59, %v4496_v31  ;;  %v536_v39 = vmul.f32 %v4463_v10, %v4496_v31 }
 0x165   : > { %v814_v43 = vpack.c.bf16 %v740_v37, %v739_v40  ;;  %v806_v44 = vpack.c.bf16 %v604_v38, %v603_v41  ;;  %v802_v45 = vpack.c.bf16 %v536_v39, %v535_v42 }
 0x168   : > { %v506_v52 = vpop.f32.mrf.mxu1 }
 0x169   : > { %v4453_v2 = vadd.f32 %v506_v52, %v456_v54 }
 0x16b   : > { %v741_v5 = vmul.f32 %v4451_v1, %v4453_v2  ;;  %v605_v29 = vmul.f32 %v4441_v59, %v4453_v2 }
 0x170   : > { %v509_v53 = vpop.f32.mrf.mxu1 }
 0x171   : > { %v4449_v63 = vadd.f32 %v509_v53, %v456_v54 }
 0x173   : > { %v742_v4 = vmul.f32 %v4451_v1, %v4449_v63  ;;  %v606_v25 = vmul.f32 %v4441_v59, %v4449_v63  ;;  %v674_v52 = vmul.f32 %v4481_v22, %v4449_v63  ;;  %v538_v53 = vmul.f32 %v4463_v10, %v4449_v63 }
 0x175   : > { %v815_v6 = vpack.c.bf16 %v742_v4, %v741_v5  ;;  %v807_v33 = vpack.c.bf16 %v606_v25, %v605_v29 }
 0x178   : > { %v512_v55 = vpop.f32.mrf.mxu1 }
 0x179   : > { %v4439_v57 = vadd.f32 %v512_v55, %v456_v54  ;;  %v537_v55 = vmul.f32 %v4463_v10, %v4453_v2 }
 0x17b   : > { %v607_v61 = vmul.f32 %v4441_v59, %v4439_v57  ;;  %v743_v28 = vmul.f32 %v4451_v1, %v4439_v57  ;;  %v675_v30 = vmul.f32 %v4481_v22, %v4439_v57  ;;  %v539_v48 = vmul.f32 %v4463_v10, %v4439_v57 }
 0x180   : > { %v515_v58 = vpop.f32.mrf.mxu1 }
 0x181   : > { %v4443_v60 = vadd.f32 %v515_v58, %v456_v54  ;;  %v803_v58 = vpack.c.bf16 %v538_v53, %v537_v55 }
 0x183   : > { %v608_v62 = vmul.f32 %v4441_v59, %v4443_v60  ;;  %v744_v23 = vmul.f32 %v4451_v1, %v4443_v60  ;;  %v676_v26 = vmul.f32 %v4481_v22, %v4443_v60  ;;  %v540_v46 = vmul.f32 %v4463_v10, %v4443_v60 }
 0x185   : > { %v808_v0 = vpack.c.bf16 %v608_v62, %v607_v61  ;;  %v816_v32 = vpack.c.bf16 %v744_v23, %v743_v28  ;;  %v812_v34 = vpack.c.bf16 %v676_v26, %v675_v30  ;;  %v804_v50 = vpack.c.bf16 %v540_v46, %v539_v48 }
 0x186   : > { %v671_v61 = vmul.f32 %v4481_v22, %v4498_v36 }
 0x187   : > { %846 = vrot.lane.b32.xlu1 %v808_v0, %s4227_s20 }
 0x188   : > { %v518_v3 = vpop.f32.mrf.mxu1 }
 0x189   : > { %v4460_v8 = vadd.f32 %v518_v3, %v456_v54 }
 0x18b   : > { %v745_v12 = vmul.f32 %v4451_v1, %v4460_v8  ;;  %v609_v13 = vmul.f32 %v4441_v59, %v4460_v8  ;;  %v541_v16 = vmul.f32 %v4463_v10, %v4460_v8  ;;  %v677_v49 = vmul.f32 %v4481_v22, %v4460_v8 }
 0x18f   : > { %860 = vrot.lane.b32.xlu1 %v815_v6, %s4227_s20 }
 0x190   : > { %v521_v9 = vpop.f32.mrf.mxu1 }
 0x191   : > { %v4465_v11 = vadd.f32 %v521_v9, %v456_v54  ;;  %v673_v54 = vmul.f32 %v4481_v22, %v4453_v2 }
 0x193   : > { %v746_v14 = vmul.f32 %v4451_v1, %v4465_v11  ;;  %v610_v15 = vmul.f32 %v4441_v59, %v4465_v11  ;;  %v542_v17 = vmul.f32 %v4463_v10, %v4465_v11  ;;  %v678_v47 = vmul.f32 %v4481_v22, %v4465_v11 }
 0x194   : > { %v811_v56 = vpack.c.bf16 %v674_v52, %v673_v54 }
 0x195   : > { %v817_v18 = vpack.c.bf16 %v746_v14, %v745_v12  ;;  %v809_v19 = vpack.c.bf16 %v610_v15, %v609_v13  ;;  %v805_v21 = vpack.c.bf16 %v542_v17, %v541_v16  ;;  %v813_v51 = vpack.c.bf16 %v678_v47, %v677_v49 }
 0x197   : > { %864 = vrot.lane.b32.xlu0 %v817_v18, %s4227_s20  ;;  %848 = vrot.lane.b32.xlu2 %v809_v19, %s4227_s20 }
 0x198   : > { %840 = vrot.lane.b32.xlu1 %v805_v21, %s4227_s20 }
 0x19f   : > { %862 = vrot.lane.b32.xlu2 %v816_v32, %s4227_s20  ;;  %844 = vrot.lane.b32.xlu0 %v807_v33, %s4227_s20 }
 0x1a0   : > { %854 = vrot.lane.b32.xlu1 %v812_v34, %s4227_s20 }
 0x1a7   : > { %858 = vrot.lane.b32.xlu0 %v814_v43, %s4227_s20  ;;  %842 = vrot.lane.b32.xlu2 %v806_v44, %s4227_s20 }
 0x1a8   : > { %834 = vrot.lane.b32.xlu1 %v802_v45, %s4227_s20 }
 0x1af   : > { %838 = vrot.lane.b32.xlu0 %v804_v50, %s4227_s20  ;;  %856 = vrot.lane.b32.xlu2 %v813_v51, %s4227_s20 }
 0x1b0   : > { %3642 = vrot.lane.b32.xlu1 %v4428_v35, %s4230_s10  ;;  %v672_v35 = vmul.f32 %v4481_v22, %v4496_v31 }
 0x1b2   : > { %v810_v62 = vpack.c.bf16 %v672_v35, %v671_v61 }
 0x1b7   : > { %852 = vrot.lane.b32.xlu0 %v811_v56, %s4227_s20  ;;  %836 = vrot.lane.b32.xlu2 %v803_v58, %s4227_s20 }
 0x1bf   : > { %3637 = vrot.lane.b32.xlu0 %v4416_v27, %s4230_s10  ;;  %850 = vrot.lane.b32.xlu2 %v810_v62, %s4227_s20 }
 0x1f1   : > { %v849_v0 = vpop.permute.xlu2 %848 }
 0x1f2   : > { %v900_v3 = vsel %vm5586_vm7, %v849_v0, 0 }
 0x1f3   : > { %926 = vmatpush.bf16.xpose.msra.mxu2 %v900_v3 }
 0x1f9   : > { %v847_v4 = vpop.permute.xlu1 %846  ;;  %v863_v9 = vpop.permute.xlu2 %862 }
 0x1fa   : > { %v897_v5 = vsel %vm5586_vm7, %v847_v4, 0  ;;  %v921_v27 = vsel %vm5586_vm7, %v863_v9, 0 }
 0x1fb   : > { %927 = vmatpush.bf16.xpose.msra.mxu2 %v897_v5 }
 0x201   : > { %v861_v14 = vpop.permute.xlu1 %860  ;;  %v843_v15 = vpop.permute.xlu2 %842 }
 0x202   : > { %v891_v17 = vsel %vm5586_vm7, %v843_v15, 0  ;;  %v918_v18 = vsel %vm5586_vm7, %v861_v14, 0 }
 0x209   : > { %v865_v6 = vpop.permute.xlu0 %864  ;;  %v857_v26 = vpop.permute.xlu2 %856 }
 0x20a   : > { %v924_v7 = vsel %vm5586_vm7, %v865_v6, 0  ;;  %v841_v19 = vpop.permute.xlu1 %840  ;;  %v912_v32 = vsel %vm5586_vm7, %v857_v26, 0  ;;  %v798_v6 = vpack.c.bf16 %v4496_v31, %v4498_v36 }
 0x20b   : > { %955 = vmatpush.bf16.xpose.msra.mxu3 %v924_v7  ;;  %v888_v23 = vsel %vm5586_vm7, %v841_v19, 0 }
 0x211   : > { %v845_v12 = vpop.permute.xlu0 %844  ;;  %v837_v33 = vpop.permute.xlu2 %836 }
 0x212   : > { %v894_v13 = vsel %vm5586_vm7, %v845_v12, 0  ;;  %v855_v28 = vpop.permute.xlu1 %854  ;;  %v882_v40 = vsel %vm5586_vm7, %v837_v33, 0 }
 0x213   : > { %928 = vmatpush.bf16.xpose.msra.mxu2 %v894_v13  ;;  %956 = vmatpush.bf16.xpose.msra.mxu3 %v921_v27  ;;  %v909_v41 = vsel %vm5586_vm7, %v855_v28, 0 }
 0x219   : > { %v859_v16 = vpop.permute.xlu0 %858  ;;  %v851_v62 = vpop.permute.xlu2 %850 }
 0x21a   : > { %v915_v25 = vsel %vm5586_vm7, %v859_v16, 0  ;;  %v835_v37 = vpop.permute.xlu1 %834  ;;  %v903_v7 = vsel %vm5586_vm7, %v851_v62, 0 }
 0x21b   : > { %929 = vmatpush.bf16.xpose.msra.mxu2 %v891_v17  ;;  %957 = vmatpush.bf16.xpose.msra.mxu3 %v918_v18  ;;  %v879_v51 = vsel %vm5586_vm7, %v835_v37, 0 }
 0x221   : > { %v839_v21 = vpop.permute.xlu0 %838 }
 0x222   : > { %v885_v30 = vsel %vm5586_vm7, %v839_v21, 0  ;;  %v3643_v61 = vpop.permute.xlu1 %3642 }
 0x223   : > { %930 = vmatpush.bf16.xpose.msra.mxu2 %v888_v23  ;;  %958 = vmatpush.bf16.xpose.msra.mxu3 %v915_v25  ;;  %v3644_v4 = vunpack.i.l.bf16 %v3643_v61  ;;  %v3645_v16 = vunpack.i.h.bf16 %v3643_v61 }
 0x225   : > { %v552_v14 = vmul.f32 %v3644_v4, %v4460_v8  ;;  %v553_v15 = vmul.f32 %v3644_v4, %v4465_v11  ;;  %v688_v21 = vmul.f32 %v3645_v16, %v4460_v8  ;;  %v689_v23 = vmul.f32 %v3645_v16, %v4465_v11 }
 0x226   : > { %v550_v25 = vmul.f32 %v3644_v4, %v4439_v57  ;;  %v551_v26 = vmul.f32 %v3644_v4, %v4443_v60  ;;  %v686_v28 = vmul.f32 %v3645_v16, %v4439_v57  ;;  %v684_v37 = vmul.f32 %v3645_v16, %v4453_v2 }
 0x227   : > { %v3686_v19 = vpack.i.bf16 %v553_v15, %v552_v14 }
 0x229   : > { %v853_v29 = vpop.permute.xlu0 %852 }
 0x22a   : > { %v906_v52 = vsel %vm5586_vm7, %v853_v29, 0  ;;  %v687_v29 = vmul.f32 %v3645_v16, %v4443_v60 }
 0x22b   : > { %931 = vmatpush.bf16.xpose.msra.mxu2 %v885_v30  ;;  %959 = vmatpush.bf16.xpose.msra.mxu3 %v912_v32  ;;  %v3691_v30 = vpack.i.bf16 %v689_v23, %v688_v21  ;;  %v3696_v32 = vpack.i.bf16 %v551_v26, %v550_v25 }
 0x22c   : > { %v3701_v33 = vpack.i.bf16 %v687_v29, %v686_v28 }
 0x231   : > { %v3638_v34 = vpop.permute.xlu0 %3637 }
 0x232   : > { %v3640_v38 = vunpack.i.h.bf16 %v3638_v34  ;;  %v3639_v39 = vunpack.i.l.bf16 %v3638_v34  ;;  %v799_v34 = vpack.c.bf16 %v4449_v63, %v4453_v2 }
 0x233   : > { %932 = vmatpush.bf16.xpose.msra.mxu2 %v882_v40  ;;  %960 = vmatpush.bf16.xpose.msra.mxu3 %v909_v41  ;;  %v549_v40 = vmul.f32 %v3644_v4, %v4449_v63  ;;  %v546_v41 = vmul.f32 %v3644_v4, %v4498_v36 }
 0x234   : > { %v756_v42 = vmul.f32 %v3640_v38, %v4460_v8  ;;  %v757_v43 = vmul.f32 %v3640_v38, %v4465_v11  ;;  %v620_v44 = vmul.f32 %v3639_v39, %v4460_v8  ;;  %v621_v45 = vmul.f32 %v3639_v39, %v4465_v11 }
 0x235   : > { %v618_v46 = vmul.f32 %v3639_v39, %v4439_v57  ;;  %v619_v47 = vmul.f32 %v3639_v39, %v4443_v60  ;;  %v616_v53 = vmul.f32 %v3639_v39, %v4453_v2  ;;  %v617_v54 = vmul.f32 %v3639_v39, %v4449_v63 }
 0x236   : > { %v3651_v48 = vpack.i.bf16 %v757_v43, %v756_v42  ;;  %v3646_v49 = vpack.i.bf16 %v621_v45, %v620_v44  ;;  %v754_v55 = vmul.f32 %v3640_v38, %v4439_v57  ;;  %v755_v56 = vmul.f32 %v3640_v38, %v4443_v60  ;;  %v4613_v43 = vld [vmem:[%s4371_s7] sm:$0xff]  }
 0x237   : > { %v3656_v50 = vpack.i.bf16 %v619_v47, %v618_v46  ;;  %v752_v58 = vmul.f32 %v3640_v38, %v4453_v2  ;;  %v753_v35 = vmul.f32 %v3640_v38, %v4449_v63  ;;  %v3666_v0 = vpack.i.bf16 %v617_v54, %v616_v53  ;;  %v4616_v46 = vld [vmem:[%s4371_s7 + $0x8] sm:$0xff]   ;;  %v4637_v54 = vld [vmem:[%s4371_s7 + $0x18] sm:$0xff]  }
 0x238   : > { %3652 = vrot.lane.b32.xlu0 %v3651_v48, %s4230_s10  ;;  %3647 = vrot.lane.b32.xlu2 %v3646_v49, %s4230_s10  ;;  %v3661_v3 = vpack.i.bf16 %v755_v56, %v754_v55  ;;  %v750_v9 = vmul.f32 %v3640_v38, %v4498_v36  ;;  %v751_v12 = vmul.f32 %v3640_v38, %v4496_v31  ;;  %v3518_v48 = vunpack.c.l.bf16 %v4616_v46 }
 0x239   : > { %3657 = vrot.lane.b32.xlu1 %v3656_v50, %s4230_s10  ;;  %v3671_v5 = vpack.i.bf16 %v753_v35, %v752_v58  ;;  %v614_v13 = vmul.f32 %v3639_v39, %v4498_v36  ;;  %v615_v27 = vmul.f32 %v3639_v39, %v4496_v31  ;;  %v685_v38 = vmul.f32 %v3645_v16, %v4449_v63 }
 0x23a   : > { %v3681_v17 = vpack.i.bf16 %v751_v12, %v750_v9  ;;  %v548_v39 = vmul.f32 %v3644_v4, %v4453_v2  ;;  %v547_v42 = vmul.f32 %v3644_v4, %v4496_v31  ;;  %v3514_v2 = vunpack.c.l.bf16 %v4613_v43 }
 0x23b   : > { %933 = vmatpush.bf16.xpose.msra.mxu2 %v879_v51  ;;  %961 = vmatpush.bf16.xpose.msra.mxu3 %v906_v52  ;;  %v3676_v18 = vpack.i.bf16 %v615_v27, %v614_v13  ;;  %v3711_v44 = vpack.i.bf16 %v685_v38, %v684_v37  ;;  %v3515_v63 = vunpack.c.h.bf16 %v4613_v43  ;;  %v3519_v49 = vunpack.c.h.bf16 %v4616_v46 }
 0x23c   : > { %v3706_v45 = vpack.i.bf16 %v549_v40, %v548_v39  ;;  %v3716_v47 = vpack.i.bf16 %v547_v42, %v546_v41  ;;  %v682_v50 = vmul.f32 %v3645_v16, %v4498_v36  ;;  %v683_v51 = vmul.f32 %v3645_v16, %v4496_v31 }
 0x23d   : > { %v3726_v52 = vpack.i.bf16 %v3515_v63, %v3514_v2  ;;  %v3731_v53 = vpack.i.bf16 %v3519_v49, %v3518_v48  ;;  %v800_v31 = vpack.c.bf16 %v4443_v60, %v4439_v57  ;;  %v3526_v36 = vunpack.c.l.bf16 %v4637_v54  ;;  %v4657_v60 = vld [vmem:[%s4371_s7 + $0x10] sm:$0xff]  }
 0x23e   : > { %v3721_v55 = vpack.i.bf16 %v683_v51, %v682_v50  ;;  %v3527_v56 = vunpack.c.h.bf16 %v4637_v54  ;;  %v801_v57 = vpack.c.bf16 %v4465_v11, %v4460_v8  ;;  %v3522_v35 = vunpack.c.l.bf16 %v4657_v60 }
 0x23f   : > { %v3523_v61 = vunpack.c.h.bf16 %v4657_v60 }
 0x240   : > { %3667 = vrot.lane.b32.xlu0 %v3666_v0, %s4230_s10  ;;  %3662 = vrot.lane.b32.xlu2 %v3661_v3, %s4230_s10  ;;  %v3741_v58 = vpack.i.bf16 %v3527_v56, %v3526_v36 }
 0x241   : > { %3672 = vrot.lane.b32.xlu1 %v3671_v5, %s4230_s10  ;;  %v3736_v62 = vpack.i.bf16 %v3523_v61, %v3522_v35 }
 0x242   : > { %3407 = vmatmul.msk.bf16.vlgmr.msra.gmra.mxu2 %vm5586_vm7, %v798_v6 }
 0x243   : > { %962 = vmatpush.bf16.xpose.msra.mxu3 %v903_v7 }
 0x248   : > { %3682 = vrot.lane.b32.xlu0 %v3681_v17, %s4230_s10  ;;  %3677 = vrot.lane.b32.xlu2 %v3676_v18, %s4230_s10 }
 0x249   : > { %3687 = vrot.lane.b32.xlu1 %v3686_v19, %s4230_s10 }
 0x24a   : > { %3411 = vmatmul.msk.bf16.vlgmr.msra.gmra.mxu3 %vm5586_vm7, %v798_v6 }
 0x250   : > { %3692 = vrot.lane.b32.xlu2 %v3691_v30, %s4230_s10  ;;  %3697 = vrot.lane.b32.xlu0 %v3696_v32, %s4230_s10 }
 0x251   : > { %3702 = vrot.lane.b32.xlu1 %v3701_v33, %s4230_s10 }
 0x252   : > { %3408 = vmatmul.msk.bf16.gmra.mxu2 %vm5586_vm7, %v799_v34 }
 0x258   : > { %3712 = vrot.lane.b32.xlu0 %v3711_v44, %s4230_s10  ;;  %3707 = vrot.lane.b32.xlu2 %v3706_v45, %s4230_s10 }
 0x259   : > { %3717 = vrot.lane.b32.xlu1 %v3716_v47, %s4230_s10 }
 0x25a   : > { %3412 = vmatmul.msk.bf16.gmra.mxu3 %vm5586_vm7, %v799_v34 }
 0x260   : > { %3727 = vrot.lane.b32.xlu0 %v3726_v52, %s4230_s10  ;;  %3722 = vrot.lane.b32.xlu2 %v3721_v55, %s4230_s10 }
 0x261   : > { %3732 = vrot.lane.b32.xlu1 %v3731_v53, %s4230_s10 }
 0x262   : > { %3409 = vmatmul.msk.bf16.gmra.mxu2 %vm5586_vm7, %v800_v31 }
 0x268   : > { %3742 = vrot.lane.b32.xlu0 %v3741_v58, %s4230_s10  ;;  %3737 = vrot.lane.b32.xlu2 %v3736_v62, %s4230_s10 }
 0x26a   : > { %3413 = vmatmul.msk.bf16.gmra.mxu3 %vm5586_vm7, %v800_v31 }
 0x272   : > { %3410 = vmatmul.msk.bf16.gmra.mxu2 %vm5586_vm7, %v801_v57 }
 0x27a   : > { %3414 = vmatmul.msk.bf16.gmra.mxu3 %vm5586_vm7, %v801_v57 }
 0x292   : > { %v3648_v0 = vpop.permute.xlu2 %3647 }
 0x293   : > { %v3650_v3 = vunpack.i.h.bf16 %v3648_v0  ;;  %v3649_v8 = vunpack.i.l.bf16 %v3648_v0 }
 0x295   : > { %v660_v11 = vsel %vm5586_vm7, %v3649_v8, %v4441_v59  ;;  %v661_v4 = vsel %vm5586_vm7, %v3650_v3, %v4441_v59 }
 0x296   : > { %v1079_v5 = vpack.c.bf16 %v661_v4, %v660_v11 }
 0x298   : > { %1088 = vmatpush.bf16.msrb.mxu1 %v1079_v5 }
 0x29a   : > { %v3663_v6 = vpop.permute.xlu2 %3662 }
 0x29b   : > { %v3665_v9 = vunpack.i.h.bf16 %v3663_v6  ;;  %v3664_v12 = vunpack.i.l.bf16 %v3663_v6 }
 0x29d   : > { %v794_v28 = vsel %vm5586_vm7, %v3664_v12, %v4451_v1  ;;  %v795_v29 = vsel %vm5586_vm7, %v3665_v9, %v4451_v1 }
 0x29e   : > { %v1086_v32 = vpack.c.bf16 %v795_v29, %v794_v28 }
 0x2a2   : > { %v3678_v13 = vpop.permute.xlu2 %3677 }
 0x2a3   : > { %v3680_v33 = vunpack.i.h.bf16 %v3678_v13  ;;  %v3679_v34 = vunpack.i.l.bf16 %v3678_v13 }
 0x2a5   : > { %v654_v53 = vsel %vm5586_vm7, %v3679_v34, %v4441_v59  ;;  %v655_v55 = vsel %vm5586_vm7, %v3680_v33, %v4441_v59 }
 0x2a6   : > { %v1076_v58 = vpack.c.bf16 %v655_v55, %v654_v53 }
 0x2aa   : > { %v3653_v7 = vpop.permute.xlu0 %3652  ;;  %v3693_v42 = vpop.permute.xlu2 %3692 }
 0x2ab   : > { %v3655_v27 = vunpack.i.h.bf16 %v3653_v7  ;;  %v3654_v14 = vunpack.i.l.bf16 %v3653_v7  ;;  %v3658_v15 = vpop.permute.xlu1 %3657  ;;  %v3695_v57 = vunpack.i.h.bf16 %v3693_v42  ;;  %v3694_v62 = vunpack.i.l.bf16 %v3693_v42 }
 0x2ac   : > { %v3660_v16 = vunpack.i.h.bf16 %v3658_v15  ;;  %v3659_v17 = vunpack.i.l.bf16 %v3658_v15 }
 0x2ad   : > { %v796_v18 = vsel %vm5586_vm7, %v3654_v14, %v4451_v1  ;;  %v797_v19 = vsel %vm5586_vm7, %v3655_v27, %v4451_v1  ;;  %v728_v27 = vsel %vm5586_vm7, %v3694_v62, %v4481_v22  ;;  %v729_v14 = vsel %vm5586_vm7, %v3695_v57, %v4481_v22 }
 0x2ae   : > { %v658_v21 = vsel %vm5586_vm7, %v3659_v17, %v4441_v59  ;;  %v659_v23 = vsel %vm5586_vm7, %v3660_v16, %v4441_v59  ;;  %v1087_v25 = vpack.c.bf16 %v797_v19, %v796_v18  ;;  %v1083_v16 = vpack.c.bf16 %v729_v14, %v728_v27 }
 0x2af   : > { %v1078_v26 = vpack.c.bf16 %v659_v23, %v658_v21 }
 0x2b0   : > { %1117 = vmatpush.bf16.msrb.mxu0 %v1087_v25 }
 0x2b1   : > { %1089 = vmatpush.bf16.msrb.mxu1 %v1078_v26 }
 0x2b2   : > { %v3668_v30 = vpop.permute.xlu0 %3667  ;;  %v3708_v12 = vpop.permute.xlu2 %3707 }
 0x2b3   : > { %v3670_v37 = vunpack.i.h.bf16 %v3668_v30  ;;  %v3669_v38 = vunpack.i.l.bf16 %v3668_v30  ;;  %v3673_v39 = vpop.permute.xlu1 %3672  ;;  %v3709_v17 = vunpack.i.l.bf16 %v3708_v12 }
 0x2b4   : > { %v3675_v40 = vunpack.i.h.bf16 %v3673_v39  ;;  %v3674_v41 = vunpack.i.l.bf16 %v3673_v39  ;;  %1118 = vmatpush.bf16.msrb.mxu0 %v1086_v32 }
 0x2b5   : > { %v656_v44 = vsel %vm5586_vm7, %v3669_v38, %v4441_v59  ;;  %v657_v45 = vsel %vm5586_vm7, %v3670_v37, %v4441_v59  ;;  %v588_v37 = vsel %vm5586_vm7, %v3709_v17, %v4463_v10 }
 0x2b6   : > { %v1077_v47 = vpack.c.bf16 %v657_v45, %v656_v44  ;;  %v792_v50 = vsel %vm5586_vm7, %v3674_v41, %v4451_v1  ;;  %v793_v51 = vsel %vm5586_vm7, %v3675_v40, %v4451_v1 }
 0x2b7   : > { %v1085_v52 = vpack.c.bf16 %v793_v51, %v792_v50 }
 0x2b8   : > { %1090 = vmatpush.bf16.msrb.mxu1 %v1077_v47 }
 0x2b9   : > { %1119 = vmatpush.bf16.msrb.mxu0 %v1085_v52 }
 0x2ba   : > { %v3683_v31 = vpop.permute.xlu0 %3682  ;;  %v3723_v39 = vpop.permute.xlu2 %3722 }
 0x2bb   : > { %v3685_v0 = vunpack.i.h.bf16 %v3683_v31  ;;  %v3684_v3 = vunpack.i.l.bf16 %v3683_v31  ;;  %v3688_v8 = vpop.permute.xlu1 %3687  ;;  %v3725_v50 = vunpack.i.h.bf16 %v3723_v39  ;;  %v3724_v51 = vunpack.i.l.bf16 %v3723_v39 }
 0x2bc   : > { %v3690_v11 = vunpack.i.h.bf16 %v3688_v8  ;;  %v3689_v4 = vunpack.i.l.bf16 %v3688_v8  ;;  %1091 = vmatpush.bf16.msrb.mxu1 %v1076_v58 }
 0x2bd   : > { %v790_v5 = vsel %vm5586_vm7, %v3684_v3, %v4451_v1  ;;  %v791_v6 = vsel %vm5586_vm7, %v3685_v0, %v4451_v1  ;;  %v3710_v1 = vunpack.i.h.bf16 %v3708_v12 }
 0x2be   : > { %v592_v59 = vsel %vm5586_vm7, %v3689_v4, %v4463_v10  ;;  %v593_v7 = vsel %vm5586_vm7, %v3690_v11, %v4463_v10  ;;  %v1084_v9 = vpack.c.bf16 %v791_v6, %v790_v5  ;;  %v722_v6 = vsel %vm5586_vm7, %v3724_v51, %v4481_v22 }
 0x2bf   : > { %v1075_v13 = vpack.c.bf16 %v593_v7, %v592_v59  ;;  %v589_v38 = vsel %vm5586_vm7, %v3710_v1, %v4463_v10  ;;  %v723_v59 = vsel %vm5586_vm7, %v3725_v50, %v4481_v22 }
 0x2c0   : > { %1120 = vmatpush.bf16.msrb.mxu0 %v1084_v9  ;;  %v1073_v42 = vpack.c.bf16 %v589_v38, %v588_v37  ;;  %v1080_v27 = vpack.c.bf16 %v723_v59, %v722_v6 }
 0x2c1   : > { %1092 = vmatpush.bf16.msrb.mxu1 %v1075_v13 }
 0x2c2   : > { %v3698_v15 = vpop.permute.xlu0 %3697 }
 0x2c3   : > { %v3703_v18 = vpop.permute.xlu1 %3702  ;;  %v3700_v19 = vunpack.i.h.bf16 %v3698_v15  ;;  %v3699_v21 = vunpack.i.l.bf16 %v3698_v15 }
 0x2c4   : > { %v3705_v23 = vunpack.i.h.bf16 %v3703_v18  ;;  %v3704_v25 = vunpack.i.l.bf16 %v3703_v18  ;;  %1121 = vmatpush.bf16.msrb.mxu0 %v1083_v16 }
 0x2c5   : > { %v935_v26 = vpop.f32.mrf.mxu2  ;;  %v590_v28 = vsel %vm5586_vm7, %v3699_v21, %v4463_v10  ;;  %v591_v29 = vsel %vm5586_vm7, %v3700_v19, %v4463_v10 }
 0x2c6   : > { %v1074_v30 = vpack.c.bf16 %v591_v29, %v590_v28  ;;  %v726_v32 = vsel %vm5586_vm7, %v3704_v25, %v4481_v22  ;;  %v727_v33 = vsel %vm5586_vm7, %v3705_v23, %v4481_v22  ;;  %v3415_v40 = vclamps-f32 %v935_v26, 5.0 }
 0x2c7   : > { %v1082_v34 = vpack.c.bf16 %v727_v33, %v726_v32 }
 0x2c8   : > { %1093 = vmatpush.bf16.msrb.mxu1 %v1074_v30  ;;  %v1016_v55 = vmul.f32 1.442695, %v3415_v40 }
 0x2c9   : > { %1122 = vmatpush.bf16.msrb.mxu0 %v1082_v34 }
 0x2ca   : > { %v3713_v41 = vpop.permute.xlu0 %3712  ;;  %3909 = vpow2.f32 %v1016_v55 }
 0x2cb   : > { %v3715_v44 = vunpack.i.h.bf16 %v3713_v41  ;;  %v3714_v45 = vunpack.i.l.bf16 %v3713_v41  ;;  %v3718_v47 = vpop.permute.xlu1 %3717 }
 0x2cc   : > { %v3720_v52 = vunpack.i.h.bf16 %v3718_v47  ;;  %v3719_v53 = vunpack.i.l.bf16 %v3718_v47  ;;  %1094 = vmatpush.bf16.msrb.mxu1 %v1073_v42 }
 0x2cd   : > { %v937_v31 = vpop.f32.mrf.mxu2  ;;  %v964_v58 = vpop.f32.mrf.mxu3  ;;  %v724_v57 = vsel %vm5586_vm7, %v3714_v45, %v4481_v22  ;;  %v725_v62 = vsel %vm5586_vm7, %v3715_v44, %v4481_v22 }
 0x2ce   : > { %v3417_v0 = vclamps-f32 %v937_v31, 5.0  ;;  %v586_v3 = vsel %vm5586_vm7, %v3719_v53, %v4463_v10  ;;  %v587_v8 = vsel %vm5586_vm7, %v3720_v52, %v4463_v10  ;;  %v1081_v4 = vpack.c.bf16 %v725_v62, %v724_v57 }
 0x2cf   : > { %v1072_v11 = vpack.c.bf16 %v587_v8, %v586_v3  ;;  %v3416_v7 = vclamps-f32 %v964_v58, 5.0 }
 0x2d0   : > { %v1020_v5 = vmul.f32 1.442695, %v3417_v0  ;;  %1123 = vmatpush.bf16.msrb.mxu0 %v1081_v4  ;;  %v3910_v17 = vpop.eup %3909 }
 0x2d1   : > { %1095 = vmatpush.bf16.msrb.mxu1 %v1072_v11  ;;  %v1018_v14 = vmul.f32 1.442695, %v3416_v7 }
 0x2d2   : > { %3911 = vpow2.f32 %v1020_v5  ;;  %v3728_v9 = vpop.permute.xlu0 %3727 }
 0x2d3   : > { %v3730_v12 = vunpack.i.h.bf16 %v3728_v9  ;;  %v3729_v13 = vunpack.i.l.bf16 %v3728_v9  ;;  %3913 = vpow2.f32 %v1018_v14 }
 0x2d4   : > { %1124 = vmatpush.bf16.msrb.mxu0 %v1080_v27 }
 0x2d5   : > { %v940_v10 = vpop.f32.mrf.mxu2  ;;  %v966_v15 = vpop.f32.mrf.mxu3  ;;  %v4734_v16 = vsel %vm5585_vm0, %v3515_v63, %v3730_v12  ;;  %v4739_v22 = vsel %vm5585_vm0, %v3514_v2, %v3729_v13 }
 0x2d6   : > { %v3418_v1 = vclamps-f32 %v966_v15, 5.0  ;;  %v3419_v19 = vclamps-f32 %v940_v10, 5.0  ;;  %v1048_v23 = vmul.f32 %v3910_v17, %v4739_v22  ;;  %v3733_v2 = vpop.permute.xlu1 %3732 }
 0x2d7   : > { %v3735_v37 = vunpack.i.h.bf16 %v3733_v2  ;;  %v3734_v38 = vunpack.i.l.bf16 %v3733_v2 }
 0x2d8   : > { %v3912_v18 = vpop.eup %3911  ;;  %v1022_v21 = vmul.f32 1.442695, %v3418_v1  ;;  %v1024_v28 = vmul.f32 1.442695, %v3419_v19 }
 0x2d9   : > { %v1050_v25 = vmul.f32 %v3912_v18, %v4734_v16  ;;  %v3914_v30 = vpop.eup %3913  ;;  %v4748_v50 = vsel %vm5585_vm0, %v3519_v49, %v3735_v37  ;;  %v4753_v51 = vsel %vm5585_vm0, %v3518_v48, %v3734_v38  ;;  %v3738_v48 = vpop.permute.xlu2 %3737 }
 0x2da   : > { %3915 = vpow2.f32 %v1022_v21  ;;  %v1049_v39 = vmul.f32 %v3914_v30, %v4739_v22  ;;  %v3740_v6 = vunpack.i.h.bf16 %v3738_v48  ;;  %v3739_v59 = vunpack.i.l.bf16 %v3738_v48 }
 0x2db   : > { %v1064_v26 = vpack.c.bf16 %v1050_v25, %v1048_v23  ;;  %3917 = vpow2.f32 %v1024_v28 }
 0x2dc   : > { %v4762_v15 = vsel %vm5585_vm0, %v3523_v61, %v3740_v6  ;;  %v4767_v1 = vsel %vm5585_vm0, %v3522_v35, %v3739_v59  ;;  %v3743_v35 = vpop.permute.xlu0 %3742 }
 0x2dd   : > { %v942_v63 = vpop.f32.mrf.mxu2  ;;  %v969_v29 = vpop.f32.mrf.mxu3  ;;  %1096 = vmatmul.bf16.vlgmr.msrb.gmra.mxu1 %v1064_v26 }
 0x2de   : > { %v3421_v43 = vclamps-f32 %v942_v63, 5.0  ;;  %v3420_v34 = vclamps-f32 %v969_v29, 5.0 }
 0x2e0   : > { %v1028_v32 = vmul.f32 1.442695, %v3421_v43  ;;  %v3916_v33 = vpop.eup %3915  ;;  %v1026_v42 = vmul.f32 1.442695, %v3420_v34 }
 0x2e1   : > { %v1051_v40 = vmul.f32 %v3916_v33, %v4734_v16  ;;  %v3918_v47 = vpop.eup %3917  ;;  %v3744_v33 = vunpack.i.l.bf16 %v3743_v35 }
 0x2e2   : > { %3919 = vpow2.f32 %v1028_v32  ;;  %v1052_v58 = vmul.f32 %v3918_v47, %v4753_v51  ;;  %v3745_v32 = vunpack.i.h.bf16 %v3743_v35 }
 0x2e3   : > { %v1065_v41 = vpack.c.bf16 %v1051_v40, %v1049_v39  ;;  %3921 = vpow2.f32 %v1026_v42 }
 0x2e4   : > { %v4776_v42 = vsel %vm5585_vm0, %v3527_v56, %v3745_v32 }
 0x2e5   : > { %v945_v44 = vpop.f32.mrf.mxu2  ;;  %v971_v45 = vpop.f32.mrf.mxu3  ;;  %1125 = vmatmul.bf16.vlgmr.msrb.gmra.mxu0 %v1065_v41 }
 0x2e6   : > { %v3422_v52 = vclamps-f32 %v971_v45, 5.0  ;;  %v3423_v55 = vclamps-f32 %v945_v44, 5.0  ;;  %v4781_v44 = vsel %vm5585_vm0, %v3526_v36, %v3744_v33 }
 0x2e8   : > { %v3920_v53 = vpop.eup %3919  ;;  %v1030_v31 = vmul.f32 1.442695, %v3422_v52  ;;  %v1032_v0 = vmul.f32 1.442695, %v3423_v55 }
 0x2e9   : > { %v1054_v57 = vmul.f32 %v3920_v53, %v4748_v50  ;;  %v3922_v8 = vpop.eup %3921 }
 0x2ea   : > { %3923 = vpow2.f32 %v1030_v31  ;;  %v1053_v7 = vmul.f32 %v3922_v8, %v4753_v51 }
 0x2eb   : > { %v1066_v62 = vpack.c.bf16 %v1054_v57, %v1052_v58  ;;  %3925 = vpow2.f32 %v1032_v0 }
 0x2ed   : > { %v947_v49 = vpop.f32.mrf.mxu2  ;;  %v974_v3 = vpop.f32.mrf.mxu3  ;;  %1101 = vmatmul.bf16.gmra.mxu1 %v1066_v62 }
 0x2ee   : > { %v3425_v46 = vclamps-f32 %v947_v49, 5.0  ;;  %v3424_v5 = vclamps-f32 %v974_v3, 5.0 }
 0x2f0   : > { %v1036_v11 = vmul.f32 1.442695, %v3425_v46  ;;  %v3924_v4 = vpop.eup %3923  ;;  %v1034_v13 = vmul.f32 1.442695, %v3424_v5 }
 0x2f1   : > { %v1055_v9 = vmul.f32 %v3924_v4, %v4748_v50  ;;  %v3926_v10 = vpop.eup %3925 }
 0x2f2   : > { %3927 = vpow2.f32 %v1036_v11  ;;  %v1056_v23 = vmul.f32 %v3926_v10, %v4767_v1 }
 0x2f3   : > { %v1067_v12 = vpack.c.bf16 %v1055_v9, %v1053_v7  ;;  %3929 = vpow2.f32 %v1034_v13 }
 0x2f5   : > { %v950_v27 = vpop.f32.mrf.mxu2  ;;  %v976_v14 = vpop.f32.mrf.mxu3  ;;  %1130 = vmatmul.bf16.gmra.mxu0 %v1067_v12 }
 0x2f6   : > { %v3426_v17 = vclamps-f32 %v976_v14, 5.0  ;;  %v3427_v19 = vclamps-f32 %v950_v27, 5.0 }
 0x2f8   : > { %v3928_v18 = vpop.eup %3927  ;;  %v1038_v21 = vmul.f32 1.442695, %v3426_v17  ;;  %v1040_v28 = vmul.f32 1.442695, %v3427_v19 }
 0x2f9   : > { %v1058_v25 = vmul.f32 %v3928_v18, %v4762_v15  ;;  %v3930_v29 = vpop.eup %3929 }
 0x2fa   : > { %3931 = vpow2.f32 %v1038_v21  ;;  %v1057_v34 = vmul.f32 %v3930_v29, %v4767_v1 }
 0x2fb   : > { %v1068_v26 = vpack.c.bf16 %v1058_v25, %v1056_v23  ;;  %3933 = vpow2.f32 %v1040_v28 }
 0x2fd   : > { %v952_v61 = vpop.f32.mrf.mxu2  ;;  %v979_v63 = vpop.f32.mrf.mxu3  ;;  %1106 = vmatmul.bf16.gmra.mxu1 %v1068_v26 }
 0x2fe   : > { %v3429_v60 = vclamps-f32 %v952_v61, 5.0  ;;  %v3428_v30 = vclamps-f32 %v979_v63, 5.0 }
 0x300   : > { %v1044_v43 = vmul.f32 1.442695, %v3429_v60  ;;  %v3932_v2 = vpop.eup %3931  ;;  %v1042_v38 = vmul.f32 1.442695, %v3428_v30 }
 0x301   : > { %v1059_v37 = vmul.f32 %v3932_v2, %v4762_v15  ;;  %v3934_v41 = vpop.eup %3933 }
 0x302   : > { %3935 = vpow2.f32 %v1044_v43  ;;  %v1060_v53 = vmul.f32 %v3934_v41, %v4781_v44 }
 0x303   : > { %v1069_v39 = vpack.c.bf16 %v1059_v37, %v1057_v34  ;;  %3937 = vpow2.f32 %v1042_v38 }
 0x305   : > { %v981_v40 = vpop.f32.mrf.mxu3  ;;  %1135 = vmatmul.bf16.gmra.mxu0 %v1069_v39 }
 0x306   : > { %v3430_v45 = vclamps-f32 %v981_v40, 5.0 }
 0x308   : > { %v3936_v47 = vpop.eup %3935  ;;  %v1046_v52 = vmul.f32 1.442695, %v3430_v45 }
 0x309   : > { %v1062_v55 = vmul.f32 %v3936_v47, %v4776_v42  ;;  %v3938_v58 = vpop.eup %3937 }
 0x30a   : > { %3939 = vpow2.f32 %v1046_v52  ;;  %v1061_v57 = vmul.f32 %v3938_v58, %v4781_v44 }
 0x30b   : > { %v1070_v31 = vpack.c.bf16 %v1062_v55, %v1060_v53 }
 0x30d   : > { %1111 = vmatmul.bf16.gmra.mxu1 %v1070_v31 }
 0x310   : > { %v3940_v56 = vpop.eup %3939 }
 0x311   : > { %v1063_v54 = vmul.f32 %v3940_v56, %v4776_v42 }
 0x313   : > { %v1071_v36 = vpack.c.bf16 %v1063_v54, %v1061_v57 }
 0x315   : > { %1140 = vmatmul.bf16.gmra.mxu0 %v1071_v36 }
 0x35a   : > { %v1097_v62 = vpop.f32.mrf.mxu1 }
 0x362   : > { %v1099_v0 = vpop.f32.mrf.mxu1  ;;  %v1126_v49 = vpop.f32.mrf.mxu0 }
 0x363   : > { %v4787_v3 = vadd.f32 %v1126_v49, %v1097_v62 }
 0x365   : > { %vm1146_vm12 = vcmp.gt.f32.partialorder %v4787_v3, 0.0 }
 0x366   : > { %v1154_v46 = vsel %vm1146_vm12, %v4787_v3, 1.0 }
 0x367   : > { %1170 = vrot.lane.b32.xlu1 %v1154_v46, %s4227_s20 }
 0x36a   : > { %v1102_v8 = vpop.f32.mrf.mxu1  ;;  %v1128_v48 = vpop.f32.mrf.mxu0 }
 0x36b   : > { %v4794_v11 = vadd.f32 %v1128_v48, %v1099_v0 }
 0x36d   : > { %vm1147_vm13 = vcmp.gt.f32.partialorder %v4794_v11, 0.0 }
 0x36e   : > { %v1155_v4 = vsel %vm1147_vm13, %v4794_v11, 1.0 }
 0x36f   : > { %1172 = vrot.lane.b32.xlu2 %v1155_v4, %s4227_s20 }
 0x372   : > { %v1104_v5 = vpop.f32.mrf.mxu1  ;;  %v1131_v6 = vpop.f32.mrf.mxu0 }
 0x373   : > { %v4801_v59 = vadd.f32 %v1131_v6, %v1102_v8 }
 0x375   : > { %vm1148_vm14 = vcmp.gt.f32.partialorder %v4801_v59, 0.0 }
 0x376   : > { %v1156_v7 = vsel %vm1148_vm14, %v4801_v59, 1.0 }
 0x377   : > { %1174 = vrot.lane.b32.xlu0 %v1156_v7, %s4227_s20 }
 0x37a   : > { %v1133_v9 = vpop.f32.mrf.mxu0  ;;  %v1107_v13 = vpop.f32.mrf.mxu1 }
 0x37b   : > { %v4808_v12 = vadd.f32 %v1133_v9, %v1104_v5 }
 0x37d   : > { %vm1149_vm15 = vcmp.gt.f32.partialorder %v4808_v12, 0.0 }
 0x37e   : > { %v1157_v27 = vsel %vm1149_vm15, %v4808_v12, 1.0 }
 0x37f   : > { %1176 = vrot.lane.b32.xlu1 %v1157_v27, %s4227_s20 }
 0x382   : > { %v1136_v14 = vpop.f32.mrf.mxu0  ;;  %v1109_v17 = vpop.f32.mrf.mxu1 }
 0x383   : > { %v4815_v10 = vadd.f32 %v1136_v14, %v1107_v13 }
 0x385   : > { %vm1150_vm3 = vcmp.gt.f32.partialorder %v4815_v10, 0.0 }
 0x386   : > { %v1158_v18 = vsel %vm1150_vm3, %v4815_v10, 1.0 }
 0x387   : > { %1178 = vrot.lane.b32.xlu2 %v1158_v18, %s4227_s20 }
 0x38a   : > { %v1138_v19 = vpop.f32.mrf.mxu0  ;;  %v1112_v25 = vpop.f32.mrf.mxu1 }
 0x38b   : > { %v4822_v21 = vadd.f32 %v1138_v19, %v1109_v17 }
 0x38d   : > { %vm1151_vm4 = vcmp.gt.f32.partialorder %v4822_v21, 0.0 }
 0x38e   : > { %v1159_v23 = vsel %vm1151_vm4, %v4822_v21, 1.0 }
 0x38f   : > { %1180 = vrot.lane.b32.xlu0 %v1159_v23, %s4227_s20 }
 0x392   : > { %v1141_v26 = vpop.f32.mrf.mxu0  ;;  %v1114_v63 = vpop.f32.mrf.mxu1 }
 0x393   : > { %v4829_v28 = vadd.f32 %v1141_v26, %v1112_v25 }
 0x395   : > { %vm1152_vm5 = vcmp.gt.f32.partialorder %v4829_v28, 0.0 }
 0x396   : > { %v1160_v61 = vsel %vm1152_vm5, %v4829_v28, 1.0 }
 0x397   : > { %1182 = vrot.lane.b32.xlu1 %v1160_v61, %s4227_s20 }
 0x39a   : > { %v1143_v60 = vpop.f32.mrf.mxu0 }
 0x39b   : > { %v4836_v29 = vadd.f32 %v1143_v60, %v1114_v63 }
 0x39d   : > { %vm1153_vm6 = vcmp.gt.f32.partialorder %v4836_v29, 0.0 }
 0x39e   : > { %v1161_v35 = vsel %vm1153_vm6, %v4836_v29, 1.0 }
 0x39f   : > { %1184 = vrot.lane.b32.xlu2 %v1161_v35, %s4227_s20 }
 0x3c9   : > { %v1173_v43 = vpop.permute.xlu2 %1172 }
 0x3ca   : > { %3941 = vrcp.f32 %v1173_v43  ;;  %v1220_v33 = vand.u32 2147483648, %v1173_v43  ;;  %v1218_v37 = vand.u32 2147483647, %v1173_v43  ;;  %vm1214_vm9 = vweird.f32 %v1173_v43 }
 0x3cc   : > { %v1221_v39 = vor.u32 1.1754944e-38, %v1220_v33  ;;  %vm1219_vm2 = vcmp.eq.f32.partialorder %v1218_v37, 8.507059e+37 }
 0x3d0   : > { %v3942_v30 = vpop.eup %3941 }
 0x3d1   : > { %v1210_v2 = vmul.f32 %v3942_v30, %v1173_v43  ;;  %vm1215_vm8 = vweird.f32 %v3942_v30 }
 0x3d2   : > { %vm1216_vm11 = vmor %vm1214_vm9, %vm1215_vm8 }
 0x3d3   : > { %v1211_v32 = vsub.f32 1.0, %v1210_v2 }
 0x3d5   : > { %v1212_v34 = vmul.f32 %v3942_v30, %v1211_v32 }
 0x3d7   : > { %v1213_v38 = vadd.f32 %v3942_v30, %v1212_v34 }
 0x3d9   : > { %v1171_v40 = vpop.permute.xlu1 %1170  ;;  %v1217_v41 = vsel %vm1216_vm11, %v3942_v30, %v1213_v38 }
 0x3da   : > { %3943 = vrcp.f32 %v1171_v40  ;;  %v1222_v45 = vsel %vm1219_vm2, %v1221_v39, %v1217_v41  ;;  %v1205_v58 = vand.u32 2147483648, %v1171_v40  ;;  %v1203_v57 = vand.u32 2147483647, %v1171_v40 }
 0x3db   : > { %v1223_v47 = vmul.f32 %v1222_v45, %v4794_v11  ;;  %vm1199_vm10 = vweird.f32 %v1171_v40 }
 0x3dc   : > { %v1206_v62 = vor.u32 1.1754944e-38, %v1205_v58  ;;  %vm1204_vm2 = vcmp.eq.f32.partialorder %v1203_v57, 8.507059e+37 }
 0x3dd   : > { %1324 = vrot.lane.b32.xlu1 %v1223_v47, %s4229_s24 }
 0x3e0   : > { %v3944_v52 = vpop.eup %3943 }
 0x3e1   : > { %v1195_v53 = vmul.f32 %v3944_v52, %v1171_v40  ;;  %v1179_v55 = vpop.permute.xlu2 %1178  ;;  %vm1200_vm1 = vweird.f32 %v3944_v52 }
 0x3e2   : > { %3945 = vrcp.f32 %v1179_v55  ;;  %vm1201_vm8 = vmor %vm1199_vm10, %vm1200_vm1  ;;  %v1265_v5 = vand.u32 2147483648, %v1179_v55  ;;  %v1263_v7 = vand.u32 2147483647, %v1179_v55  ;;  %vm1259_vm11 = vweird.f32 %v1179_v55 }
 0x3e3   : > { %v1196_v31 = vsub.f32 1.0, %v1195_v53 }
 0x3e4   : > { %v1266_v27 = vor.u32 1.1754944e-38, %v1265_v5  ;;  %vm1264_vm10 = vcmp.eq.f32.partialorder %v1263_v7, 8.507059e+37 }
 0x3e5   : > { %v1197_v56 = vmul.f32 %v3944_v52, %v1196_v31 }
 0x3e7   : > { %v1198_v54 = vadd.f32 %v3944_v52, %v1197_v56 }
 0x3e8   : > { %v3946_v36 = vpop.eup %3945 }
 0x3e9   : > { %v1255_v0 = vmul.f32 %v3946_v36, %v1179_v55  ;;  %v1175_v49 = vpop.permute.xlu0 %1174  ;;  %v1202_v46 = vsel %vm1201_vm8, %v3944_v52, %v1198_v54  ;;  %vm1260_vm9 = vweird.f32 %v3946_v36 }
 0x3ea   : > { %3947 = vrcp.f32 %v1175_v49  ;;  %v1207_v8 = vsel %vm1204_vm2, %v1206_v62, %v1202_v46  ;;  %vm1261_vm1 = vmor %vm1259_vm11, %vm1260_vm9  ;;  %v1235_v26 = vand.u32 2147483648, %v1175_v49  ;;  %v1233_v63 = vand.u32 2147483647, %v1175_v49 }
 0x3eb   : > { %v1256_v48 = vsub.f32 1.0, %v1255_v0  ;;  %v1208_v4 = vmul.f32 %v1207_v8, %v4787_v3  ;;  %vm1229_vm2 = vweird.f32 %v1175_v49 }
 0x3ec   : > { %v1236_v43 = vor.u32 1.1754944e-38, %v1235_v26  ;;  %vm1234_vm11 = vcmp.eq.f32.partialorder %v1233_v63, 8.507059e+37 }
 0x3ed   : > { %v1257_v6 = vmul.f32 %v3946_v36, %v1256_v48  ;;  %1322 = vrot.lane.b32.xlu0 %v1208_v4, %s4229_s24 }
 0x3ef   : > { %v1258_v9 = vadd.f32 %v3946_v36, %v1257_v6 }
 0x3f0   : > { %v3948_v13 = vpop.eup %3947 }
 0x3f1   : > { %v1225_v14 = vmul.f32 %v3948_v13, %v1175_v49  ;;  %v1177_v17 = vpop.permute.xlu1 %1176  ;;  %v1262_v18 = vsel %vm1261_vm1, %v3946_v36, %v1258_v9  ;;  %vm1230_vm8 = vweird.f32 %v3948_v13 }
 0x3f2   : > { %3949 = vrcp.f32 %v1177_v17  ;;  %v1267_v19 = vsel %vm1264_vm10, %v1266_v27, %v1262_v18  ;;  %vm1231_vm9 = vmor %vm1229_vm2, %vm1230_vm8  ;;  %v1250_v38 = vand.u32 2147483648, %v1177_v17  ;;  %v1248_v40 = vand.u32 2147483647, %v1177_v17 }
 0x3f3   : > { %v1226_v23 = vsub.f32 1.0, %v1225_v14  ;;  %v1268_v25 = vmul.f32 %v1267_v19, %v4815_v10  ;;  %vm1244_vm10 = vweird.f32 %v1177_v17 }
 0x3f4   : > { %v1251_v47 = vor.u32 1.1754944e-38, %v1250_v38  ;;  %vm1249_vm2 = vcmp.eq.f32.partialorder %v1248_v40, 8.507059e+37 }
 0x3f5   : > { %v1227_v61 = vmul.f32 %v3948_v13, %v1226_v23  ;;  %1330 = vrot.lane.b32.xlu1 %v1268_v25, %s4229_s24 }
 0x3f7   : > { %v1228_v60 = vadd.f32 %v3948_v13, %v1227_v61 }
 0x3f8   : > { %v3950_v35 = vpop.eup %3949 }
 0x3f9   : > { %v1240_v30 = vmul.f32 %v3950_v35, %v1177_v17  ;;  %v1185_v2 = vpop.permute.xlu2 %1184  ;;  %v1232_v32 = vsel %vm1231_vm9, %v3948_v13, %v1228_v60  ;;  %vm1245_vm1 = vweird.f32 %v3950_v35 }
 0x3fa   : > { %3951 = vrcp.f32 %v1185_v2  ;;  %v1237_v33 = vsel %vm1234_vm11, %v1236_v43, %v1232_v32  ;;  %vm1246_vm8 = vmor %vm1244_vm10, %vm1245_vm1  ;;  %v1310_v57 = vand.u32 2147483648, %v1185_v2  ;;  %v1308_v36 = vand.u32 2147483647, %v1185_v2 }
 0x3fb   : > { %v1241_v34 = vsub.f32 1.0, %v1240_v30  ;;  %v1238_v37 = vmul.f32 %v1237_v33, %v4801_v59  ;;  %vm1304_vm11 = vweird.f32 %v1185_v2 }
 0x3fc   : > { %v1311_v49 = vor.u32 1.1754944e-38, %v1310_v57  ;;  %vm1309_vm10 = vcmp.eq.f32.partialorder %v1308_v36, 8.507059e+37 }
 0x3fd   : > { %v1242_v39 = vmul.f32 %v3950_v35, %v1241_v34  ;;  %1326 = vrot.lane.b32.xlu2 %v1238_v37, %s4229_s24 }
 0x3ff   : > { %v1243_v41 = vadd.f32 %v3950_v35, %v1242_v39 }
 0x400   : > { %v3952_v45 = vpop.eup %3951 }
 0x401   : > { %v1300_v52 = vmul.f32 %v3952_v45, %v1185_v2  ;;  %v1181_v53 = vpop.permute.xlu0 %1180  ;;  %v1247_v55 = vsel %vm1246_vm8, %v3950_v35, %v1243_v41  ;;  %vm1305_vm9 = vweird.f32 %v3952_v45 }
 0x402   : > { %3953 = vrcp.f32 %v1181_v53  ;;  %v1252_v31 = vsel %vm1249_vm2, %v1251_v47, %v1247_v55  ;;  %vm1306_vm1 = vmor %vm1304_vm11, %vm1305_vm9  ;;  %v1280_v7 = vand.u32 2147483648, %v1181_v53  ;;  %v1278_v13 = vand.u32 2147483647, %v1181_v53 }
 0x403   : > { %v1301_v58 = vsub.f32 1.0, %v1300_v52  ;;  %v1253_v56 = vmul.f32 %v1252_v31, %v4808_v12  ;;  %vm1274_vm2 = vweird.f32 %v1181_v53 }
 0x404   : > { %v1281_v17 = vor.u32 1.1754944e-38, %v1280_v7  ;;  %vm1279_vm11 = vcmp.eq.f32.partialorder %v1278_v13, 8.507059e+37 }
 0x405   : > { %v1302_v54 = vmul.f32 %v3952_v45, %v1301_v58  ;;  %1328 = vrot.lane.b32.xlu0 %v1253_v56, %s4229_s24  ;;  %v4231_v58 = vmov 64.0  }
 0x407   : > { %v1303_v62 = vadd.f32 %v3952_v45, %v1302_v54 }
 0x408   : > { %v3954_v0 = vpop.eup %3953 }
 0x409   : > { %v1270_v46 = vmul.f32 %v3954_v0, %v1181_v53  ;;  %v1183_v8 = vpop.permute.xlu1 %1182  ;;  %v1307_v48 = vsel %vm1306_vm1, %v3952_v45, %v1303_v62  ;;  %vm1275_vm8 = vweird.f32 %v3954_v0 }
 0x40a   : > { %3955 = vrcp.f32 %v1183_v8  ;;  %v1312_v4 = vsel %vm1309_vm10, %v1311_v49, %v1307_v48  ;;  %vm1276_vm9 = vmor %vm1274_vm2, %vm1275_vm8  ;;  %v1295_v61 = vand.u32 2147483648, %v1183_v8  ;;  %v1293_v60 = vand.u32 2147483647, %v1183_v8 }
 0x40b   : > { %v1271_v5 = vsub.f32 1.0, %v1270_v46  ;;  %v1313_v6 = vmul.f32 %v1312_v4, %v4836_v29  ;;  %vm1289_vm10 = vweird.f32 %v1183_v8  ;;  %vm1354_vm8 = vcmask 523520  }
 0x40c   : > { %v1296_v43 = vor.u32 1.1754944e-38, %v1295_v61  ;;  %vm1294_vm7 = vcmp.eq.f32.partialorder %v1293_v60, 8.507059e+37  ;;  %3957 = vrcp.f32 %v4231_v58 }
 0x40d   : > { %v1272_v9 = vmul.f32 %v3954_v0, %v1271_v5  ;;  %1336 = vrot.lane.b32.xlu1 %v1313_v6, %s4229_s24 }
 0x40f   : > { %v1273_v27 = vadd.f32 %v3954_v0, %v1272_v9 }
 0x410   : > { %v3956_v14 = vpop.eup %3955 }
 0x411   : > { %v1285_v18 = vmul.f32 %v3956_v14, %v1183_v8  ;;  %v1277_v19 = vsel %vm1276_vm9, %v3954_v0, %v1273_v27  ;;  %vm1290_vm1 = vweird.f32 %v3956_v14 }
 0x412   : > { %v1282_v23 = vsel %vm1279_vm11, %v1281_v17, %v1277_v19  ;;  %vm1291_vm0 = vmor %vm1289_vm10, %vm1290_vm1  ;;  %v3958_v36 = vpop.eup %3957  ;;  %vm5601_vm11 = vcmask 523264  }
 0x413   : > { %v1286_v25 = vsub.f32 1.0, %v1285_v18  ;;  %v1283_v26 = vmul.f32 %v1282_v23, %v4822_v21  ;;  %v1377_v46 = vmul.f32 64.0, %v3958_v36  ;;  %vm5602_vm1 = vmmov %vm5601_vm11 }
 0x414   : > { %vm5603_vm10 = vmmov %vm5602_vm1 }
 0x415   : > { %v1287_v63 = vmul.f32 %v3956_v14, %v1286_v25  ;;  %1332 = vrot.lane.b32.xlu2 %v1283_v26, %s4229_s24  ;;  %v1378_v21 = vsub.f32 1.0, %v1377_v46 }
 0x417   : > { %v1288_v35 = vadd.f32 %v3956_v14, %v1287_v63  ;;  %v1379_v27 = vmul.f32 %v3958_v36, %v1378_v21 }
 0x419   : > { %v1292_v30 = vsel %vm1291_vm0, %v3956_v14, %v1288_v35  ;;  %v1380_v18 = vadd.f32 %v3958_v36, %v1379_v27  ;;  %vm1381_vm0 = vweird.f32 %v3958_v36  ;;  %v4907_v27 = vld [vmem:[#allocation6 + $0x8] sm:$0xff] }
 0x41a   : > { %v1297_v2 = vsel %vm1294_vm7, %v1296_v43, %v1292_v30 }
 0x41b   : > { %v1298_v32 = vmul.f32 %v1297_v2, %v4829_v28  ;;  %v4883_v23 = vsel %vm1381_vm0, %v3958_v36, %v1380_v18  ;;  %vm5605_vm0 = vmmov %vm5602_vm1 }
 0x41d   : > { %1334 = vrot.lane.b32.xlu0 %v1298_v32, %s4229_s24 }
 0x44f   : > { %v1325_v34 = vpop.permute.xlu1 %1324 }
 0x450   : > { %v1347_v38 = vsel %vm1147_vm13, %v1325_v34, 0.0 }
 0x451   : > { %v1356_v45 = vsel %vm1354_vm8, %v1347_v38, 0.0 }
 0x457   : > { %v1327_v39 = vpop.permute.xlu2 %1326 }
 0x458   : > { %v1348_v47 = vsel %vm1148_vm14, %v1327_v39, 0.0  ;;  %vm5593_vm14 = vcmask 261120  }
 0x459   : > { %v1358_v3 = vsel %vm1354_vm8, %v1348_v47, 0.0 }
 0x45f   : > { %v1323_v33 = vpop.permute.xlu0 %1322 }
 0x460   : > { %v1346_v37 = vsel %vm1146_vm12, %v1323_v33, 0.0 }
 0x461   : > { %v1355_v40 = vsel %vm1354_vm8, %v1346_v37, 0.0 }
 0x462   : > { %v1357_v52 = vadd.f32 %v1356_v45, %v1355_v40 }
 0x464   : > { %v1359_v11 = vadd.f32 %v1358_v3, %v1357_v52 }
 0x467   : > { %v1331_v55 = vpop.permute.xlu1 %1330 }
 0x468   : > { %v1350_v56 = vsel %vm1150_vm3, %v1331_v55, 0.0  ;;  %vm5595_vm3 = vmmov %vm5593_vm14 }
 0x469   : > { %v1362_v59 = vsel %vm1354_vm8, %v1350_v56, 0.0  ;;  %vm5599_vm2 = vmmov %vm5595_vm3 }
 0x46a   : > { %vm5600_vm9 = vmmov %vm5599_vm2 }
 0x46f   : > { %v1333_v54 = vpop.permute.xlu2 %1332 }
 0x470   : > { %v1351_v12 = vsel %vm1151_vm4, %v1333_v54, 0.0  ;;  %vm5596_vm4 = vmmov %vm5595_vm3 }
 0x471   : > { %v1364_v49 = vsel %vm1354_vm8, %v1351_v12, 0.0 }
 0x477   : > { %v1329_v41 = vpop.permute.xlu0 %1328 }
 0x478   : > { %v1349_v53 = vsel %vm1149_vm15, %v1329_v41, 0.0  ;;  %vm5594_vm15 = vmmov %vm5593_vm14 }
 0x479   : > { %v1360_v31 = vsel %vm1354_vm8, %v1349_v53, 0.0 }
 0x47a   : > { %v1361_v57 = vadd.f32 %v1360_v31, %v1359_v11 }
 0x47c   : > { %v1363_v62 = vadd.f32 %v1362_v59, %v1361_v57 }
 0x47e   : > { %v1365_v4 = vadd.f32 %v1364_v49, %v1363_v62 }
 0x47f   : > { %v1337_v0 = vpop.permute.xlu1 %1336 }
 0x480   : > { %v1353_v48 = vsel %vm1153_vm6, %v1337_v0, 0.0  ;;  %vm5598_vm6 = vmmov %vm5595_vm3 }
 0x481   : > { %v1368_v7 = vsel %vm1354_vm8, %v1353_v48, 0.0 }
 0x48f   : > { %v1335_v8 = vpop.permute.xlu0 %1334 }
 0x490   : > { %v1352_v10 = vsel %vm1152_vm5, %v1335_v8, 0.0  ;;  %vm5597_vm5 = vmmov %vm5595_vm3 }
 0x491   : > { %v1366_v5 = vsel %vm1354_vm8, %v1352_v10, 0.0 }
 0x492   : > { %v1367_v6 = vadd.f32 %v1366_v5, %v1365_v4  ;;  %v4899_v5 = vld [vmem:[#allocation6 + $0x50] sm:$0xff] }
 0x493   : > { %1501 = vmatpush.msrb.mxu2 %v4899_v5 }
 0x494   : > { %v1369_v9 = vadd.f32 %v1368_v7, %v1367_v6  ;;  %v4901_v6 = vld [vmem:[#allocation6 + $0x38] sm:$0xff] }
 0x495   : > { %1502 = vmatpush.msrb.mxu2 %v4901_v6 }
 0x496   : > { %v1370_v13 = vrot.slane %v1369_v9, 4 }
 0x498   : > { %v1371_v14 = vadd.f32 %v1370_v13, %v1369_v9  ;;  %v4904_v9 = vld [vmem:[#allocation6 + $0x20] sm:$0xff] }
 0x499   : > { %1503 = vmatpush.msrb.mxu2 %v4904_v9 }
 0x49a   : > { %v1372_v17 = vrot.slane %v1371_v14, 2 }
 0x49b   : > { %1504 = vmatpush.msrb.mxu2 %v4907_v27 }
 0x49c   : > { %v1373_v19 = vadd.f32 %v1372_v17, %v1371_v14 }
 0x49e   : > { %v1374_v29 = vrot.slane %v1373_v19, 1 }
 0x4a0   : > { %v1375_v28 = vadd.f32 %v1374_v29, %v1373_v19 }
 0x4a2   : > { %v1383_v25 = vmul.f32 %v4883_v23, %v1375_v28 }
 0x4a4   : > { %v1384_v26 = vsub.f32 %v1346_v37, %v1383_v25  ;;  %v1385_v61 = vsub.f32 %v1347_v38, %v1383_v25  ;;  %v1386_v63 = vsub.f32 %v1348_v47, %v1383_v25  ;;  %v4886_v60 = vsub.f32 %v1349_v53, %v1383_v25 }
 0x4a5   : > { %v1388_v35 = vsub.f32 %v1350_v56, %v1383_v25  ;;  %v1389_v32 = vsub.f32 %v1351_v12, %v1383_v25  ;;  %v1390_v41 = vsub.f32 %v1352_v10, %v1383_v25  ;;  %v1391_v47 = vsub.f32 %v1353_v48, %v1383_v25 }
 0x4a6   : > { %v1392_v43 = vmul.f32 %v1384_v26, %v1384_v26  ;;  %v1393_v30 = vmul.f32 %v1385_v61, %v1385_v61  ;;  %v1394_v2 = vmul.f32 %v1386_v63, %v1386_v63  ;;  %v1395_v33 = vmul.f32 %v4886_v60, %v4886_v60 }
 0x4a7   : > { %v1396_v45 = vmul.f32 %v1388_v35, %v1388_v35  ;;  %v1397_v52 = vmul.f32 %v1389_v32, %v1389_v32  ;;  %v1398_v55 = vmul.f32 %v1390_v41, %v1390_v41  ;;  %v1399_v58 = vmul.f32 %v1391_v47, %v1391_v47 }
 0x4a8   : > { %v1400_v34 = vsel %vm1354_vm8, %v1392_v43, 0.0  ;;  %v1401_v39 = vsel %vm1354_vm8, %v1393_v30, 0.0  ;;  %v1403_v37 = vsel %vm1354_vm8, %v1394_v2, 0.0  ;;  %v1405_v53 = vsel %vm1354_vm8, %v1395_v33, 0.0  ;;  %v1544_v33 = vld [vmem:[#allocation6 + $0x98] sm:$0xff] }
 0x4a9   : > { %v1402_v40 = vadd.f32 %v1401_v39, %v1400_v34  ;;  %v1407_v31 = vsel %vm1354_vm8, %v1396_v45, 0.0  ;;  %v1409_v56 = vsel %vm1354_vm8, %v1397_v52, 0.0  ;;  %v1411_v54 = vsel %vm1354_vm8, %v1398_v55, 0.0  ;;  %v1543_v39 = vld [vmem:[#allocation6 + $0x80] sm:$0xff] }
 0x4aa   : > { %v1413_v36 = vsel %vm1354_vm8, %v1399_v58, 0.0  ;;  %vm5604_vm8 = vmmov %vm5602_vm1 }
 0x4ab   : > { %v1404_v38 = vadd.f32 %v1403_v37, %v1402_v40 }
 0x4ad   : > { %v1406_v3 = vadd.f32 %v1405_v53, %v1404_v38 }
 0x4af   : > { %v1408_v11 = vadd.f32 %v1407_v31, %v1406_v3 }
 0x4b1   : > { %v1410_v57 = vadd.f32 %v1409_v56, %v1408_v11  ;;  %v3907_v11 = vld [vmem:[#allocation7 + $0x1] ss:$0 sm:$0xff] }
 0x4b3   : > { %v1412_v59 = vadd.f32 %v1411_v54, %v1410_v57 }
 0x4b5   : > { %v1414_v12 = vadd.f32 %v1413_v36, %v1412_v59 }
 0x4b7   : > { %v1415_v62 = vrot.slane %v1414_v12, 4 }
 0x4b9   : > { %v1416_v0 = vadd.f32 %v1415_v62, %v1414_v12 }
 0x4bb   : > { %v1417_v49 = vrot.slane %v1416_v0, 2 }
 0x4bd   : > { %v1418_v46 = vadd.f32 %v1417_v49, %v1416_v0 }
 0x4bf   : > { %v1419_v8 = vrot.slane %v1418_v46, 1 }
 0x4c1   : > { %v1420_v48 = vadd.f32 %v1419_v8, %v1418_v46 }
 0x4c3   : > { %v1421_v10 = vmul.f32 %v1420_v48, %v4883_v23 }
 0x4c5   : > { %v1422_v4 = vadd.f32 1e-05, %v1421_v10 }
 0x4c7   : > { %3959 = vrsqrt.f32 %v1422_v4  ;;  %vm1429_vm12 = vweird.f32 %v1422_v4 }
 0x4cd   : > { %v3960_v7 = vpop.eup %3959 }
 0x4ce   : > { %v1424_v21 = vmul.f32 %v3960_v7, %v1422_v4  ;;  %vm1430_vm7 = vweird.f32 %v3960_v7 }
 0x4cf   : > { %vm1431_vm13 = vmor %vm1429_vm12, %vm1430_vm7 }
 0x4d0   : > { %v1425_v13 = vmul.f32 %v3960_v7, %v1424_v21  ;;  %vm5606_vm7 = vmmov %vm5605_vm0 }
 0x4d1   : > { %vm5607_vm12 = vmmov %vm5605_vm0 }
 0x4d2   : > { %v1426_v14 = vmul.f32 0.5, %v1425_v13 }
 0x4d4   : > { %v1427_v17 = vsub.f32 1.5, %v1426_v14 }
 0x4d6   : > { %v1428_v18 = vmul.f32 %v3960_v7, %v1427_v17 }
 0x4d8   : > { %v1432_v19 = vsel %vm1431_vm13, %v3960_v7, %v1428_v18  ;;  %vm5608_vm13 = vmmov %vm5605_vm0 }
 0x4d9   : > { %v1435_v29 = vmul.f32 %v1432_v19, %v1386_v63  ;;  %v1434_v28 = vmul.f32 %v1432_v19, %v1385_v61  ;;  %v1433_v25 = vmul.f32 %v1432_v19, %v1384_v26  ;;  %v1438_v43 = vmul.f32 %v1432_v19, %v1389_v32  ;;  %v1545_v63 = vld [vmem:[#allocation6 + $0xb0] sm:$0xff]  ;;  %v1542_v32 = vld [vmem:[#allocation6 + $0x68] sm:$0xff] }
 0x4da   : > { %v1437_v30 = vmul.f32 %v1432_v19, %v1388_v35  ;;  %v1436_v2 = vmul.f32 %v1432_v19, %v4886_v60  ;;  %v3746_v61 = vpack.i.bf16 %v1544_v33, %v1545_v63  ;;  %v1440_v26 = vmul.f32 %v1432_v19, %v1391_v47 }
 0x4db   : > { %1461 = vrot.lane.b32.xlu1 %v1435_v29, %s4227_s20  ;;  %1459 = vrot.lane.b32.xlu0 %v1434_v28, %s4227_s20  ;;  %v1439_v34 = vmul.f32 %v1432_v19, %v1390_v41  ;;  %v3756_v60 = vpack.i.bf16 %v4901_v6, %v4899_v5  ;;  %v3761_v35 = vpack.i.bf16 %v4907_v27, %v4904_v9  ;;  %v1732_v29 = vld [vmem:[#allocation6 + $0x58] sm:$0xff]  ;;  %v1730_v28 = vld [vmem:[#allocation6 + $0x40] sm:$0xff] }
 0x4dc   : > { %1457 = vrot.lane.b32.xlu2 %v1433_v25, %s4227_s20  ;;  %v3751_v40 = vpack.i.bf16 %v1542_v32, %v1543_v39  ;;  %v3766_v25 = vpack.i.bf16 %v1732_v29, %v4899_v5  ;;  %v1726_v39 = vld [vmem:[#allocation6 + $0x10] sm:$0xff] }
 0x4e3   : > { %1467 = vrot.lane.b32.xlu1 %v1438_v43, %s4227_s20  ;;  %1465 = vrot.lane.b32.xlu0 %v1437_v30, %s4227_s20  ;;  %v3771_v43 = vpack.i.bf16 %v1730_v28, %v4901_v6 }
 0x4e4   : > { %1463 = vrot.lane.b32.xlu2 %v1436_v2, %s4227_s20 }
 0x4eb   : > { %1471 = vrot.lane.b32.xlu0 %v1440_v26, %s4227_s20  ;;  %3747 = vrot.lane.b32.xlu1 %v3746_v61, %s4230_s10 }
 0x4ec   : > { %1469 = vrot.lane.b32.xlu2 %v1439_v34, %s4227_s20 }
 0x4f3   : > { %3757 = vrot.lane.b32.xlu0 %v3756_v60, %s4230_s10  ;;  %3762 = vrot.lane.b32.xlu1 %v3761_v35, %s4230_s10 }
 0x4f4   : > { %3752 = vrot.lane.b32.xlu2 %v3751_v40, %s4230_s10  ;;  %v3781_v40 = vpack.i.bf16 %v1726_v39, %v4907_v27 }
 0x4fb   : > { %3767 = vrot.lane.b32.xlu0 %v3766_v25, %s4229_s24  ;;  %3772 = vrot.lane.b32.xlu1 %v3771_v43, %s4229_s24 }
 0x4fc   : > { %1578 = vrot.lane.b32.xlu2 %v3907_v11, %s4230_s10 }
 0x503   : > { %3782 = vrot.lane.b32.xlu0 %v3781_v40, %s4229_s24 }
 0x536   : > { %v1458_v41 = vpop.permute.xlu2 %1457 }
 0x537   : > { %3431 = vmatmul.msk.f32.vlgmr.msrb.gmra.mxu2 %vm5593_vm14, %v1458_v41  ;;  %v1728_v41 = vld [vmem:[#allocation6 + $0x28] sm:$0xff]  ;;  %vm5609_vm14 = vmmov %vm5599_vm2 }
 0x53e   : > { %v1464_v47 = vpop.permute.xlu2 %1463 }
 0x546   : > { %v1470_v31 = vpop.permute.xlu2 %1469 }
 0x54d   : > { %v1462_v45 = vpop.permute.xlu1 %1461  ;;  %v1460_v37 = vpop.permute.xlu0 %1459 }
 0x54e   : > { %3432 = vmatmul.msk.f32.gmra.mxu2 %vm5594_vm15, %v1460_v37  ;;  %v3753_v56 = vpop.permute.xlu2 %3752  ;;  %vm5610_vm15 = vmmov %vm5599_vm2 }
 0x54f   : > { %v3754_v57 = vunpack.i.l.bf16 %v3753_v56  ;;  %v3755_v54 = vunpack.i.h.bf16 %v3753_v56 }
 0x555   : > { %v1468_v38 = vpop.permute.xlu1 %1467  ;;  %v1466_v55 = vpop.permute.xlu0 %1465 }
 0x556   : > { %3433 = vmatmul.msk.f32.gmra.mxu2 %vm5595_vm3, %v1462_v45  ;;  %v3776_v45 = vpack.i.bf16 %v1728_v41, %v4904_v9  ;;  %vm5611_vm3 = vmmov %vm5599_vm2 }
 0x558   : > { %3777 = vrot.lane.b32.xlu2 %v3776_v45, %s4229_s24 }
 0x55d   : > { %v3748_v52 = vpop.permute.xlu1 %3747  ;;  %v1472_v58 = vpop.permute.xlu0 %1471 }
 0x55e   : > { %3434 = vmatmul.msk.f32.gmra.mxu2 %vm5596_vm4, %v1464_v47  ;;  %v3749_v53 = vunpack.i.l.bf16 %v3748_v52  ;;  %v3750_v3 = vunpack.i.h.bf16 %v3748_v52  ;;  %vm5612_vm4 = vmmov %vm5599_vm2 }
 0x560   : > { %1613 = vmatpush.msrb.mxu3 %v3749_v53 }
 0x562   : > { %1614 = vmatpush.msrb.mxu3 %v3750_v3  ;;  %v1579_v3 = vpop.permute.xlu2 %1578 }
 0x564   : > { %1615 = vmatpush.msrb.mxu3 %v3754_v57 }
 0x565   : > { %v3758_v59 = vpop.permute.xlu0 %3757  ;;  %v3763_v12 = vpop.permute.xlu1 %3762 }
 0x566   : > { %3435 = vmatmul.msk.f32.gmra.mxu2 %vm5597_vm5, %v1466_v55  ;;  %1616 = vmatpush.msrb.mxu3 %v3755_v54  ;;  %v3759_v36 = vunpack.i.l.bf16 %v3758_v59  ;;  %v3760_v62 = vunpack.i.h.bf16 %v3758_v59  ;;  %v3764_v0 = vunpack.i.l.bf16 %v3763_v12  ;;  %v3765_v49 = vunpack.i.h.bf16 %v3763_v12  ;;  %vm5613_vm5 = vmmov %vm5599_vm2 }
 0x568   : > { %1617 = vmatpush.msrb.mxu3 %v3759_v36 }
 0x56a   : > { %1618 = vmatpush.msrb.mxu3 %v3760_v62 }
 0x56c   : > { %1619 = vmatpush.msrb.mxu3 %v3764_v0 }
 0x56e   : > { %3436 = vmatmul.msk.f32.gmra.mxu2 %vm5598_vm6, %v1468_v38  ;;  %1620 = vmatpush.msrb.mxu3 %v3765_v49  ;;  %vm5614_vm6 = vmmov %vm5599_vm2 }
 0x576   : > { %3437 = vmatmul.msk.f32.gmra.mxu2 %vm5599_vm2, %v1470_v31 }
 0x57e   : > { %3438 = vmatmul.msk.f32.gmra.mxu2 %vm5600_vm9, %v1472_v58  ;;  %vm5615_vm9 = vmmov %vm5599_vm2 }
 0x5ba   : > { %v1506_v46 = vpop.f32.mrf.mxu2 }
 0x5bb   : > { %v1507_v8 = vadd.f32 %v3907_v11, %v1506_v46 }
 0x5bd   : > { %v1530_v48 = vmax.f32 %v1507_v8, 0.0 }
 0x5bf   : > { %3439 = vmatmul.msk.f32.vlgmr.msrb.gmra.mxu3 %vm5601_vm11, %v1530_v48  ;;  %vm5616_vm11 = vmmov %vm5599_vm2 }
 0x5d1   : > { %v1509_v10 = vpop.f32.mrf.mxu2 }
 0x5d2   : > { %v1510_v4 = vadd.f32 %v3907_v11, %v1509_v10 }
 0x5d4   : > { %v1531_v7 = vmax.f32 %v1510_v4, 0.0 }
 0x5d6   : > { %3440 = vmatmul.msk.f32.gmra.mxu3 %vm5602_vm1, %v1531_v7  ;;  %vm5617_vm1 = vmmov %vm5599_vm2 }
 0x5d9   : > { %v1512_v21 = vpop.f32.mrf.mxu2 }
 0x5da   : > { %v1513_v13 = vadd.f32 %v3907_v11, %v1512_v21 }
 0x5dc   : > { %v1532_v14 = vmax.f32 %v1513_v13, 0.0 }
 0x5de   : > { %3441 = vmatmul.msk.f32.gmra.mxu3 %vm5603_vm10, %v1532_v14  ;;  %vm5618_vm10 = vmmov %vm5617_vm1 }
 0x5e1   : > { %v1515_v17 = vpop.f32.mrf.mxu2 }
 0x5e2   : > { %v1516_v18 = vadd.f32 %v3907_v11, %v1515_v17 }
 0x5e4   : > { %v1533_v19 = vmax.f32 %v1516_v18, 0.0 }
 0x5e6   : > { %3442 = vmatmul.msk.f32.gmra.mxu3 %vm5604_vm8, %v1533_v19  ;;  %vm5619_vm8 = vmmov %vm5617_vm1 }
 0x5e9   : > { %v1518_v30 = vpop.f32.mrf.mxu2 }
 0x5ea   : > { %v1519_v2 = vadd.f32 %v3907_v11, %v1518_v30 }
 0x5ec   : > { %v1534_v33 = vmax.f32 %v1519_v2, 0.0 }
 0x5ee   : > { %3443 = vmatmul.msk.f32.gmra.mxu3 %vm5605_vm0, %v1534_v33  ;;  %vm5620_vm0 = vmmov %vm5617_vm1 }
 0x5f1   : > { %v1521_v63 = vpop.f32.mrf.mxu2 }
 0x5f2   : > { %v1522_v61 = vadd.f32 %v3907_v11, %v1521_v63 }
 0x5f4   : > { %v1535_v26 = vmax.f32 %v1522_v61, 0.0 }
 0x5f6   : > { %3444 = vmatmul.msk.f32.gmra.mxu3 %vm5606_vm7, %v1535_v26  ;;  %vm5621_vm7 = vmmov %vm5620_vm0 }
 0x5f9   : > { %v1524_v34 = vpop.f32.mrf.mxu2 }
 0x5fa   : > { %v1525_v60 = vadd.f32 %v3907_v11, %v1524_v34 }
 0x5fc   : > { %v1536_v35 = vmax.f32 %v1525_v60, 0.0 }
 0x5fe   : > { %3445 = vmatmul.msk.f32.gmra.mxu3 %vm5607_vm12, %v1536_v35  ;;  %vm5622_vm12 = vmmov %vm5620_vm0 }
 0x601   : > { %v1527_v5 = vpop.f32.mrf.mxu2 }
 0x602   : > { %v1528_v6 = vadd.f32 %v3907_v11, %v1527_v5 }
 0x604   : > { %v1537_v32 = vmax.f32 %v1528_v6, 0.0 }
 0x606   : > { %3446 = vmatmul.msk.f32.gmra.mxu3 %vm5608_vm13, %v1537_v32  ;;  %vm5623_vm13 = vmmov %vm5620_vm0 }
 0x642   : > { %v1622_v37 = vpop.f32.mrf.mxu3 }
 0x643   : > { %v1623_v11 = vadd.f32 %v1622_v37, %v1579_v3 }
 0x645   : > { %v1646_v57 = vsel %vm5610_vm15, %v1623_v11, 0.0  ;;  %vm5625_vm15 = vmmov %vm5620_vm0 }
 0x659   : > { %v1625_v38 = vpop.f32.mrf.mxu3 }
 0x65a   : > { %v1626_v31 = vadd.f32 %v1625_v38, %v1579_v3 }
 0x65c   : > { %v1647_v56 = vsel %vm5609_vm14, %v1626_v31, 0.0  ;;  %vm5624_vm14 = vmmov %vm5620_vm0 }
 0x65d   : > { %v1648_v59 = vadd.f32 %v1647_v56, %v1646_v57 }
 0x661   : > { %v1628_v47 = vpop.f32.mrf.mxu3 }
 0x662   : > { %v1629_v58 = vadd.f32 %v1628_v47, %v1579_v3 }
 0x664   : > { %v1649_v54 = vsel %vm5611_vm3, %v1629_v58, 0.0  ;;  %vm5626_vm3 = vmmov %vm5620_vm0 }
 0x665   : > { %v1650_v0 = vadd.f32 %v1649_v54, %v1648_v59  ;;  %v3768_v59 = vpop.permute.xlu0 %3767 }
 0x669   : > { %v1631_v52 = vpop.f32.mrf.mxu3 }
 0x66a   : > { %v1632_v27 = vadd.f32 %v1631_v52, %v1579_v3 }
 0x66c   : > { %v1651_v12 = vsel %vm5612_vm4, %v1632_v27, 0.0  ;;  %vm1908_vm4 = vcmp.ge.s32.totalorder %v4404_v20, 4 }
 0x66d   : > { %v1652_v8 = vadd.f32 %v1651_v12, %v1650_v0  ;;  %v3770_v12 = vunpack.i.h.bf16 %v3768_v59 }
 0x671   : > { %v1634_v53 = vpop.f32.mrf.mxu3 }
 0x672   : > { %v1635_v9 = vadd.f32 %v1634_v53, %v1579_v3 }
 0x674   : > { %v1653_v49 = vsel %vm5613_vm5, %v1635_v9, 0.0  ;;  %vm5627_vm5 = vmmov %vm5620_vm0 }
 0x675   : > { %v1654_v10 = vadd.f32 %v1653_v49, %v1652_v8  ;;  %v3773_v8 = vpop.permute.xlu1 %3772 }
 0x679   : > { %v1637_v55 = vpop.f32.mrf.mxu3 }
 0x67a   : > { %v1638_v62 = vadd.f32 %v1637_v55, %v1579_v3 }
 0x67c   : > { %v1655_v48 = vsel %vm5614_vm6, %v1638_v62, 0.0  ;;  %vm5628_vm6 = vcmp.lt.s32.totalorder %v4404_v20, 8 }
 0x67d   : > { %v1656_v7 = vadd.f32 %v1655_v48, %v1654_v10  ;;  %v3775_v48 = vunpack.i.h.bf16 %v3773_v8  ;;  %v3774_v10 = vunpack.i.l.bf16 %v3773_v8 }
 0x681   : > { %v1640_v36 = vpop.f32.mrf.mxu3 }
 0x682   : > { %v1641_v46 = vadd.f32 %v1640_v36, %v1579_v3 }
 0x684   : > { %v1657_v4 = vsel %vm5599_vm2, %v1641_v46, 0.0  ;;  %vm1909_vm2 = vmand %vm1908_vm4, %vm5628_vm6 }
 0x685   : > { %v1658_v14 = vadd.f32 %v1657_v4, %v1656_v7  ;;  %v3778_v4 = vpop.permute.xlu2 %3777  ;;  %vm5632_vm4 = vmmov %vm5626_vm3 }
 0x686   : > { %vm5634_vm6 = vmmov %vm5626_vm3 }
 0x689   : > { %v1643_v21 = vpop.f32.mrf.mxu3 }
 0x68a   : > { %v1644_v13 = vadd.f32 %v1643_v21, %v1579_v3  ;;  %v3780_v21 = vunpack.i.h.bf16 %v3778_v4 }
 0x68c   : > { %v1659_v17 = vsel %vm5615_vm9, %v1644_v13, 0.0  ;;  %vm1840_vm9 = vcmp.lt.s32.totalorder %v4404_v20, 4 }
 0x68d   : > { %v1660_v18 = vadd.f32 %v1659_v17, %v1658_v14  ;;  %v1763_v14 = vsel %vm5625_vm15, %v3774_v10, %v3775_v48  ;;  %vm5631_vm15 = vmmov %vm5626_vm3 }
 0x68f   : > { %v1661_v19 = vrot.slane %v1660_v18, 4 }
 0x691   : > { %v1662_v29 = vadd.f32 %v1661_v19, %v1660_v18  ;;  %v3783_v19 = vpop.permute.xlu0 %3782 }
 0x693   : > { %v1663_v28 = vrot.slane %v1662_v29, 2 }
 0x695   : > { %v1664_v25 = vadd.f32 %v1663_v28, %v1662_v29  ;;  %v1733_v29 = vld [vmem:[#allocation7 + $0x1] sm:$0x3]  ;;  %v3785_v28 = vunpack.i.h.bf16 %v3783_v19 }
 0x697   : > { %v1665_v43 = vrot.slane %v1664_v25, 1 }
 0x699   : > { %v1666_v30 = vadd.f32 %v1665_v43, %v1664_v25  ;;  %v3784_v25 = vunpack.i.l.bf16 %v3783_v19  ;;  %v1735_v43 = vperm.slane %v1733_v29, 0 }
 0x69b   : > { %v1667_v2 = vmul.f32 %v1666_v30, %v4883_v23  ;;  %1769 = vrot.lane.b32.xlu1 %v1735_v43, %s4229_s24 }
 0x69d   : > { %v4962_v33 = vsub.f32 %v1623_v11, %v1667_v2  ;;  %v4964_v63 = vsub.f32 %v1626_v31, %v1667_v2  ;;  %v4966_v61 = vsub.f32 %v1629_v58, %v1667_v2  ;;  %v4968_v26 = vsub.f32 %v1632_v27, %v1667_v2 }
 0x69e   : > { %v4970_v34 = vsub.f32 %v1635_v9, %v1667_v2  ;;  %v4978_v6 = vsub.f32 %v1638_v62, %v1667_v2  ;;  %v4984_v45 = vsub.f32 %v1641_v46, %v1667_v2  ;;  %v4989_v52 = vsub.f32 %v1644_v13, %v1667_v2 }
 0x69f   : > { %v1676_v60 = vmul.f32 %v4962_v33, %v4962_v33  ;;  %v1677_v35 = vmul.f32 %v4964_v63, %v4964_v63  ;;  %v1678_v5 = vmul.f32 %v4966_v61, %v4966_v61  ;;  %v1679_v32 = vmul.f32 %v4968_v26, %v4968_v26 }
 0x6a0   : > { %v1680_v37 = vmul.f32 %v4970_v34, %v4970_v34  ;;  %v1681_v53 = vmul.f32 %v4978_v6, %v4978_v6  ;;  %v1682_v31 = vmul.f32 %v4984_v45, %v4984_v45  ;;  %v1683_v56 = vmul.f32 %v4989_v52, %v4989_v52 }
 0x6a1   : > { %v1684_v39 = vsel %vm5616_vm11, %v1676_v60, 0.0  ;;  %v1685_v40 = vsel %vm5617_vm1, %v1677_v35, 0.0  ;;  %v1687_v38 = vsel %vm5618_vm10, %v1678_v5, 0.0  ;;  %v1689_v3 = vsel %vm5619_vm8, %v1679_v32, 0.0 }
 0x6a2   : > { %v1686_v41 = vadd.f32 %v1685_v40, %v1684_v39  ;;  %v1691_v11 = vsel %vm5620_vm0, %v1680_v37, 0.0  ;;  %v1693_v27 = vsel %vm5621_vm7, %v1681_v53, 0.0  ;;  %v1695_v54 = vsel %vm5622_vm12, %v1682_v31, 0.0 }
 0x6a3   : > { %v1697_v36 = vsel %vm5623_vm13, %v1683_v56, 0.0  ;;  %v3769_v62 = vunpack.i.l.bf16 %v3768_v59  ;;  %v3779_v13 = vunpack.i.l.bf16 %v3778_v4  ;;  %v1761_v2 = vsel %vm5627_vm5, %v3784_v25, %v3785_v28  ;;  %vm5633_vm5 = vmmov %vm5626_vm3 }
 0x6a4   : > { %v1688_v47 = vadd.f32 %v1687_v38, %v1686_v41  ;;  %vm1975_vm11 = vcmp.lt.s32.totalorder %v4404_v20, 12  ;;  %v3455_v32 = vsel %vm1840_vm9, 1.0, %v4228_v24  ;;  %vm5629_vm1 = vcmp.ge.s32.totalorder %v4404_v20, 8 }
 0x6a5   : > { %v1764_v49 = vsel %vm5624_vm14, %v3769_v62, %v3770_v12  ;;  %v1762_v18 = vsel %vm5626_vm3, %v3779_v13, %v3780_v21  ;;  %vm1976_vm10 = vmand %vm5629_vm1, %vm1975_vm11  ;;  %v3456_v39 = vsel %vm1909_vm2, 1.0, %v4228_v24  ;;  %vm2042_vm8 = vcmp.ge.s32.totalorder %v4404_v20, 12 }
 0x6a6   : > { %v1690_v55 = vadd.f32 %v1689_v3, %v1688_v47  ;;  %1811 = vmatpush.msra.mxu1 %v1764_v49  ;;  %v3457_v41 = vsel %vm1976_vm10, 1.0, %v4228_v24  ;;  %vm5630_vm0 = vcmp.lt.s32.totalorder %v4404_v20, 16  ;;  %v1736_v56 = vperm.slane %v1733_v29, 1  ;;  %vm5635_vm2 = vmmov %vm5626_vm3 }
 0x6a7   : > { %vm2043_vm7 = vmand %vm2042_vm8, %vm5630_vm0  ;;  %v5021_v37 = vpack.i.bf16 %v3457_v41, %v3455_v32  ;;  %vm5587_vm10 = vcmask 130048  }
 0x6a8   : > { %v1692_v58 = vadd.f32 %v1691_v11, %v1690_v55  ;;  %1812 = vmatpush.msra.mxu1 %v1763_v14  ;;  %v3458_v38 = vsel %vm2043_vm7, 1.0, %v4228_v24  ;;  %1771 = vrot.lane.b32.xlu2 %v1736_v56, %s4229_s24  ;;  %vm5636_vm9 = vmmov %vm5635_vm2 }
 0x6a9   : > { %v5024_v47 = vpack.i.bf16 %v3458_v38, %v3456_v39  ;;  %3792 = vrot.lane.b32.xlu1 %v5021_v37, %s4232_s30  ;;  %vm5637_vm11 = vmmov %vm5635_vm2 }
 0x6aa   : > { %v1694_v57 = vadd.f32 %v1693_v27, %v1692_v58  ;;  %1813 = vmatpush.msra.mxu1 %v1762_v18  ;;  %vm5638_vm1 = vmmov %vm5635_vm2 }
 0x6ab   : > { %3787 = vrot.lane.b32.xlu0 %v5024_v47, %s4232_s30 }
 0x6ac   : > { %v1696_v9 = vadd.f32 %v1695_v54, %v1694_v57  ;;  %1814 = vmatpush.msra.mxu1 %v1761_v2 }
 0x6ae   : > { %v1698_v0 = vadd.f32 %v1697_v36, %v1696_v9 }
 0x6b0   : > { %v1699_v46 = vrot.slane %v1698_v0, 4 }
 0x6b2   : > { %v1700_v7 = vadd.f32 %v1699_v46, %v1698_v0 }
 0x6b4   : > { %v1701_v17 = vrot.slane %v1700_v7, 2 }
 0x6b6   : > { %v1702_v30 = vadd.f32 %v1701_v17, %v1700_v7 }
 0x6b8   : > { %v1703_v60 = vrot.slane %v1702_v30, 1 }
 0x6ba   : > { %v1704_v35 = vadd.f32 %v1703_v60, %v1702_v30 }
 0x6bc   : > { %v1705_v5 = vmul.f32 %v1704_v35, %v4883_v23 }
 0x6be   : > { %v1706_v40 = vadd.f32 1e-05, %v1705_v5 }
 0x6c0   : > { %3961 = vrsqrt.f32 %v1706_v40  ;;  %vm1713_vm13 = vweird.f32 %v1706_v40 }
 0x6c6   : > { %v3962_v53 = vpop.eup %3961 }
 0x6c7   : > { %v1708_v3 = vmul.f32 %v3962_v53, %v1706_v40  ;;  %vm1714_vm12 = vweird.f32 %v3962_v53 }
 0x6c8   : > { %vm1715_vm14 = vmor %vm1713_vm13, %vm1714_vm12 }
 0x6c9   : > { %v1709_v55 = vmul.f32 %v3962_v53, %v1708_v3 }
 0x6cb   : > { %v1710_v31 = vmul.f32 0.5, %v1709_v55 }
 0x6cd   : > { %v1711_v20 = vsub.f32 1.5, %v1710_v31 }
 0x6cf   : > { %v1712_v11 = vmul.f32 %v3962_v53, %v1711_v20 }
 0x6d1   : > { %v1716_v24 = vsel %vm1715_vm14, %v3962_v53, %v1712_v11 }
 0x6d2   : > { %v1717_v58 = vmul.f32 %v1716_v24, %v4962_v33  ;;  %v1718_v27 = vmul.f32 %v1716_v24, %v4964_v63  ;;  %v1719_v57 = vmul.f32 %v1716_v24, %v4966_v61  ;;  %v1720_v54 = vmul.f32 %v1716_v24, %v4968_v26 }
 0x6d3   : > { %v1721_v9 = vmul.f32 %v1716_v24, %v4970_v34  ;;  %v1722_v33 = vmul.f32 %v1716_v24, %v4978_v6  ;;  %v1723_v63 = vmul.f32 %v1716_v24, %v4984_v45  ;;  %v1724_v61 = vmul.f32 %v1716_v24, %v4989_v52 }
 0x6d4   : > { %3447 = vmatmul.msk.f32.vlgmr.msra.gmra.mxu1 %vm5631_vm15, %v1717_v58 }
 0x6dc   : > { %3448 = vmatmul.msk.f32.gmra.mxu1 %vm5626_vm3, %v1718_v27 }
 0x6e4   : > { %3449 = vmatmul.msk.f32.gmra.mxu1 %vm5632_vm4, %v1719_v57 }
 0x6ec   : > { %3450 = vmatmul.msk.f32.gmra.mxu1 %vm5633_vm5, %v1720_v54 }
 0x6f4   : > { %3451 = vmatmul.msk.f32.gmra.mxu1 %vm5634_vm6, %v1721_v9 }
 0x6fc   : > { %3452 = vmatmul.msk.f32.gmra.mxu1 %vm5635_vm2, %v1722_v33 }
 0x702   : > { %v1772_v34 = vpop.permute.xlu2 %1771 }
 0x704   : > { %3453 = vmatmul.msk.f32.gmra.mxu1 %vm5636_vm9, %v1723_v63 }
 0x70c   : > { %3454 = vmatmul.msk.f32.gmra.mxu1 %vm5637_vm11, %v1724_v61 }
 0x70d   : > { %v1770_v0 = vpop.permute.xlu1 %1769 }
 0x70e   : > { %v1773_v49 = vsel %vm5638_vm1, %v1770_v0, %v1772_v34 }
 0x71b   : > { %v3793_v29 = vpop.permute.xlu1 %3792 }
 0x71c   : > { %v5072_v43 = vunpack.i.l.bf16 %v3793_v29  ;;  %v5090_v53 = vunpack.i.h.bf16 %v3793_v29 }
 0x71d   : > { %v3788_v6 = vpop.permute.xlu0 %3787 }
 0x71e   : > { %v5050_v45 = vunpack.i.l.bf16 %v3788_v6  ;;  %v5060_v21 = vunpack.i.h.bf16 %v3788_v6 }
 0x751   : > { %v1816_v59 = vpop.f32.mrf.mxu1 }
 0x752   : > { %v5107_v54 = vadd.f32 %v1816_v59, %v1773_v49 }
 0x754   : > { %v2050_v61 = vmul.f32 %v5060_v21, %v5107_v54  ;;  %v1916_v59 = vmul.f32 %v5050_v45, %v5107_v54  ;;  %v1983_v29 = vmul.f32 %v5090_v53, %v5107_v54 }
 0x759   : > { %v1819_v26 = vpop.f32.mrf.mxu1 }
 0x75a   : > { %v5105_v58 = vadd.f32 %v1819_v26, %v1773_v49  ;;  %v1848_v26 = vmul.f32 %v5072_v43, %v5107_v54 }
 0x75c   : > { %v2051_v9 = vmul.f32 %v5060_v21, %v5105_v58  ;;  %v1917_v33 = vmul.f32 %v5050_v45, %v5105_v58  ;;  %v1849_v63 = vmul.f32 %v5072_v43, %v5105_v58 }
 0x761   : > { %v1822_v36 = vpop.f32.mrf.mxu1 }
 0x762   : > { %v5062_v13 = vadd.f32 %v1822_v36, %v1773_v49  ;;  %v2125_v36 = vpack.c.bf16 %v2051_v9, %v2050_v61 }
 0x764   : > { %v2052_v18 = vmul.f32 %v5060_v21, %v5062_v13  ;;  %v1918_v11 = vmul.f32 %v5050_v45, %v5062_v13 }
 0x769   : > { %v1825_v12 = vpop.f32.mrf.mxu1 }
 0x76a   : > { %v5058_v4 = vadd.f32 %v1825_v12, %v1773_v49  ;;  %v2117_v12 = vpack.c.bf16 %v1917_v33, %v1916_v59 }
 0x76c   : > { %v2053_v17 = vmul.f32 %v5060_v21, %v5058_v4  ;;  %v1919_v55 = vmul.f32 %v5050_v45, %v5058_v4 }
 0x76e   : > { %v2126_v19 = vpack.c.bf16 %v2053_v17, %v2052_v18  ;;  %v2118_v27 = vpack.c.bf16 %v1919_v55, %v1918_v11  ;;  %v1850_v17 = vmul.f32 %v5072_v43, %v5062_v13 }
 0x771   : > { %v1828_v62 = vpop.f32.mrf.mxu1 }
 0x772   : > { %v5048_v46 = vadd.f32 %v1828_v62, %v1773_v49  ;;  %v2113_v62 = vpack.c.bf16 %v1849_v63, %v1848_v26 }
 0x774   : > { %v1920_v52 = vmul.f32 %v5050_v45, %v5048_v46  ;;  %v2054_v20 = vmul.f32 %v5060_v21, %v5048_v46  ;;  %v1987_v24 = vmul.f32 %v5090_v53, %v5048_v46 }
 0x779   : > { %v1831_v8 = vpop.f32.mrf.mxu1 }
 0x77a   : > { %v5052_v48 = vadd.f32 %v1831_v8, %v1773_v49 }
 0x77c   : > { %v1921_v10 = vmul.f32 %v5050_v45, %v5052_v48  ;;  %v2055_v3 = vmul.f32 %v5060_v21, %v5052_v48  ;;  %v1988_v31 = vmul.f32 %v5090_v53, %v5052_v48  ;;  %v1853_v34 = vmul.f32 %v5072_v43, %v5052_v48 }
 0x77e   : > { %v2119_v7 = vpack.c.bf16 %v1921_v10, %v1920_v52  ;;  %v2127_v56 = vpack.c.bf16 %v2055_v3, %v2054_v20  ;;  %v2123_v57 = vpack.c.bf16 %v1988_v31, %v1987_v24  ;;  %v1986_v10 = vmul.f32 %v5090_v53, %v5058_v4 }
 0x780   : > { %2157 = vrot.lane.b32.xlu1 %v2119_v7, %s4233_s5  ;;  %v1851_v7 = vmul.f32 %v5072_v43, %v5058_v4 }
 0x781   : > { %v1834_v14 = vpop.f32.mrf.mxu1 }
 0x782   : > { %v5069_v28 = vadd.f32 %v1834_v14, %v1773_v49  ;;  %v1985_v14 = vmul.f32 %v5090_v53, %v5062_v13 }
 0x784   : > { %v2056_v2 = vmul.f32 %v5060_v21, %v5069_v28  ;;  %v1922_v60 = vmul.f32 %v5050_v45, %v5069_v28  ;;  %v1854_v32 = vmul.f32 %v5072_v43, %v5069_v28  ;;  %v1989_v6 = vmul.f32 %v5090_v53, %v5069_v28 }
 0x785   : > { %v2122_v18 = vpack.c.bf16 %v1986_v10, %v1985_v14 }
 0x788   : > { %2171 = vrot.lane.b32.xlu1 %v2126_v19, %s4233_s5  ;;  %v2114_v19 = vpack.c.bf16 %v1851_v7, %v1850_v17 }
 0x789   : > { %v1837_v25 = vpop.f32.mrf.mxu1 }
 0x78a   : > { %v5074_v30 = vadd.f32 %v1837_v25, %v1773_v49  ;;  %v1852_v49 = vmul.f32 %v5072_v43, %v5048_v46 }
 0x78c   : > { %v2057_v35 = vmul.f32 %v5060_v21, %v5074_v30  ;;  %v1923_v5 = vmul.f32 %v5050_v45, %v5074_v30  ;;  %v1855_v39 = vmul.f32 %v5072_v43, %v5074_v30  ;;  %v1990_v0 = vmul.f32 %v5090_v53, %v5074_v30 }
 0x78d   : > { %v2115_v8 = vpack.c.bf16 %v1853_v34, %v1852_v49 }
 0x78e   : > { %v2128_v40 = vpack.c.bf16 %v2057_v35, %v2056_v2  ;;  %v2120_v41 = vpack.c.bf16 %v1923_v5, %v1922_v60  ;;  %v2116_v38 = vpack.c.bf16 %v1855_v39, %v1854_v32  ;;  %v2124_v52 = vpack.c.bf16 %v1990_v0, %v1989_v6 }
 0x790   : > { %2175 = vrot.lane.b32.xlu0 %v2128_v40, %s4233_s5  ;;  %2159 = vrot.lane.b32.xlu2 %v2120_v41, %s4233_s5 }
 0x791   : > { %2151 = vrot.lane.b32.xlu1 %v2116_v38, %s4233_s5 }
 0x798   : > { %2173 = vrot.lane.b32.xlu2 %v2127_v56, %s4233_s5  ;;  %2155 = vrot.lane.b32.xlu0 %v2118_v27, %s4233_s5 }
 0x799   : > { %2165 = vrot.lane.b32.xlu1 %v2123_v57, %s4233_s5 }
 0x7a0   : > { %2169 = vrot.lane.b32.xlu0 %v2125_v36, %s4233_s5  ;;  %2153 = vrot.lane.b32.xlu2 %v2117_v12, %s4233_s5 }
 0x7a1   : > { %2145 = vrot.lane.b32.xlu1 %v2113_v62, %s4233_s5 }
 0x7a8   : > { %2149 = vrot.lane.b32.xlu0 %v2115_v8, %s4233_s5  ;;  %2167 = vrot.lane.b32.xlu2 %v2124_v52, %s4233_s5 }
 0x7a9   : > { %3802 = vrot.lane.b32.xlu1 %v5021_v37, %s4229_s24  ;;  %v1984_v37 = vmul.f32 %v5090_v53, %v5105_v58 }
 0x7ab   : > { %v2121_v25 = vpack.c.bf16 %v1984_v37, %v1983_v29 }
 0x7b0   : > { %2163 = vrot.lane.b32.xlu0 %v2122_v18, %s4233_s5  ;;  %2147 = vrot.lane.b32.xlu2 %v2114_v19, %s4233_s5 }
 0x7b8   : > { %3797 = vrot.lane.b32.xlu0 %v5024_v47, %s4229_s24  ;;  %2161 = vrot.lane.b32.xlu2 %v2121_v25, %s4233_s5 }
 0x7ea   : > { %v2160_v2 = vpop.permute.xlu2 %2159 }
 0x7eb   : > { %v2211_v60 = vsel %vm5587_vm10, %v2160_v2, 0 }
 0x7ec   : > { %2237 = vmatpush.bf16.xpose.msra.mxu0 %v2211_v60 }
 0x7f2   : > { %v2158_v35 = vpop.permute.xlu1 %2157  ;;  %v2174_v40 = vpop.permute.xlu2 %2173 }
 0x7f3   : > { %v2208_v5 = vsel %vm5587_vm10, %v2158_v35, 0  ;;  %v2232_v38 = vsel %vm5587_vm10, %v2174_v40, 0 }
 0x7f4   : > { %2238 = vmatpush.bf16.xpose.msra.mxu0 %v2208_v5 }
 0x7fa   : > { %v2172_v3 = vpop.permute.xlu1 %2171  ;;  %v2154_v55 = vpop.permute.xlu2 %2153 }
 0x7fb   : > { %v2229_v20 = vsel %vm5587_vm10, %v2172_v3, 0  ;;  %v2202_v11 = vsel %vm5587_vm10, %v2154_v55, 0  ;;  %v2109_v55 = vpack.c.bf16 %v5105_v58, %v5107_v54 }
 0x802   : > { %v2176_v32 = vpop.permute.xlu0 %2175  ;;  %v2168_v9 = vpop.permute.xlu2 %2167 }
 0x803   : > { %v2235_v39 = vsel %vm5587_vm10, %v2176_v32, 0  ;;  %v2152_v24 = vpop.permute.xlu1 %2151  ;;  %v2223_v61 = vsel %vm5587_vm10, %v2168_v9, 0 }
 0x804   : > { %2266 = vmatpush.bf16.xpose.msra.mxu2 %v2235_v39  ;;  %v2199_v27 = vsel %vm5587_vm10, %v2152_v24, 0 }
 0x80a   : > { %v2156_v41 = vpop.permute.xlu0 %2155  ;;  %v2148_v26 = vpop.permute.xlu2 %2147 }
 0x80b   : > { %v2205_v47 = vsel %vm5587_vm10, %v2156_v41, 0  ;;  %v2166_v33 = vpop.permute.xlu1 %2165  ;;  %v2193_v34 = vsel %vm5587_vm10, %v2148_v26, 0 }
 0x80c   : > { %2239 = vmatpush.bf16.xpose.msra.mxu0 %v2205_v47  ;;  %2267 = vmatpush.bf16.xpose.msra.mxu2 %v2232_v38  ;;  %v2220_v62 = vsel %vm5587_vm10, %v2166_v33, 0 }
 0x812   : > { %v2170_v31 = vpop.permute.xlu0 %2169  ;;  %v2162_v40 = vpop.permute.xlu2 %2161 }
 0x813   : > { %v2226_v57 = vsel %vm5587_vm10, %v2170_v31, 0  ;;  %v2146_v36 = vpop.permute.xlu1 %2145  ;;  %v2214_v31 = vsel %vm5587_vm10, %v2162_v40, 0 }
 0x814   : > { %2240 = vmatpush.bf16.xpose.msra.mxu0 %v2202_v11  ;;  %2268 = vmatpush.bf16.xpose.msra.mxu2 %v2229_v20  ;;  %v2190_v37 = vsel %vm5587_vm10, %v2146_v36, 0 }
 0x81a   : > { %v2150_v56 = vpop.permute.xlu0 %2149 }
 0x81b   : > { %v2196_v59 = vsel %vm5587_vm10, %v2150_v56, 0  ;;  %v3803_v5 = vpop.permute.xlu1 %3802 }
 0x81c   : > { %2241 = vmatpush.bf16.xpose.msra.mxu0 %v2199_v27  ;;  %2269 = vmatpush.bf16.xpose.msra.mxu2 %v2226_v57  ;;  %v3804_v41 = vunpack.i.l.bf16 %v3803_v5  ;;  %v3805_v9 = vunpack.i.h.bf16 %v3803_v5 }
 0x81e   : > { %v1865_v24 = vmul.f32 %v3804_v41, %v5069_v28  ;;  %v1866_v56 = vmul.f32 %v3804_v41, %v5074_v30  ;;  %v2001_v26 = vmul.f32 %v3805_v9, %v5074_v30  ;;  %v1863_v36 = vmul.f32 %v3804_v41, %v5048_v46 }
 0x822   : > { %v2164_v63 = vpop.permute.xlu0 %2163 }
 0x823   : > { %v2217_v29 = vsel %vm5587_vm10, %v2164_v63, 0  ;;  %v3841_v63 = vpack.i.bf16 %v1866_v56, %v1865_v24 }
 0x824   : > { %2242 = vmatpush.bf16.xpose.msra.mxu0 %v2196_v59  ;;  %2270 = vmatpush.bf16.xpose.msra.mxu2 %v2223_v61  ;;  %v2000_v59 = vmul.f32 %v3805_v9, %v5069_v28 }
 0x82a   : > { %v3798_v12 = vpop.permute.xlu0 %3797 }
 0x82b   : > { %v3800_v0 = vunpack.i.h.bf16 %v3798_v12  ;;  %v3799_v49 = vunpack.i.l.bf16 %v3798_v12  ;;  %v1864_v12 = vmul.f32 %v3804_v41, %v5052_v48 }
 0x82c   : > { %2243 = vmatpush.bf16.xpose.msra.mxu0 %v2193_v34  ;;  %2271 = vmatpush.bf16.xpose.msra.mxu2 %v2220_v62  ;;  %v1861_v62 = vmul.f32 %v3804_v41, %v5062_v13  ;;  %v1862_v34 = vmul.f32 %v3804_v41, %v5058_v4 }
 0x82d   : > { %v1931_v6 = vmul.f32 %v3799_v49, %v5048_v46  ;;  %v1932_v8 = vmul.f32 %v3799_v49, %v5052_v48  ;;  %v1933_v52 = vmul.f32 %v3799_v49, %v5069_v28  ;;  %v1934_v10 = vmul.f32 %v3799_v49, %v5074_v30 }
 0x82e   : > { %v2067_v7 = vmul.f32 %v3800_v0, %v5069_v28  ;;  %v2068_v14 = vmul.f32 %v3800_v0, %v5074_v30  ;;  %v2065_v25 = vmul.f32 %v3800_v0, %v5048_v46  ;;  %v2066_v2 = vmul.f32 %v3800_v0, %v5052_v48 }
 0x82f   : > { %v3811_v17 = vpack.i.bf16 %v1932_v8, %v1931_v6  ;;  %v3806_v18 = vpack.i.bf16 %v1934_v10, %v1933_v52  ;;  %v1929_v60 = vmul.f32 %v3799_v49, %v5062_v13  ;;  %v1930_v35 = vmul.f32 %v3799_v49, %v5058_v4 }
 0x830   : > { %v3816_v19 = vpack.i.bf16 %v2068_v14, %v2067_v7  ;;  %v1927_v32 = vmul.f32 %v3799_v49, %v5107_v54  ;;  %v1928_v39 = vmul.f32 %v3799_v49, %v5105_v58  ;;  %v3826_v38 = vpack.i.bf16 %v2066_v2, %v2065_v25 }
 0x831   : > { %3812 = vrot.lane.b32.xlu0 %v3811_v17, %s4227_s20  ;;  %3807 = vrot.lane.b32.xlu2 %v3806_v18, %s4227_s20  ;;  %v3821_v47 = vpack.i.bf16 %v1930_v35, %v1929_v60  ;;  %v2063_v20 = vmul.f32 %v3800_v0, %v5062_v13  ;;  %v2064_v11 = vmul.f32 %v3800_v0, %v5058_v4 }
 0x832   : > { %3817 = vrot.lane.b32.xlu1 %v3816_v19, %s4227_s20  ;;  %v3831_v3 = vpack.i.bf16 %v1928_v39, %v1927_v32  ;;  %v2061_v27 = vmul.f32 %v3800_v0, %v5107_v54  ;;  %v2062_v57 = vmul.f32 %v3800_v0, %v5105_v58  ;;  %v3856_v0 = vpack.i.bf16 %v2001_v26, %v2000_v59 }
 0x833   : > { %v3836_v33 = vpack.i.bf16 %v2064_v11, %v2063_v20  ;;  %v3851_v49 = vpack.i.bf16 %v1864_v12, %v1863_v36  ;;  %v3861_v6 = vpack.i.bf16 %v1862_v34, %v1861_v62  ;;  %v2110_v8 = vpack.c.bf16 %v5058_v4, %v5062_v13 }
 0x834   : > { %2244 = vmatpush.bf16.xpose.msra.mxu0 %v2190_v37  ;;  %2272 = vmatpush.bf16.xpose.msra.mxu2 %v2217_v29  ;;  %v3846_v61 = vpack.i.bf16 %v2062_v57, %v2061_v27  ;;  %v1998_v52 = vmul.f32 %v3805_v9, %v5048_v46  ;;  %v1999_v10 = vmul.f32 %v3805_v9, %v5052_v48 }
 0x835   : > { %v1859_v7 = vmul.f32 %v3804_v41, %v5107_v54  ;;  %v1860_v14 = vmul.f32 %v3804_v41, %v5105_v58  ;;  %v1996_v17 = vmul.f32 %v3805_v9, %v5062_v13  ;;  %v1997_v18 = vmul.f32 %v3805_v9, %v5058_v4 }
 0x836   : > { %v3866_v19 = vpack.i.bf16 %v1999_v10, %v1998_v52  ;;  %v1994_v25 = vmul.f32 %v3805_v9, %v5107_v54  ;;  %v1995_v2 = vmul.f32 %v3805_v9, %v5105_v58  ;;  %v2111_v4 = vpack.c.bf16 %v5052_v48, %v5048_v46 }
 0x837   : > { %v3871_v37 = vpack.i.bf16 %v1860_v14, %v1859_v7  ;;  %v3876_v29 = vpack.i.bf16 %v1997_v18, %v1996_v17  ;;  %v2112_v13 = vpack.c.bf16 %v5074_v30, %v5069_v28 }
 0x838   : > { %v3881_v60 = vpack.i.bf16 %v1995_v2, %v1994_v25 }
 0x839   : > { %3827 = vrot.lane.b32.xlu0 %v3826_v38, %s4227_s20  ;;  %3822 = vrot.lane.b32.xlu2 %v3821_v47, %s4227_s20 }
 0x83a   : > { %3832 = vrot.lane.b32.xlu1 %v3831_v3, %s4227_s20 }
 0x83b   : > { %3459 = vmatmul.msk.bf16.vlgmr.msra.gmra.mxu0 %vm5587_vm10, %v2109_v55 }
 0x83c   : > { %2273 = vmatpush.bf16.xpose.msra.mxu2 %v2214_v31 }
 0x841   : > { %3837 = vrot.lane.b32.xlu2 %v3836_v33, %s4227_s20  ;;  %3842 = vrot.lane.b32.xlu0 %v3841_v63, %s4227_s20 }
 0x842   : > { %3847 = vrot.lane.b32.xlu1 %v3846_v61, %s4227_s20 }
 0x843   : > { %3463 = vmatmul.msk.bf16.vlgmr.msra.gmra.mxu2 %vm5587_vm10, %v2109_v55 }
 0x849   : > { %3857 = vrot.lane.b32.xlu0 %v3856_v0, %s4227_s20  ;;  %3852 = vrot.lane.b32.xlu2 %v3851_v49, %s4227_s20 }
 0x84a   : > { %3862 = vrot.lane.b32.xlu1 %v3861_v6, %s4227_s20 }
 0x84b   : > { %3460 = vmatmul.msk.bf16.gmra.mxu0 %vm5587_vm10, %v2110_v8 }
 0x851   : > { %3867 = vrot.lane.b32.xlu2 %v3866_v19, %s4227_s20  ;;  %3872 = vrot.lane.b32.xlu0 %v3871_v37, %s4227_s20 }
 0x852   : > { %3877 = vrot.lane.b32.xlu1 %v3876_v29, %s4227_s20 }
 0x853   : > { %3464 = vmatmul.msk.bf16.gmra.mxu2 %vm5587_vm10, %v2110_v8 }
 0x859   : > { %3882 = vrot.lane.b32.xlu2 %v3881_v60, %s4227_s20 }
 0x85b   : > { %3461 = vmatmul.msk.bf16.gmra.mxu0 %vm5587_vm10, %v2111_v4 }
 0x863   : > { %3465 = vmatmul.msk.bf16.gmra.mxu2 %vm5587_vm10, %v2111_v4 }
 0x86b   : > { %3462 = vmatmul.msk.bf16.gmra.mxu0 %vm5587_vm10, %v2112_v13 }
 0x873   : > { %3466 = vmatmul.msk.bf16.gmra.mxu2 %vm5587_vm10, %v2112_v13 }
 0x88b   : > { %v3808_v54 = vpop.permute.xlu2 %3807 }
 0x88c   : > { %v3810_v35 = vunpack.i.h.bf16 %v3808_v54  ;;  %v3809_v58 = vunpack.i.l.bf16 %v3808_v54 }
 0x88e   : > { %v1974_v5 = vsel %vm5587_vm10, %v3810_v35, %v5050_v45  ;;  %v1973_v46 = vsel %vm5587_vm10, %v3809_v58, %v5050_v45 }
 0x88f   : > { %v2390_v48 = vpack.c.bf16 %v1974_v5, %v1973_v46 }
 0x891   : > { %2399 = vmatpush.bf16.msra.mxu3 %v2390_v48 }
 0x893   : > { %v3823_v32 = vpop.permute.xlu2 %3822 }
 0x894   : > { %v3825_v41 = vunpack.i.h.bf16 %v3823_v32  ;;  %v3824_v28 = vunpack.i.l.bf16 %v3823_v32 }
 0x896   : > { %v1969_v57 = vsel %vm5587_vm10, %v3824_v28, %v5050_v45  ;;  %v1970_v9 = vsel %vm5587_vm10, %v3825_v41, %v5050_v45 }
 0x897   : > { %v2388_v63 = vpack.c.bf16 %v1970_v9, %v1969_v57 }
 0x89b   : > { %v3838_v39 = vpop.permute.xlu2 %3837 }
 0x89c   : > { %v3840_v61 = vunpack.i.h.bf16 %v3838_v39  ;;  %v3839_v59 = vunpack.i.l.bf16 %v3838_v39 }
 0x89e   : > { %v2103_v14 = vsel %vm5587_vm10, %v3839_v59, %v5060_v21  ;;  %v2104_v17 = vsel %vm5587_vm10, %v3840_v61, %v5060_v21 }
 0x89f   : > { %v2396_v19 = vpack.c.bf16 %v2104_v17, %v2103_v14 }
 0x8a3   : > { %v3813_v40 = vpop.permute.xlu0 %3812  ;;  %v3853_v62 = vpop.permute.xlu2 %3852 }
 0x8a4   : > { %v3815_v30 = vunpack.i.h.bf16 %v3813_v40  ;;  %v3814_v38 = vunpack.i.l.bf16 %v3813_v40  ;;  %v3818_v47 = vpop.permute.xlu1 %3817  ;;  %v3855_v37 = vunpack.i.h.bf16 %v3853_v62  ;;  %v3854_v29 = vunpack.i.l.bf16 %v3853_v62 }
 0x8a5   : > { %v3820_v3 = vunpack.i.h.bf16 %v3818_v47  ;;  %v3819_v55 = vunpack.i.l.bf16 %v3818_v47 }
 0x8a6   : > { %v1971_v31 = vsel %vm5587_vm10, %v3814_v38, %v5050_v45  ;;  %v1972_v20 = vsel %vm5587_vm10, %v3815_v30, %v5050_v45  ;;  %v1904_v39 = vsel %vm5587_vm10, %v3854_v29, %v5072_v43  ;;  %v1905_v40 = vsel %vm5587_vm10, %v3855_v37, %v5072_v43 }
 0x8a7   : > { %v2108_v11 = vsel %vm5587_vm10, %v3820_v3, %v5060_v21  ;;  %v2107_v24 = vsel %vm5587_vm10, %v3819_v55, %v5060_v21  ;;  %v2389_v56 = vpack.c.bf16 %v1972_v20, %v1971_v31  ;;  %v2385_v30 = vpack.c.bf16 %v1905_v40, %v1904_v39 }
 0x8a8   : > { %v2398_v27 = vpack.c.bf16 %v2108_v11, %v2107_v24 }
 0x8a9   : > { %2400 = vmatpush.bf16.msra.mxu3 %v2389_v56 }
 0x8aa   : > { %2428 = vmatpush.bf16.msrb.mxu1 %v2398_v27 }
 0x8ab   : > { %v3828_v33 = vpop.permute.xlu0 %3827  ;;  %v3868_v35 = vpop.permute.xlu2 %3867 }
 0x8ac   : > { %v3830_v26 = vunpack.i.h.bf16 %v3828_v33  ;;  %v3829_v36 = vunpack.i.l.bf16 %v3828_v33  ;;  %v3833_v12 = vpop.permute.xlu1 %3832  ;;  %v3870_v38 = vunpack.i.h.bf16 %v3868_v35  ;;  %v3869_v47 = vunpack.i.l.bf16 %v3868_v35 }
 0x8ad   : > { %v3835_v34 = vunpack.i.h.bf16 %v3833_v12  ;;  %v3834_v0 = vunpack.i.l.bf16 %v3833_v12  ;;  %2401 = vmatpush.bf16.msra.mxu3 %v2388_v63 }
 0x8ae   : > { %v2105_v49 = vsel %vm5587_vm10, %v3829_v36, %v5060_v21  ;;  %v2106_v6 = vsel %vm5587_vm10, %v3830_v26, %v5060_v21  ;;  %v2038_v61 = vsel %vm5587_vm10, %v3869_v47, %v5090_v53  ;;  %v2039_v59 = vsel %vm5587_vm10, %v3870_v38, %v5090_v53 }
 0x8af   : > { %v1967_v8 = vsel %vm5587_vm10, %v3834_v0, %v5050_v45  ;;  %v1968_v52 = vsel %vm5587_vm10, %v3835_v34, %v5050_v45  ;;  %v2397_v10 = vpack.c.bf16 %v2106_v6, %v2105_v49  ;;  %v2393_v34 = vpack.c.bf16 %v2039_v59, %v2038_v61 }
 0x8b0   : > { %v2387_v7 = vpack.c.bf16 %v1968_v52, %v1967_v8 }
 0x8b1   : > { %2429 = vmatpush.bf16.msrb.mxu1 %v2397_v10 }
 0x8b2   : > { %2402 = vmatpush.bf16.msra.mxu3 %v2387_v7 }
 0x8b3   : > { %v3843_v18 = vpop.permute.xlu0 %3842  ;;  %v3883_v26 = vpop.permute.xlu2 %3882 }
 0x8b4   : > { %v3848_v25 = vpop.permute.xlu1 %3847  ;;  %v3845_v2 = vunpack.i.h.bf16 %v3843_v18  ;;  %v3844_v60 = vunpack.i.l.bf16 %v3843_v18  ;;  %v3885_v0 = vunpack.i.h.bf16 %v3883_v26  ;;  %v3884_v52 = vunpack.i.l.bf16 %v3883_v26 }
 0x8b5   : > { %v3850_v4 = vunpack.i.h.bf16 %v3848_v25  ;;  %v3849_v13 = vunpack.i.l.bf16 %v3848_v25  ;;  %2430 = vmatpush.bf16.msrb.mxu1 %v2396_v19 }
 0x8b6   : > { %v1906_v45 = vsel %vm5587_vm10, %v3844_v60, %v5072_v43  ;;  %v1907_v54 = vsel %vm5587_vm10, %v3845_v2, %v5072_v43 }
 0x8b7   : > { %v2386_v58 = vpack.c.bf16 %v1907_v54, %v1906_v45  ;;  %v2101_v5 = vsel %vm5587_vm10, %v3849_v13, %v5060_v21  ;;  %v2102_v46 = vsel %vm5587_vm10, %v3850_v4, %v5060_v21  ;;  %v2034_v13 = vsel %vm5587_vm10, %v3884_v52, %v5090_v53 }
 0x8b8   : > { %v2246_v48 = vpop.f32.mrf.mxu0  ;;  %v2395_v32 = vpack.c.bf16 %v2102_v46, %v2101_v5  ;;  %v2035_v45 = vsel %vm5587_vm10, %v3885_v0, %v5090_v53 }
 0x8b9   : > { %2403 = vmatpush.bf16.msra.mxu3 %v2386_v58  ;;  %v3467_v41 = vclamps-f32 %v2246_v48, 5.0  ;;  %v2391_v5 = vpack.c.bf16 %v2035_v45, %v2034_v13 }
 0x8ba   : > { %2431 = vmatpush.bf16.msrb.mxu1 %v2395_v32 }
 0x8bb   : > { %v3858_v28 = vpop.permute.xlu0 %3857  ;;  %v2327_v56 = vmul.f32 1.442695, %v3467_v41 }
 0x8bc   : > { %v3860_v3 = vunpack.i.h.bf16 %v3858_v28  ;;  %v3859_v55 = vunpack.i.l.bf16 %v3858_v28  ;;  %v3863_v31 = vpop.permute.xlu1 %3862 }
 0x8bd   : > { %v3865_v20 = vunpack.i.h.bf16 %v3863_v31  ;;  %v3864_v21 = vunpack.i.l.bf16 %v3863_v31  ;;  %2404 = vmatpush.bf16.msra.mxu3 %v2385_v30  ;;  %3963 = vpow2.f32 %v2327_v56 }
 0x8be   : > { %v2040_v11 = vsel %vm5587_vm10, %v3859_v55, %v5090_v53  ;;  %v2041_v24 = vsel %vm5587_vm10, %v3860_v3, %v5090_v53 }
 0x8bf   : > { %v1902_v27 = vsel %vm5587_vm10, %v3864_v21, %v5072_v43  ;;  %v1903_v57 = vsel %vm5587_vm10, %v3865_v20, %v5072_v43  ;;  %v2394_v9 = vpack.c.bf16 %v2041_v24, %v2040_v11 }
 0x8c0   : > { %v2248_v33 = vpop.f32.mrf.mxu0  ;;  %v2384_v63 = vpack.c.bf16 %v1903_v57, %v1902_v27 }
 0x8c1   : > { %v3469_v36 = vclamps-f32 %v2248_v33, 5.0  ;;  %2432 = vmatpush.bf16.msrb.mxu1 %v2394_v9 }
 0x8c2   : > { %2405 = vmatpush.bf16.msra.mxu3 %v2384_v63 }
 0x8c3   : > { %v2331_v12 = vmul.f32 1.442695, %v3469_v36  ;;  %v3873_v62 = vpop.permute.xlu0 %3872  ;;  %v3964_v60 = vpop.eup %3963 }
 0x8c4   : > { %v3878_v49 = vpop.permute.xlu1 %3877  ;;  %v3875_v6 = vunpack.i.h.bf16 %v3873_v62  ;;  %v3874_v8 = vunpack.i.l.bf16 %v3873_v62  ;;  %v2359_v35 = vmul.f32 %v3964_v60, %v4739_v22 }
 0x8c5   : > { %3965 = vpow2.f32 %v2331_v12  ;;  %v3880_v10 = vunpack.i.h.bf16 %v3878_v49  ;;  %v3879_v7 = vunpack.i.l.bf16 %v3878_v49  ;;  %2433 = vmatpush.bf16.msrb.mxu1 %v2393_v34 }
 0x8c6   : > { %v2275_v14 = vpop.f32.mrf.mxu2  ;;  %v1900_v17 = vsel %vm5587_vm10, %v3874_v8, %v5072_v43  ;;  %v1901_v18 = vsel %vm5587_vm10, %v3875_v6, %v5072_v43 }
 0x8c7   : > { %v2383_v19 = vpack.c.bf16 %v1901_v18, %v1900_v17  ;;  %v2036_v37 = vsel %vm5587_vm10, %v3879_v7, %v5090_v53  ;;  %v2037_v29 = vsel %vm5587_vm10, %v3880_v10, %v5090_v53  ;;  %v3468_v4 = vclamps-f32 %v2275_v14, 5.0 }
 0x8c8   : > { %v2251_v25 = vpop.f32.mrf.mxu0  ;;  %v2392_v2 = vpack.c.bf16 %v2037_v29, %v2036_v37 }
 0x8c9   : > { %2406 = vmatpush.bf16.msra.mxu3 %v2383_v19  ;;  %v3471_v54 = vclamps-f32 %v2251_v25, 5.0  ;;  %v2329_v46 = vmul.f32 1.442695, %v3468_v4 }
 0x8ca   : > { %2434 = vmatpush.bf16.msrb.mxu1 %v2392_v2 }
 0x8cb   : > { %v3966_v43 = vpop.eup %3965  ;;  %v2335_v48 = vmul.f32 1.442695, %v3471_v54  ;;  %3967 = vpow2.f32 %v2329_v46 }
 0x8cc   : > { %v2361_v58 = vmul.f32 %v3966_v43, %v4734_v16 }
 0x8cd   : > { %3969 = vpow2.f32 %v2335_v48 }
 0x8ce   : > { %2435 = vmatpush.bf16.msrb.mxu1 %v2391_v5  ;;  %v2277_v32 = vpop.f32.mrf.mxu2  ;;  %v2375_v39 = vpack.c.bf16 %v2361_v58, %v2359_v35 }
 0x8cf   : > { %v3470_v40 = vclamps-f32 %v2277_v32, 5.0 }
 0x8d0   : > { %v2253_v41 = vpop.f32.mrf.mxu0  ;;  %2407 = vmatmul.bf16.vlgmr.msra.gmra.mxu3 %v2375_v39 }
 0x8d1   : > { %v2333_v28 = vmul.f32 1.442695, %v3470_v40  ;;  %v3473_v30 = vclamps-f32 %v2253_v41, 5.0  ;;  %v3968_v47 = vpop.eup %3967 }
 0x8d2   : > { %v2360_v21 = vmul.f32 %v3968_v47, %v4739_v22 }
 0x8d3   : > { %3971 = vpow2.f32 %v2333_v28  ;;  %v2339_v53 = vmul.f32 1.442695, %v3473_v30  ;;  %v3970_v3 = vpop.eup %3969 }
 0x8d4   : > { %v2363_v57 = vmul.f32 %v3970_v3, %v4753_v51 }
 0x8d5   : > { %3973 = vpow2.f32 %v2339_v53 }
 0x8d6   : > { %v2280_v38 = vpop.f32.mrf.mxu2 }
 0x8d7   : > { %v3472_v20 = vclamps-f32 %v2280_v38, 5.0 }
 0x8d8   : > { %v2256_v55 = vpop.f32.mrf.mxu0 }
 0x8d9   : > { %v3972_v31 = vpop.eup %3971  ;;  %v3475_v24 = vclamps-f32 %v2256_v55, 5.0  ;;  %v2337_v33 = vmul.f32 1.442695, %v3472_v20 }
 0x8da   : > { %v2362_v11 = vmul.f32 %v3972_v31, %v4734_v16 }
 0x8db   : > { %v3974_v56 = vpop.eup %3973  ;;  %v2343_v63 = vmul.f32 1.442695, %v3475_v24  ;;  %3975 = vpow2.f32 %v2337_v33 }
 0x8dc   : > { %v2376_v27 = vpack.c.bf16 %v2362_v11, %v2360_v21  ;;  %v2365_v9 = vmul.f32 %v3974_v56, %v4748_v50 }
 0x8dd   : > { %3977 = vpow2.f32 %v2343_v63 }
 0x8de   : > { %v2282_v61 = vpop.f32.mrf.mxu2  ;;  %2436 = vmatmul.bf16.vlgmr.msrb.gmra.mxu1 %v2376_v27  ;;  %v2377_v59 = vpack.c.bf16 %v2365_v9, %v2363_v57 }
 0x8df   : > { %v3474_v26 = vclamps-f32 %v2282_v61, 5.0 }
 0x8e0   : > { %v2258_v36 = vpop.f32.mrf.mxu0  ;;  %2412 = vmatmul.bf16.gmra.mxu3 %v2377_v59 }
 0x8e1   : > { %v2341_v12 = vmul.f32 1.442695, %v3474_v26  ;;  %v3477_v22 = vclamps-f32 %v2258_v36, 5.0  ;;  %v3976_v34 = vpop.eup %3975 }
 0x8e2   : > { %v2364_v10 = vmul.f32 %v3976_v34, %v4753_v51 }
 0x8e3   : > { %3979 = vpow2.f32 %v2341_v12  ;;  %v2347_v16 = vmul.f32 1.442695, %v3477_v22  ;;  %v3978_v0 = vpop.eup %3977 }
 0x8e4   : > { %v2367_v18 = vmul.f32 %v3978_v0, %v4767_v1 }
 0x8e5   : > { %3981 = vpow2.f32 %v2347_v16 }
 0x8e6   : > { %v2285_v62 = vpop.f32.mrf.mxu2 }
 0x8e7   : > { %v3476_v8 = vclamps-f32 %v2285_v62, 5.0 }
 0x8e8   : > { %v2261_v49 = vpop.f32.mrf.mxu0 }
 0x8e9   : > { %v3980_v6 = vpop.eup %3979  ;;  %v3479_v52 = vclamps-f32 %v2261_v49, 5.0  ;;  %v2345_v37 = vmul.f32 1.442695, %v3476_v8 }
 0x8ea   : > { %v2366_v7 = vmul.f32 %v3980_v6, %v4748_v50 }
 0x8eb   : > { %v3982_v14 = vpop.eup %3981  ;;  %v2351_v29 = vmul.f32 1.442695, %v3479_v52  ;;  %3983 = vpow2.f32 %v2345_v37 }
 0x8ec   : > { %v2378_v17 = vpack.c.bf16 %v2366_v7, %v2364_v10  ;;  %v2369_v19 = vmul.f32 %v3982_v14, %v4762_v15 }
 0x8ed   : > { %3985 = vpow2.f32 %v2351_v29 }
 0x8ee   : > { %v2287_v25 = vpop.f32.mrf.mxu2  ;;  %2441 = vmatmul.bf16.gmra.mxu1 %v2378_v17  ;;  %v2379_v2 = vpack.c.bf16 %v2369_v19, %v2367_v18 }
 0x8ef   : > { %v3478_v60 = vclamps-f32 %v2287_v25, 5.0 }
 0x8f0   : > { %v2263_v4 = vpop.f32.mrf.mxu0  ;;  %2417 = vmatmul.bf16.gmra.mxu3 %v2379_v2 }
 0x8f1   : > { %v2349_v13 = vmul.f32 1.442695, %v3478_v60  ;;  %v3481_v45 = vclamps-f32 %v2263_v4, 5.0  ;;  %v3984_v54 = vpop.eup %3983 }
 0x8f2   : > { %v2368_v5 = vmul.f32 %v3984_v54, %v4767_v1 }
 0x8f3   : > { %3987 = vpow2.f32 %v2349_v13  ;;  %v2355_v50 = vmul.f32 1.442695, %v3481_v45  ;;  %v3986_v43 = vpop.eup %3985 }
 0x8f4   : > { %v2371_v39 = vmul.f32 %v3986_v43, %v4781_v44 }
 0x8f5   : > { %3989 = vpow2.f32 %v2355_v50 }
 0x8f6   : > { %v2290_v51 = vpop.f32.mrf.mxu2 }
 0x8f7   : > { %v3480_v58 = vclamps-f32 %v2290_v51, 5.0 }
 0x8f9   : > { %v3988_v35 = vpop.eup %3987  ;;  %v2353_v41 = vmul.f32 1.442695, %v3480_v58 }
 0x8fa   : > { %v2370_v46 = vmul.f32 %v3988_v35, %v4762_v15 }
 0x8fb   : > { %v3990_v48 = vpop.eup %3989  ;;  %3991 = vpow2.f32 %v2353_v41 }
 0x8fc   : > { %v2380_v32 = vpack.c.bf16 %v2370_v46, %v2368_v5  ;;  %v2373_v40 = vmul.f32 %v3990_v48, %v4776_v42 }
 0x8fe   : > { %v2292_v28 = vpop.f32.mrf.mxu2  ;;  %2446 = vmatmul.bf16.gmra.mxu1 %v2380_v32  ;;  %v2381_v30 = vpack.c.bf16 %v2373_v40, %v2371_v39 }
 0x8ff   : > { %v3482_v53 = vclamps-f32 %v2292_v28, 5.0 }
 0x900   : > { %2422 = vmatmul.bf16.gmra.mxu3 %v2381_v30 }
 0x901   : > { %v2357_v38 = vmul.f32 1.442695, %v3482_v53  ;;  %v3992_v47 = vpop.eup %3991 }
 0x902   : > { %v2372_v1 = vmul.f32 %v3992_v47, %v4781_v44 }
 0x903   : > { %3993 = vpow2.f32 %v2357_v38 }
 0x909   : > { %v3994_v3 = vpop.eup %3993 }
 0x90a   : > { %v2374_v15 = vmul.f32 %v3994_v3, %v4776_v42 }
 0x90c   : > { %v2382_v55 = vpack.c.bf16 %v2374_v15, %v2372_v1 }
 0x90e   : > { %2451 = vmatmul.bf16.gmra.mxu1 %v2382_v55 }
 0x953   : > { %v2408_v31 = vpop.f32.mrf.mxu3 }
 0x95b   : > { %v2410_v20 = vpop.f32.mrf.mxu3  ;;  %v2437_v21 = vpop.f32.mrf.mxu1 }
 0x95c   : > { %v5316_v11 = vadd.f32 %v2437_v21, %v2408_v31 }
 0x95e   : > { %vm2457_vm8 = vcmp.gt.f32.partialorder %v5316_v11, 0.0 }
 0x95f   : > { %v2465_v24 = vsel %vm2457_vm8, %v5316_v11, 1.0 }
 0x960   : > { %2481 = vrot.lane.b32.xlu0 %v2465_v24, %s4233_s5 }
 0x963   : > { %v2413_v56 = vpop.f32.mrf.mxu3  ;;  %v2439_v27 = vpop.f32.mrf.mxu1 }
 0x964   : > { %v5323_v44 = vadd.f32 %v2439_v27, %v2410_v20 }
 0x966   : > { %vm2458_vm0 = vcmp.gt.f32.partialorder %v5323_v44, 0.0 }
 0x967   : > { %v2466_v42 = vsel %vm2458_vm0, %v5323_v44, 1.0 }
 0x968   : > { %2483 = vrot.lane.b32.xlu1 %v2466_v42, %s4233_s5 }
 0x96b   : > { %v2415_v57 = vpop.f32.mrf.mxu3  ;;  %v2442_v9 = vpop.f32.mrf.mxu1 }
 0x96c   : > { %v5330_v33 = vadd.f32 %v2442_v9, %v2413_v56 }
 0x96e   : > { %vm2459_vm7 = vcmp.gt.f32.partialorder %v5330_v33, 0.0 }
 0x96f   : > { %v2467_v63 = vsel %vm2459_vm7, %v5330_v33, 1.0 }
 0x970   : > { %2485 = vrot.lane.b32.xlu2 %v2467_v63, %s4233_s5 }
 0x973   : > { %v2444_v61 = vpop.f32.mrf.mxu1  ;;  %v2418_v26 = vpop.f32.mrf.mxu3 }
 0x974   : > { %v5337_v59 = vadd.f32 %v2444_v61, %v2415_v57 }
 0x976   : > { %vm2460_vm12 = vcmp.gt.f32.partialorder %v5337_v59, 0.0 }
 0x977   : > { %v2468_v36 = vsel %vm2460_vm12, %v5337_v59, 1.0 }
 0x978   : > { %2487 = vrot.lane.b32.xlu0 %v2468_v36, %s4233_s5 }
 0x97b   : > { %v2447_v12 = vpop.f32.mrf.mxu1  ;;  %v2420_v16 = vpop.f32.mrf.mxu3 }
 0x97c   : > { %v5344_v22 = vadd.f32 %v2447_v12, %v2418_v26 }
 0x97e   : > { %vm2461_vm13 = vcmp.gt.f32.partialorder %v5344_v22, 0.0 }
 0x97f   : > { %v2469_v62 = vsel %vm2461_vm13, %v5344_v22, 1.0 }
 0x980   : > { %2489 = vrot.lane.b32.xlu1 %v2469_v62, %s4233_s5 }
 0x983   : > { %v2449_v34 = vpop.f32.mrf.mxu1  ;;  %v2423_v6 = vpop.f32.mrf.mxu3 }
 0x984   : > { %v5351_v0 = vadd.f32 %v2449_v34, %v2420_v16 }
 0x986   : > { %vm2462_vm14 = vcmp.gt.f32.partialorder %v5351_v0, 0.0 }
 0x987   : > { %v2470_v49 = vsel %vm2462_vm14, %v5351_v0, 1.0 }
 0x988   : > { %2491 = vrot.lane.b32.xlu2 %v2470_v49, %s4233_s5 }
 0x98b   : > { %v2452_v8 = vpop.f32.mrf.mxu1  ;;  %v2425_v7 = vpop.f32.mrf.mxu3 }
 0x98c   : > { %v5358_v52 = vadd.f32 %v2452_v8, %v2423_v6 }
 0x98e   : > { %vm2463_vm15 = vcmp.gt.f32.partialorder %v5358_v52, 0.0 }
 0x98f   : > { %v2471_v10 = vsel %vm2463_vm15, %v5358_v52, 1.0 }
 0x990   : > { %2493 = vrot.lane.b32.xlu0 %v2471_v10, %s4233_s5 }
 0x993   : > { %v2454_v14 = vpop.f32.mrf.mxu1 }
 0x994   : > { %v5365_v17 = vadd.f32 %v2454_v14, %v2425_v7 }
 0x996   : > { %vm2464_vm3 = vcmp.gt.f32.partialorder %v5365_v17, 0.0 }
 0x997   : > { %v2472_v18 = vsel %vm2464_vm3, %v5365_v17, 1.0 }
 0x998   : > { %2495 = vrot.lane.b32.xlu1 %v2472_v18, %s4233_s5 }
 0x9ca   : > { %v2486_v19 = vpop.permute.xlu2 %2485 }
 0x9cb   : > { %3995 = vrcp.f32 %v2486_v19  ;;  %v2546_v60 = vand.u32 2147483648, %v2486_v19  ;;  %v2544_v13 = vand.u32 2147483647, %v2486_v19  ;;  %vm2540_vm5 = vweird.f32 %v2486_v19 }
 0x9cd   : > { %v2547_v51 = vor.u32 1.1754944e-38, %v2546_v60  ;;  %vm2545_vm2 = vcmp.eq.f32.partialorder %v2544_v13, 8.507059e+37 }
 0x9d1   : > { %v3996_v37 = vpop.eup %3995 }
 0x9d2   : > { %v2536_v29 = vmul.f32 %v3996_v37, %v2486_v19  ;;  %v2482_v25 = vpop.permute.xlu0 %2481  ;;  %vm2541_vm4 = vweird.f32 %v3996_v37 }
 0x9d3   : > { %3997 = vrcp.f32 %v2482_v25  ;;  %vm2542_vm6 = vmor %vm2540_vm5, %vm2541_vm4  ;;  %v2516_v48 = vand.u32 2147483648, %v2482_v25  ;;  %v2514_v39 = vand.u32 2147483647, %v2482_v25  ;;  %vm2510_vm11 = vweird.f32 %v2482_v25 }
 0x9d4   : > { %v2537_v2 = vsub.f32 1.0, %v2536_v29 }
 0x9d5   : > { %v2517_v28 = vor.u32 1.1754944e-38, %v2516_v48  ;;  %vm2515_vm4 = vcmp.eq.f32.partialorder %v2514_v39, 8.507059e+37 }
 0x9d6   : > { %v2538_v4 = vmul.f32 %v3996_v37, %v2537_v2 }
 0x9d8   : > { %v2539_v45 = vadd.f32 %v3996_v37, %v2538_v4 }
 0x9d9   : > { %v3998_v50 = vpop.eup %3997 }
 0x9da   : > { %v2506_v54 = vmul.f32 %v3998_v50, %v2482_v25  ;;  %v2484_v43 = vpop.permute.xlu1 %2483  ;;  %v2543_v35 = vsel %vm2542_vm6, %v3996_v37, %v2539_v45  ;;  %vm2511_vm9 = vweird.f32 %v3998_v50 }
 0x9db   : > { %3999 = vrcp.f32 %v2484_v43  ;;  %v2548_v58 = vsel %vm2545_vm2, %v2547_v51, %v2543_v35  ;;  %vm2512_vm1 = vmor %vm2510_vm11, %vm2511_vm9  ;;  %v2531_v15 = vand.u32 2147483648, %v2484_v43  ;;  %v2529_v31 = vand.u32 2147483647, %v2484_v43 }
 0x9dc   : > { %v2507_v5 = vsub.f32 1.0, %v2506_v54  ;;  %v2549_v46 = vmul.f32 %v2548_v58, %v5330_v33  ;;  %vm2525_vm6 = vweird.f32 %v2484_v43 }
 0x9dd   : > { %v2532_v24 = vor.u32 1.1754944e-38, %v2531_v15  ;;  %vm2530_vm9 = vcmp.eq.f32.partialorder %v2529_v31, 8.507059e+37 }
 0x9de   : > { %v2508_v32 = vmul.f32 %v3998_v50, %v2507_v5  ;;  %2637 = vrot.lane.b32.xlu1 %v2549_v46, %s4232_s30 }
 0x9e0   : > { %v2509_v40 = vadd.f32 %v3998_v50, %v2508_v32 }
 0x9e1   : > { %v4000_v41 = vpop.eup %3999 }
 0x9e2   : > { %v2521_v30 = vmul.f32 %v4000_v41, %v2484_v43  ;;  %v2492_v53 = vpop.permute.xlu2 %2491  ;;  %v2513_v38 = vsel %vm2512_vm1, %v3998_v50, %v2509_v40  ;;  %vm2526_vm5 = vweird.f32 %v4000_v41 }
 0x9e3   : > { %4001 = vrcp.f32 %v2492_v53  ;;  %v2518_v47 = vsel %vm2515_vm4, %v2517_v28, %v2513_v38  ;;  %vm2527_vm2 = vmor %vm2525_vm6, %vm2526_vm5  ;;  %v2591_v61 = vand.u32 2147483648, %v2492_v53  ;;  %v2589_v36 = vand.u32 2147483647, %v2492_v53 }
 0x9e4   : > { %v2522_v3 = vsub.f32 1.0, %v2521_v30  ;;  %v2519_v1 = vmul.f32 %v2518_v47, %v5316_v11  ;;  %vm2585_vm1 = vweird.f32 %v2492_v53 }
 0x9e5   : > { %v2592_v62 = vor.u32 1.1754944e-38, %v2591_v61  ;;  %vm2590_vm5 = vcmp.eq.f32.partialorder %v2589_v36, 8.507059e+37 }
 0x9e6   : > { %v2523_v55 = vmul.f32 %v4000_v41, %v2522_v3  ;;  %2633 = vrot.lane.b32.xlu2 %v2519_v1, %s4232_s30 }
 0x9e8   : > { %v2524_v20 = vadd.f32 %v4000_v41, %v2523_v55 }
 0x9e9   : > { %v4002_v21 = vpop.eup %4001 }
 0x9ea   : > { %v2581_v56 = vmul.f32 %v4002_v21, %v2492_v53  ;;  %v2488_v27 = vpop.permute.xlu0 %2487  ;;  %v2528_v42 = vsel %vm2527_vm2, %v4000_v41, %v2524_v20  ;;  %vm2586_vm11 = vweird.f32 %v4002_v21 }
 0x9eb   : > { %4003 = vrcp.f32 %v2488_v27  ;;  %v2533_v57 = vsel %vm2530_vm9, %v2532_v24, %v2528_v42  ;;  %vm2587_vm4 = vmor %vm2585_vm1, %vm2586_vm11  ;;  %v2561_v14 = vand.u32 2147483648, %v2488_v27  ;;  %v2559_v19 = vand.u32 2147483647, %v2488_v27 }
 0x9ec   : > { %v2582_v9 = vsub.f32 1.0, %v2581_v56  ;;  %v2534_v63 = vmul.f32 %v2533_v57, %v5323_v44  ;;  %vm2555_vm2 = vweird.f32 %v2488_v27 }
 0x9ed   : > { %v2562_v25 = vor.u32 1.1754944e-38, %v2561_v14  ;;  %vm2560_vm11 = vcmp.eq.f32.partialorder %v2559_v19, 8.507059e+37 }
 0x9ee   : > { %v2583_v26 = vmul.f32 %v4002_v21, %v2582_v9  ;;  %2635 = vrot.lane.b32.xlu0 %v2534_v63, %s4232_s30 }
 0x9f0   : > { %v2584_v12 = vadd.f32 %v4002_v21, %v2583_v26 }
 0x9f1   : > { %v4004_v16 = vpop.eup %4003 }
 0x9f2   : > { %v2551_v34 = vmul.f32 %v4004_v16, %v2488_v27  ;;  %v2490_v49 = vpop.permute.xlu1 %2489  ;;  %v2588_v6 = vsel %vm2587_vm4, %v4002_v21, %v2584_v12  ;;  %vm2556_vm6 = vweird.f32 %v4004_v16 }
 0x9f3   : > { %4005 = vrcp.f32 %v2490_v49  ;;  %v2593_v8 = vsel %vm2590_vm5, %v2592_v62, %v2588_v6  ;;  %vm2557_vm9 = vmor %vm2555_vm2, %vm2556_vm6  ;;  %v2576_v50 = vand.u32 2147483648, %v2490_v49  ;;  %v2574_v54 = vand.u32 2147483647, %v2490_v49 }
 0x9f4   : > { %v2552_v10 = vsub.f32 1.0, %v2551_v34  ;;  %v2594_v7 = vmul.f32 %v2593_v8, %v5351_v0  ;;  %vm2570_vm4 = vweird.f32 %v2490_v49 }
 0x9f5   : > { %v2577_v35 = vor.u32 1.1754944e-38, %v2576_v50  ;;  %vm2575_vm6 = vcmp.eq.f32.partialorder %v2574_v54, 8.507059e+37 }
 0x9f6   : > { %v2553_v18 = vmul.f32 %v4004_v16, %v2552_v10  ;;  %2643 = vrot.lane.b32.xlu1 %v2594_v7, %s4232_s30 }
 0x9f8   : > { %v2554_v37 = vadd.f32 %v4004_v16, %v2553_v18 }
 0x9f9   : > { %v4006_v29 = vpop.eup %4005 }
 0x9fa   : > { %v2566_v2 = vmul.f32 %v4006_v29, %v2490_v49  ;;  %v2558_v60 = vsel %vm2557_vm9, %v4004_v16, %v2554_v37  ;;  %vm2571_vm1 = vweird.f32 %v4006_v29 }
 0x9fb   : > { %v2563_v4 = vsel %vm2560_vm11, %v2562_v25, %v2558_v60  ;;  %vm2572_vm5 = vmor %vm2570_vm4, %vm2571_vm1 }
 0x9fc   : > { %v2567_v13 = vsub.f32 1.0, %v2566_v2  ;;  %v2564_v45 = vmul.f32 %v2563_v4, %v5337_v59 }
 0x9fe   : > { %v2568_v51 = vmul.f32 %v4006_v29, %v2567_v13  ;;  %2639 = vrot.lane.b32.xlu2 %v2564_v45, %s4232_s30 }
 0xa00   : > { %v2569_v43 = vadd.f32 %v4006_v29, %v2568_v51 }
 0xa02   : > { %v2494_v58 = vpop.permute.xlu0 %2493  ;;  %v2573_v5 = vsel %vm2572_vm5, %v4006_v29, %v2569_v43 }
 0xa03   : > { %4007 = vrcp.f32 %v2494_v58  ;;  %v2578_v46 = vsel %vm2575_vm6, %v2577_v35, %v2573_v5  ;;  %v2606_v28 = vand.u32 2147483648, %v2494_v58  ;;  %v2604_v53 = vand.u32 2147483647, %v2494_v58 }
 0xa04   : > { %v2579_v48 = vmul.f32 %v2578_v46, %v5344_v22  ;;  %vm2600_vm9 = vweird.f32 %v2494_v58 }
 0xa05   : > { %v2607_v3 = vor.u32 1.1754944e-38, %v2606_v28  ;;  %vm2605_vm1 = vcmp.eq.f32.partialorder %v2604_v53, 8.507059e+37 }
 0xa06   : > { %2641 = vrot.lane.b32.xlu0 %v2579_v48, %s4232_s30  ;;  %v2745_v48 = vld [vmem:[#allocation6 + $0x10] sm:$0xff] }
 0xa09   : > { %v4008_v32 = vpop.eup %4007 }
 0xa0a   : > { %v2596_v39 = vmul.f32 %v4008_v32, %v2494_v58  ;;  %v2496_v40 = vpop.permute.xlu1 %2495  ;;  %vm2601_vm2 = vweird.f32 %v4008_v32 }
 0xa0b   : > { %4009 = vrcp.f32 %v2496_v40  ;;  %vm2602_vm11 = vmor %vm2600_vm9, %vm2601_vm2  ;;  %v2621_v21 = vand.u32 2147483648, %v2496_v40  ;;  %v2619_v56 = vand.u32 2147483647, %v2496_v40  ;;  %vm2615_vm5 = vweird.f32 %v2496_v40 }
 0xa0c   : > { %v2597_v41 = vsub.f32 1.0, %v2596_v39  ;;  %vm2665_vm2 = vcmask 261248  }
 0xa0d   : > { %v2622_v42 = vor.u32 1.1754944e-38, %v2621_v21  ;;  %vm2620_vm10 = vcmp.eq.f32.partialorder %v2619_v56, 8.507059e+37 }
 0xa0e   : > { %v2598_v30 = vmul.f32 %v4008_v32, %v2597_v41 }
 0xa10   : > { %v2599_v38 = vadd.f32 %v4008_v32, %v2598_v30 }
 0xa11   : > { %v4010_v47 = vpop.eup %4009 }
 0xa12   : > { %v2611_v1 = vmul.f32 %v4010_v47, %v2496_v40  ;;  %v2603_v15 = vsel %vm2602_vm11, %v4008_v32, %v2599_v38  ;;  %vm2616_vm4 = vweird.f32 %v4010_v47 }
 0xa13   : > { %v2608_v55 = vsel %vm2605_vm1, %v2607_v3, %v2603_v15  ;;  %vm2617_vm6 = vmor %vm2615_vm5, %vm2616_vm4  ;;  %vm5647_vm1 = vcmask 261120  }
 0xa14   : > { %v2612_v31 = vsub.f32 1.0, %v2611_v1  ;;  %v2609_v20 = vmul.f32 %v2608_v55, %v5358_v52  ;;  %v2746_v52 = vld [vmem:[#allocation6 + $0x28] sm:$0xff]  ;;  %vm5648_vm4 = vmmov %vm5647_vm1 }
 0xa15   : > { %v5413_v39 = vpack.i.bf16 %v2745_v48, %v2746_v52  ;;  %v4049_v52 = vld [vmem:[#allocation6 + $0x10] sm:$0xff]  ;;  %vm5649_vm5 = vmmov %vm5647_vm1 }
 0xa16   : > { %v2613_v24 = vmul.f32 %v4010_v47, %v2612_v31  ;;  %2645 = vrot.lane.b32.xlu2 %v2609_v20, %s4232_s30 }
 0xa17   : > { %3887 = vrot.lane.b32.xlu1 %v5413_v39, %s4233_s5 }
 0xa18   : > { %v2614_v27 = vadd.f32 %v4010_v47, %v2613_v24 }
 0xa1a   : > { %v2618_v57 = vsel %vm2617_vm6, %v4010_v47, %v2614_v27  ;;  %vm5650_vm6 = vmmov %vm5647_vm1 }
 0xa1b   : > { %v2623_v9 = vsel %vm2620_vm10, %v2622_v42, %v2618_v57 }
 0xa1c   : > { %v2624_v63 = vmul.f32 %v2623_v9, %v5365_v17 }
 0xa1e   : > { %2647 = vrot.lane.b32.xlu0 %v2624_v63, %s4232_s30 }
 0xa40   : > { %v2634_v26 = vpop.permute.xlu2 %2633 }
 0xa41   : > { %v2657_v12 = vsel %vm2457_vm8, %v2634_v26, 0.0 }
 0xa42   : > { %v2666_v34 = vsel %vm2665_vm2, %v2657_v12, 0.0 }
 0xa50   : > { %v2638_v16 = vpop.permute.xlu1 %2637 }
 0xa51   : > { %v2659_v49 = vsel %vm2459_vm7, %v2638_v16, 0.0  ;;  %vm5639_vm7 = vcmask 130048  }
 0xa52   : > { %v2669_v7 = vsel %vm2665_vm2, %v2659_v49, 0.0 }
 0xa58   : > { %v2640_v8 = vpop.permute.xlu2 %2639 }
 0xa59   : > { %v2660_v44 = vsel %vm2460_vm12, %v2640_v8, 0.0  ;;  %vm5640_vm12 = vmmov %vm5639_vm7 }
 0xa5a   : > { %v2671_v18 = vsel %vm2665_vm2, %v2660_v44, 0.0 }
 0xa60   : > { %v2636_v61 = vpop.permute.xlu0 %2635 }
 0xa61   : > { %v2658_v36 = vsel %vm2458_vm0, %v2636_v61, 0.0 }
 0xa62   : > { %v2667_v62 = vsel %vm2665_vm2, %v2658_v36, 0.0 }
 0xa63   : > { %v2668_v6 = vadd.f32 %v2667_v62, %v2666_v34 }
 0xa65   : > { %v2670_v14 = vadd.f32 %v2669_v7, %v2668_v6 }
 0xa67   : > { %v2672_v29 = vadd.f32 %v2671_v18, %v2670_v14 }
 0xa68   : > { %v2644_v19 = vpop.permute.xlu1 %2643 }
 0xa69   : > { %v2662_v33 = vsel %vm2462_vm14, %v2644_v19, 0.0  ;;  %vm5642_vm14 = vmmov %vm5639_vm7 }
 0xa6a   : > { %v2675_v60 = vsel %vm2665_vm2, %v2662_v33, 0.0 }
 0xa70   : > { %v2646_v2 = vpop.permute.xlu2 %2645 }
 0xa71   : > { %v2663_v59 = vsel %vm2463_vm15, %v2646_v2, 0.0  ;;  %vm5643_vm15 = vmmov %vm5639_vm7 }
 0xa72   : > { %v2677_v22 = vsel %vm2665_vm2, %v2663_v59, 0.0 }
 0xa78   : > { %v2642_v10 = vpop.permute.xlu0 %2641 }
 0xa79   : > { %v2661_v11 = vsel %vm2461_vm13, %v2642_v10, 0.0  ;;  %vm5641_vm13 = vmmov %vm5639_vm7 }
 0xa7a   : > { %v2673_v37 = vsel %vm2665_vm2, %v2661_v11, 0.0 }
 0xa7b   : > { %v2674_v25 = vadd.f32 %v2673_v37, %v2672_v29 }
 0xa7d   : > { %v2676_v4 = vadd.f32 %v2675_v60, %v2674_v25 }
 0xa7f   : > { %v2678_v50 = vadd.f32 %v2677_v22, %v2676_v4 }
 0xa90   : > { %v2648_v13 = vpop.permute.xlu0 %2647 }
 0xa91   : > { %v2664_v45 = vsel %vm2464_vm3, %v2648_v13, 0.0  ;;  %vm5644_vm3 = vmmov %vm5639_vm7 }
 0xa92   : > { %v2679_v51 = vsel %vm2665_vm2, %v2664_v45, 0.0  ;;  %vm5645_vm9 = vmmov %vm5644_vm3 }
 0xa93   : > { %v2680_v54 = vadd.f32 %v2679_v51, %v2678_v50  ;;  %vm5646_vm11 = vmmov %vm5644_vm3 }
 0xa95   : > { %v2681_v0 = vrot.slane %v2680_v54, 4 }
 0xa97   : > { %v2682_v43 = vadd.f32 %v2681_v0, %v2680_v54 }
 0xa99   : > { %v2683_v35 = vrot.slane %v2682_v43, 2 }
 0xa9b   : > { %v2684_v58 = vadd.f32 %v2683_v35, %v2682_v43  ;;  %v4047_v43 = vld [vmem:[#allocation6 + $0x58] sm:$0xff]  ;;  %v4048_v35 = vld [vmem:[#allocation6 + $0x40] sm:$0xff] }
 0xa9d   : > { %v2685_v5 = vrot.slane %v2684_v58, 1 }
 0xa9f   : > { %v2686_v46 = vadd.f32 %v2685_v5, %v2684_v58  ;;  %v3891_v58 = vpack.i.bf16 %v4048_v35, %v4047_v43  ;;  %v3888_v5 = vpop.permute.xlu1 %3887 }
 0xaa0   : > { %v3889_v48 = vunpack.i.l.bf16 %v3888_v5 }
 0xaa1   : > { %v2687_v32 = vmul.f32 %v2686_v46, %v4883_v23  ;;  %v3890_v46 = vunpack.i.h.bf16 %v3888_v5 }
 0xaa2   : > { %2815 = vmatpush.msrb.mxu0 %v3889_v48 }
 0xaa3   : > { %v2688_v40 = vsub.f32 %v2657_v12, %v2687_v32  ;;  %v2689_v41 = vsub.f32 %v2658_v36, %v2687_v32  ;;  %v2690_v17 = vsub.f32 %v2659_v49, %v2687_v32  ;;  %v2691_v28 = vsub.f32 %v2660_v44, %v2687_v32 }
 0xaa4   : > { %v2692_v30 = vsub.f32 %v2661_v11, %v2687_v32  ;;  %v2693_v3 = vsub.f32 %v2662_v33, %v2687_v32  ;;  %v2694_v20 = vsub.f32 %v2663_v59, %v2687_v32  ;;  %v2695_v27 = vsub.f32 %v2664_v45, %v2687_v32  ;;  %2816 = vmatpush.msrb.mxu0 %v3890_v46  ;;  %v4050_v32 = vld [vmem:[#allocation6 + $0x28] sm:$0xff] }
 0xaa5   : > { %v2696_v53 = vmul.f32 %v2688_v40, %v2688_v40  ;;  %v2697_v38 = vmul.f32 %v2689_v41, %v2689_v41  ;;  %v2698_v47 = vmul.f32 %v2690_v17, %v2690_v17  ;;  %v2699_v1 = vmul.f32 %v2691_v28, %v2691_v28 }
 0xaa6   : > { %v2700_v21 = vmul.f32 %v2692_v30, %v2692_v30  ;;  %v2701_v42 = vmul.f32 %v2693_v3, %v2693_v3  ;;  %v2702_v63 = vmul.f32 %v2694_v20, %v2694_v20  ;;  %v2703_v36 = vmul.f32 %v2695_v27, %v2695_v27 }
 0xaa7   : > { %v2704_v15 = vsel %vm2665_vm2, %v2696_v53, 0.0  ;;  %v2705_v55 = vsel %vm2665_vm2, %v2697_v38, 0.0  ;;  %v2707_v24 = vsel %vm2665_vm2, %v2698_v47, 0.0  ;;  %v2709_v57 = vsel %vm2665_vm2, %v2699_v1, 0.0 }
 0xaa8   : > { %v2706_v31 = vadd.f32 %v2705_v55, %v2704_v15  ;;  %v2711_v61 = vsel %vm2665_vm2, %v2700_v21, 0.0  ;;  %v2713_v12 = vsel %vm2665_vm2, %v2701_v42, 0.0  ;;  %v2715_v62 = vsel %vm2665_vm2, %v2702_v63, 0.0 }
 0xaa9   : > { %v2717_v49 = vsel %vm2665_vm2, %v2703_v36, 0.0  ;;  %vm5651_vm2 = vmmov %vm5647_vm1 }
 0xaaa   : > { %v2708_v56 = vadd.f32 %v2707_v24, %v2706_v31 }
 0xaac   : > { %v2710_v9 = vadd.f32 %v2709_v57, %v2708_v56 }
 0xaae   : > { %v2712_v26 = vadd.f32 %v2711_v61, %v2710_v9 }
 0xab0   : > { %v2714_v16 = vadd.f32 %v2713_v12, %v2712_v26 }
 0xab2   : > { %v2716_v34 = vadd.f32 %v2715_v62, %v2714_v16 }
 0xab4   : > { %v2718_v6 = vadd.f32 %v2717_v49, %v2716_v34 }
 0xab6   : > { %v2719_v8 = vrot.slane %v2718_v6, 4 }
 0xab8   : > { %v2720_v10 = vadd.f32 %v2719_v8, %v2718_v6 }
 0xaba   : > { %v2721_v7 = vrot.slane %v2720_v10, 2 }
 0xabc   : > { %v2722_v44 = vadd.f32 %v2721_v7, %v2720_v10 }
 0xabe   : > { %v2723_v14 = vrot.slane %v2722_v44, 1 }
 0xac0   : > { %v2724_v11 = vadd.f32 %v2723_v14, %v2722_v44 }
 0xac2   : > { %v2725_v18 = vmul.f32 %v2724_v11, %v4883_v23 }
 0xac4   : > { %v2726_v19 = vadd.f32 1e-05, %v2725_v18 }
 0xac6   : > { %4011 = vrsqrt.f32 %v2726_v19  ;;  %vm2733_vm8 = vweird.f32 %v2726_v19 }
 0xacc   : > { %v4012_v37 = vpop.eup %4011 }
 0xacd   : > { %v2728_v29 = vmul.f32 %v4012_v37, %v2726_v19  ;;  %vm2734_vm10 = vweird.f32 %v4012_v37 }
 0xace   : > { %vm2735_vm0 = vmor %vm2733_vm8, %vm2734_vm10 }
 0xacf   : > { %v2729_v33 = vmul.f32 %v4012_v37, %v2728_v29  ;;  %vm5652_vm10 = vmmov %vm5647_vm1 }
 0xad0   : > { %vm5653_vm8 = vmmov %vm5647_vm1 }
 0xad1   : > { %v2730_v25 = vmul.f32 0.5, %v2729_v33 }
 0xad3   : > { %v2731_v2 = vsub.f32 1.5, %v2730_v25 }
 0xad5   : > { %v2732_v60 = vmul.f32 %v4012_v37, %v2731_v2 }
 0xad7   : > { %v2736_v59 = vsel %vm2735_vm0, %v4012_v37, %v2732_v60  ;;  %vm5654_vm0 = vmmov %vm5647_vm1 }
 0xad8   : > { %v2739_v4 = vmul.f32 %v2736_v59, %v2690_v17  ;;  %v2738_v22 = vmul.f32 %v2736_v59, %v2689_v41  ;;  %v2737_v13 = vmul.f32 %v2736_v59, %v2688_v40  ;;  %v2742_v45 = vmul.f32 %v2736_v59, %v2693_v3  ;;  %v3908_v17 = vld [vmem:[#allocation7 + $0x2] ss:$0 sm:$0xff] }
 0xad9   : > { %v2741_v50 = vmul.f32 %v2736_v59, %v2692_v30  ;;  %v2740_v51 = vmul.f32 %v2736_v59, %v2691_v28  ;;  %v2744_v54 = vmul.f32 %v2736_v59, %v2695_v27  ;;  %v2743_v0 = vmul.f32 %v2736_v59, %v2694_v20 }
 0xada   : > { %2762 = vrot.lane.b32.xlu1 %v2739_v4, %s4233_s5  ;;  %2760 = vrot.lane.b32.xlu0 %v2738_v22, %s4233_s5  ;;  %v3896_v40 = vpack.i.bf16 %v4049_v52, %v4050_v32 }
 0xadb   : > { %2758 = vrot.lane.b32.xlu2 %v2737_v13, %s4233_s5 }
 0xae2   : > { %2768 = vrot.lane.b32.xlu1 %v2742_v45, %s4233_s5  ;;  %2766 = vrot.lane.b32.xlu0 %v2741_v50, %s4233_s5 }
 0xae3   : > { %2764 = vrot.lane.b32.xlu2 %v2740_v51, %s4233_s5 }
 0xaea   : > { %2772 = vrot.lane.b32.xlu0 %v2744_v54, %s4233_s5  ;;  %3892 = vrot.lane.b32.xlu1 %v3891_v58, %s4234_s9 }
 0xaeb   : > { %2770 = vrot.lane.b32.xlu2 %v2743_v0, %s4233_s5 }
 0xaf2   : > { %3897 = vrot.lane.b32.xlu0 %v3896_v40, %s4234_s9  ;;  %2862 = vrot.lane.b32.xlu1 %v3908_v17, %s4234_s9 }
 0xaf3   : > { %2782 = vrot.lane.b32.xlu2 %v3908_v17, %s4233_s5 }
 0xafa   : > { %3015 = vrot.lane.b32.xlu0 %v3908_v17, %s4230_s10 }
 0xafb   : > { %3902 = vrot.lane.b32.xlu2 %v5413_v39, %s4230_s10 }
 0xb35   : > { %v2759_v41 = vpop.permute.xlu2 %2758 }
 0xb36   : > { %3483 = vmatmul.msk.f32.vlgmr.msrb.gmra.mxu0 %vm5639_vm7, %v2759_v41  ;;  %vm5655_vm7 = vmmov %vm5644_vm3 }
 0xb3d   : > { %v2765_v53 = vpop.permute.xlu2 %2764 }
 0xb45   : > { %v2771_v55 = vpop.permute.xlu2 %2770 }
 0xb4c   : > { %v2761_v28 = vpop.permute.xlu0 %2760  ;;  %v2763_v30 = vpop.permute.xlu1 %2762 }
 0xb4d   : > { %3484 = vmatmul.msk.f32.gmra.mxu0 %vm5640_vm12, %v2761_v28  ;;  %v2783_v56 = vpop.permute.xlu2 %2782  ;;  %vm5656_vm12 = vmmov %vm5644_vm3 }
 0xb54   : > { %v2767_v38 = vpop.permute.xlu0 %2766  ;;  %v2769_v47 = vpop.permute.xlu1 %2768 }
 0xb55   : > { %3485 = vmatmul.msk.f32.gmra.mxu0 %vm5641_vm13, %v2763_v30  ;;  %vm5657_vm13 = vmmov %vm5644_vm3 }
 0xb5c   : > { %v3893_v3 = vpop.permute.xlu1 %3892  ;;  %v2773_v31 = vpop.permute.xlu0 %2772 }
 0xb5d   : > { %3486 = vmatmul.msk.f32.gmra.mxu0 %vm5642_vm14, %v2765_v53  ;;  %v3895_v1 = vunpack.i.h.bf16 %v3893_v3  ;;  %v3894_v15 = vunpack.i.l.bf16 %v3893_v3  ;;  %vm5658_vm14 = vmmov %vm5644_vm3 }
 0xb5f   : > { %2901 = vmatpush.msra.mxu1 %v3894_v15  ;;  %3531 = vmatpush.msrb.mxu2 %v3894_v15 }
 0xb61   : > { %2902 = vmatpush.msra.mxu1 %v3895_v1  ;;  %3532 = vmatpush.msrb.mxu2 %v3895_v1 }
 0xb64   : > { %v3898_v20 = vpop.permute.xlu0 %3897  ;;  %v2863_v59 = vpop.permute.xlu1 %2862 }
 0xb65   : > { %3487 = vmatmul.msk.f32.gmra.mxu0 %vm5643_vm15, %v2767_v38  ;;  %v3900_v21 = vunpack.i.h.bf16 %v3898_v20  ;;  %v3899_v24 = vunpack.i.l.bf16 %v3898_v20  ;;  %vm5659_vm15 = vmmov %vm5644_vm3 }
 0xb67   : > { %2903 = vmatpush.msra.mxu1 %v3899_v24  ;;  %3533 = vmatpush.msrb.mxu2 %v3899_v24 }
 0xb69   : > { %2904 = vmatpush.msra.mxu1 %v3900_v21  ;;  %3534 = vmatpush.msrb.mxu2 %v3900_v21 }
 0xb6d   : > { %3488 = vmatmul.msk.f32.gmra.mxu0 %vm5644_vm3, %v2769_v47 }
 0xb75   : > { %3489 = vmatmul.msk.f32.gmra.mxu0 %vm5645_vm9, %v2771_v55  ;;  %vm5660_vm9 = vmmov %vm5644_vm3 }
 0xb7d   : > { %3490 = vmatmul.msk.f32.gmra.mxu0 %vm5646_vm11, %v2773_v31  ;;  %vm5661_vm11 = vmmov %vm5644_vm3 }
 0xbb3   : > { %v2818_v27 = vpop.f32.mrf.mxu0 }
 0xbb4   : > { %v2819_v42 = vadd.f32 %v2818_v27, %v2783_v56 }
 0xbb6   : > { %v2842_v57 = vmax.f32 %v2819_v42, 0.0 }
 0xbb8   : > { %3491 = vmatmul.msk.f32.vlgmr.msra.gmra.mxu1 %vm5647_vm1, %v2842_v57  ;;  %vm5662_vm1 = vmmov %vm5644_vm3 }
 0xbca   : > { %v2821_v9 = vpop.f32.mrf.mxu0 }
 0xbcb   : > { %v2822_v63 = vadd.f32 %v2821_v9, %v2783_v56 }
 0xbcd   : > { %v2843_v61 = vmax.f32 %v2822_v63, 0.0 }
 0xbcf   : > { %3492 = vmatmul.msk.f32.gmra.mxu1 %vm5648_vm4, %v2843_v61  ;;  %vm5663_vm4 = vmmov %vm5662_vm1 }
 0xbd2   : > { %v2824_v26 = vpop.f32.mrf.mxu0 }
 0xbd3   : > { %v2825_v36 = vadd.f32 %v2824_v26, %v2783_v56 }
 0xbd5   : > { %v2844_v12 = vmax.f32 %v2825_v36, 0.0 }
 0xbd7   : > { %3493 = vmatmul.msk.f32.gmra.mxu1 %vm5649_vm5, %v2844_v12  ;;  %vm5664_vm5 = vmmov %vm5662_vm1 }
 0xbda   : > { %v2827_v16 = vpop.f32.mrf.mxu0 }
 0xbdb   : > { %v2828_v62 = vadd.f32 %v2827_v16, %v2783_v56 }
 0xbdd   : > { %v2845_v34 = vmax.f32 %v2828_v62, 0.0 }
 0xbdf   : > { %3494 = vmatmul.msk.f32.vlgmr.msrb.gmra.mxu2 %vm5650_vm6, %v2845_v34  ;;  %vm5665_vm6 = vmmov %vm5662_vm1 }
 0xbe2   : > { %v2830_v49 = vpop.f32.mrf.mxu0 }
 0xbe3   : > { %v2831_v6 = vadd.f32 %v2830_v49, %v2783_v56 }
 0xbe5   : > { %v2846_v8 = vmax.f32 %v2831_v6, 0.0 }
 0xbe7   : > { %3495 = vmatmul.msk.f32.gmra.mxu2 %vm5651_vm2, %v2846_v8  ;;  %vm5666_vm2 = vmmov %vm5662_vm1 }
 0xbea   : > { %v2833_v10 = vpop.f32.mrf.mxu0 }
 0xbeb   : > { %v2834_v7 = vadd.f32 %v2833_v10, %v2783_v56 }
 0xbed   : > { %v2847_v44 = vmax.f32 %v2834_v7, 0.0 }
 0xbef   : > { %3496 = vmatmul.msk.f32.gmra.mxu2 %vm5652_vm10, %v2847_v44  ;;  %vm5667_vm10 = vmmov %vm5662_vm1 }
 0xbf2   : > { %v2836_v14 = vpop.f32.mrf.mxu0 }
 0xbf3   : > { %v2837_v11 = vadd.f32 %v2836_v14, %v2783_v56 }
 0xbf5   : > { %v2848_v18 = vmax.f32 %v2837_v11, 0.0 }
 0xbf7   : > { %3497 = vmatmul.msk.f32.gmra.mxu2 %vm5653_vm8, %v2848_v18  ;;  %vm5668_vm8 = vmmov %vm5662_vm1 }
 0xbfa   : > { %v2839_v19 = vpop.f32.mrf.mxu0 }
 0xbfb   : > { %v2840_v37 = vadd.f32 %v2839_v19, %v2783_v56 }
 0xbfd   : > { %v2849_v29 = vmax.f32 %v2840_v37, 0.0 }
 0xbff   : > { %3498 = vmatmul.msk.f32.gmra.mxu2 %vm5654_vm0, %v2849_v29  ;;  %vm5669_vm0 = vmmov %vm5662_vm1 }
 0xc35   : > { %v2906_v33 = vpop.f32.mrf.mxu1 }
 0xc36   : > { %v2907_v45 = vadd.f32 %v2906_v33, %v2863_v59 }
 0xc38   : > { %v2930_v0 = vsel %vm5656_vm12, %v2907_v45, 0.0 }
 0xc4c   : > { %v2909_v2 = vpop.f32.mrf.mxu1 }
 0xc4d   : > { %v2910_v13 = vadd.f32 %v2909_v2, %v2863_v59 }
 0xc4f   : > { %v2931_v51 = vsel %vm5655_vm7, %v2910_v13, 0.0 }
 0xc50   : > { %v2932_v58 = vadd.f32 %v2931_v51, %v2930_v0 }
 0xc54   : > { %v2912_v4 = vpop.f32.mrf.mxu1 }
 0xc55   : > { %v2913_v50 = vadd.f32 %v2912_v4, %v2863_v59 }
 0xc57   : > { %v2933_v43 = vsel %vm5657_vm13, %v2913_v50, 0.0 }
 0xc58   : > { %v2934_v48 = vadd.f32 %v2933_v43, %v2932_v58 }
 0xc62   : > { %v2915_v25 = vpop.f32.mrf.mxu2 }
 0xc63   : > { %v2916_v54 = vadd.f32 %v2915_v25, %v2863_v59 }
 0xc65   : > { %v2935_v5 = vsel %vm5658_vm14, %v2916_v54, 0.0  ;;  %vm5670_vm14 = vmmov %vm5669_vm0 }
 0xc66   : > { %v2936_v40 = vadd.f32 %v2935_v5, %v2934_v48 }
 0xc6a   : > { %v2918_v60 = vpop.f32.mrf.mxu2 }
 0xc6b   : > { %v2919_v35 = vadd.f32 %v2918_v60, %v2863_v59 }
 0xc6d   : > { %v2937_v52 = vsel %vm5659_vm15, %v2919_v35, 0.0  ;;  %vm5671_vm15 = vmmov %vm5669_vm0 }
 0xc6e   : > { %v2938_v17 = vadd.f32 %v2937_v52, %v2936_v40 }
 0xc72   : > { %v2921_v22 = vpop.f32.mrf.mxu2 }
 0xc73   : > { %v2922_v46 = vadd.f32 %v2921_v22, %v2863_v59 }
 0xc75   : > { %v2939_v41 = vsel %vm5644_vm3, %v2922_v46, 0.0  ;;  %vm5672_vm3 = vmmov %vm5669_vm0 }
 0xc76   : > { %v2940_v30 = vadd.f32 %v2939_v41, %v2938_v17 }
 0xc7a   : > { %v2924_v39 = vpop.f32.mrf.mxu2 }
 0xc7b   : > { %v2925_v32 = vadd.f32 %v2924_v39, %v2863_v59 }
 0xc7d   : > { %v2941_v28 = vsel %vm5660_vm9, %v2925_v32, 0.0  ;;  %vm5673_vm9 = vmmov %vm5669_vm0 }
 0xc7e   : > { %v2942_v47 = vadd.f32 %v2941_v28, %v2940_v30 }
 0xc82   : > { %v2927_v53 = vpop.f32.mrf.mxu2 }
 0xc83   : > { %v2928_v38 = vadd.f32 %v2927_v53, %v2863_v59 }
 0xc85   : > { %v2943_v3 = vsel %vm5661_vm11, %v2928_v38, 0.0  ;;  %vm5674_vm11 = vmmov %vm5669_vm0 }
 0xc86   : > { %v2944_v1 = vadd.f32 %v2943_v3, %v2942_v47 }
 0xc88   : > { %v2945_v15 = vrot.slane %v2944_v1, 4 }
 0xc8a   : > { %v2946_v55 = vadd.f32 %v2945_v15, %v2944_v1  ;;  %v5485_v15 = vpop.permute.xlu0 %3015 }
 0xc8c   : > { %v2947_v31 = vrot.slane %v2946_v55, 2 }
 0xc8e   : > { %v2948_v20 = vadd.f32 %v2947_v31, %v2946_v55 }
 0xc90   : > { %v2949_v21 = vrot.slane %v2948_v20, 1 }
 0xc92   : > { %v2950_v24 = vadd.f32 %v2949_v21, %v2948_v20 }
 0xc94   : > { %v2951_v56 = vmul.f32 %v2950_v24, %v4883_v23 }
 0xc96   : > { %v2952_v27 = vsub.f32 %v2907_v45, %v2951_v56  ;;  %v2953_v42 = vsub.f32 %v2910_v13, %v2951_v56  ;;  %v5463_v57 = vsub.f32 %v2913_v50, %v2951_v56  ;;  %v2955_v9 = vsub.f32 %v2916_v54, %v2951_v56  ;;  %v3903_v50 = vpop.permute.xlu2 %3902 }
 0xc97   : > { %v2956_v63 = vsub.f32 %v2919_v35, %v2951_v56  ;;  %v2957_v12 = vsub.f32 %v2922_v46, %v2951_v56  ;;  %v2958_v6 = vsub.f32 %v2925_v32, %v2951_v56  ;;  %v2959_v44 = vsub.f32 %v2928_v38, %v2951_v56 }
 0xc98   : > { %v2960_v61 = vmul.f32 %v2952_v27, %v2952_v27  ;;  %v2961_v26 = vmul.f32 %v2953_v42, %v2953_v42  ;;  %v2962_v36 = vmul.f32 %v5463_v57, %v5463_v57  ;;  %v2963_v16 = vmul.f32 %v2955_v9, %v2955_v9 }
 0xc99   : > { %v2964_v8 = vmul.f32 %v2956_v63, %v2956_v63  ;;  %v2965_v14 = vmul.f32 %v2957_v12, %v2957_v12  ;;  %v2966_v19 = vmul.f32 %v2958_v6, %v2958_v6  ;;  %v2967_v33 = vmul.f32 %v2959_v44, %v2959_v44 }
 0xc9a   : > { %v2968_v62 = vsel %vm5662_vm1, %v2960_v61, 0.0  ;;  %v2969_v34 = vsel %vm5663_vm4, %v2961_v26, 0.0  ;;  %v2971_v10 = vsel %vm5664_vm5, %v2962_v36, 0.0  ;;  %v2973_v11 = vsel %vm5665_vm6, %v2963_v16, 0.0  ;;  %vm5675_vm1 = vmmov %vm5669_vm0 }
 0xc9b   : > { %v2970_v49 = vadd.f32 %v2969_v34, %v2968_v62  ;;  %v2975_v37 = vsel %vm5666_vm2, %v2964_v8, 0.0  ;;  %v2977_v25 = vsel %vm5667_vm10, %v2965_v14, 0.0  ;;  %v2979_v60 = vsel %vm5668_vm8, %v2966_v19, 0.0  ;;  %vm5676_vm4 = vmmov %vm5669_vm0 }
 0xc9c   : > { %v2981_v4 = vsel %vm5669_vm0, %v2967_v33, 0.0  ;;  %v3905_v51 = vunpack.i.h.bf16 %v3903_v50  ;;  %v3904_v54 = vunpack.i.l.bf16 %v3903_v50  ;;  %vm5677_vm5 = vmmov %vm5669_vm0 }
 0xc9d   : > { %v2972_v7 = vadd.f32 %v2971_v10, %v2970_v49 }
 0xc9e   : > { %3056 = vmatpush.msra.mxu0 %v3904_v54  ;;  %3535 = vmatpush.msrb.mxu3 %v3904_v54 }
 0xc9f   : > { %v2974_v18 = vadd.f32 %v2973_v11, %v2972_v7 }
 0xca0   : > { %3057 = vmatpush.msra.mxu0 %v3905_v51  ;;  %3536 = vmatpush.msrb.mxu3 %v3905_v51 }
 0xca1   : > { %v2976_v29 = vadd.f32 %v2975_v37, %v2974_v18 }
 0xca3   : > { %v2978_v2 = vadd.f32 %v2977_v25, %v2976_v29 }
 0xca5   : > { %v2980_v59 = vadd.f32 %v2979_v60, %v2978_v2 }
 0xca7   : > { %v2982_v22 = vadd.f32 %v2981_v4, %v2980_v59 }
 0xca9   : > { %v2983_v13 = vrot.slane %v2982_v22, 4 }
 0xcab   : > { %v2984_v45 = vadd.f32 %v2983_v13, %v2982_v22 }
 0xcad   : > { %v2985_v0 = vrot.slane %v2984_v45, 2 }
 0xcaf   : > { %v2986_v43 = vadd.f32 %v2985_v0, %v2984_v45 }
 0xcb1   : > { %v2987_v35 = vrot.slane %v2986_v43, 1 }
 0xcb3   : > { %v2988_v58 = vadd.f32 %v2987_v35, %v2986_v43 }
 0xcb5   : > { %v2989_v39 = vmul.f32 %v2988_v58, %v4883_v23 }
 0xcb7   : > { %v2990_v5 = vadd.f32 1e-05, %v2989_v39 }
 0xcb9   : > { %4013 = vrsqrt.f32 %v2990_v5  ;;  %vm2997_vm12 = vweird.f32 %v2990_v5 }
 0xcbf   : > { %v4014_v46 = vpop.eup %4013 }
 0xcc0   : > { %v2992_v48 = vmul.f32 %v4014_v46, %v2990_v5  ;;  %vm2998_vm7 = vweird.f32 %v4014_v46 }
 0xcc1   : > { %vm2999_vm13 = vmor %vm2997_vm12, %vm2998_vm7  ;;  %vm3251_vm7 = vcmask 7168  }
 0xcc2   : > { %v2993_v52 = vmul.f32 %v4014_v46, %v2992_v48 }
 0xcc4   : > { %v2994_v32 = vmul.f32 0.5, %v2993_v52 }
 0xcc6   : > { %v2995_v40 = vsub.f32 1.5, %v2994_v32 }
 0xcc8   : > { %v2996_v41 = vmul.f32 %v4014_v46, %v2995_v40 }
 0xcca   : > { %v3000_v17 = vsel %vm2999_vm13, %v4014_v46, %v2996_v41 }
 0xccb   : > { %v3001_v28 = vmul.f32 %v3000_v17, %v2952_v27  ;;  %v3004_v30 = vmul.f32 %v3000_v17, %v2955_v9  ;;  %v3002_v53 = vmul.f32 %v3000_v17, %v2953_v42  ;;  %v3005_v23 = vmul.f32 %v3000_v17, %v2956_v63 }
 0xccc   : > { %v3003_v38 = vmul.f32 %v3000_v17, %v5463_v57  ;;  %v3006_v47 = vmul.f32 %v3000_v17, %v2957_v12  ;;  %v3007_v3 = vmul.f32 %v3000_v17, %v2958_v6  ;;  %v3008_v1 = vmul.f32 %v3000_v17, %v2959_v44 }
 0xccd   : > { %3499 = vmatmul.msk.f32.vlgmr.msra.gmra.mxu0 %vm5670_vm14, %v3001_v28  ;;  %3502 = vmatmul.msk.f32.vlgmr.msrb.gmra.mxu3 %vm5671_vm15, %v3004_v30 }
 0xcd5   : > { %3500 = vmatmul.msk.f32.gmra.mxu0 %vm5672_vm3, %v3002_v53  ;;  %3503 = vmatmul.msk.f32.gmra.mxu3 %vm5673_vm9, %v3005_v23 }
 0xcdd   : > { %3501 = vmatmul.msk.f32.gmra.mxu0 %vm5674_vm11, %v3003_v38  ;;  %3504 = vmatmul.msk.f32.gmra.mxu3 %vm5675_vm1, %v3006_v47 }
 0xce5   : > { %3505 = vmatmul.msk.f32.gmra.mxu3 %vm5676_vm4, %v3007_v3 }
 0xced   : > { %3506 = vmatmul.msk.f32.gmra.mxu3 %vm5677_vm5, %v3008_v1 }
 0xd4a   : > { %v3059_v55 = vpop.f32.mrf.mxu0 }
 0xd4b   : > { %v3060_v31 = vadd.f32 %v3059_v55, %v5485_v15 }
 0xd4d   : > { %v3083_v20 = vsub.f32 0.0, %v3060_v31 }
 0xd4f   : > { %v3091_v21 = vmul.f32 1.442695, %v3083_v20 }
 0xd50   : > { %v3068_v24 = vpop.f32.mrf.mxu3 }
 0xd51   : > { %4015 = vpow2.f32 %v3091_v21  ;;  %v3069_v56 = vadd.f32 %v3068_v24, %v5485_v15 }
 0xd52   : > { %v3062_v27 = vpop.f32.mrf.mxu0 }
 0xd53   : > { %v3086_v42 = vsub.f32 0.0, %v3069_v56  ;;  %v3063_v57 = vadd.f32 %v3062_v27, %v5485_v15 }
 0xd55   : > { %v3097_v9 = vmul.f32 1.442695, %v3086_v42  ;;  %v3084_v63 = vsub.f32 0.0, %v3063_v57 }
 0xd57   : > { %v4016_v61 = vpop.eup %4015  ;;  %4017 = vpow2.f32 %v3097_v9  ;;  %v3093_v26 = vmul.f32 1.442695, %v3084_v63 }
 0xd58   : > { %v3107_v36 = vadd.f32 1.0, %v4016_v61  ;;  %v3071_v12 = vpop.f32.mrf.mxu3 }
 0xd59   : > { %4019 = vpow2.f32 %v3093_v26  ;;  %v3072_v16 = vadd.f32 %v3071_v12, %v5485_v15 }
 0xd5a   : > { %4021 = vrcp.f32 %v3107_v36  ;;  %v3065_v62 = vpop.f32.mrf.mxu0  ;;  %v3124_v25 = vand.u32 2147483647, %v3107_v36  ;;  %v3126_v2 = vand.u32 2147483648, %v3107_v36  ;;  %vm3120_vm2 = vweird.f32 %v3107_v36 }
 0xd5b   : > { %v3087_v34 = vsub.f32 0.0, %v3072_v16  ;;  %v3066_v49 = vadd.f32 %v3065_v62, %v5485_v15 }
 0xd5c   : > { %vm3125_vm10 = vcmp.eq.f32.partialorder %v3124_v25, 8.507059e+37  ;;  %v3127_v0 = vor.u32 1.1754944e-38, %v3126_v2 }
 0xd5d   : > { %v4018_v6 = vpop.eup %4017  ;;  %v3099_v8 = vmul.f32 1.442695, %v3087_v34  ;;  %v3085_v10 = vsub.f32 0.0, %v3066_v49 }
 0xd5e   : > { %v3110_v7 = vadd.f32 1.0, %v4018_v6 }
 0xd5f   : > { %v4020_v44 = vpop.eup %4019  ;;  %4023 = vpow2.f32 %v3099_v8  ;;  %v3095_v14 = vmul.f32 1.442695, %v3085_v10 }
 0xd60   : > { %v4022_v11 = vpop.eup %4021  ;;  %4025 = vrcp.f32 %v3110_v7  ;;  %v3074_v18 = vpop.f32.mrf.mxu3  ;;  %v5493_v37 = vadd.f32 1.0, %v4020_v44  ;;  %v3169_v43 = vand.u32 2147483647, %v3110_v7  ;;  %v3171_v35 = vand.u32 2147483648, %v3110_v7 }
 0xd61   : > { %v3116_v19 = vmul.f32 %v4022_v11, %v3107_v36  ;;  %4027 = vpow2.f32 %v3095_v14  ;;  %v3075_v29 = vadd.f32 %v3074_v18, %v5485_v15  ;;  %vm3121_vm6 = vweird.f32 %v4022_v11 }
 0xd62   : > { %4029 = vrcp.f32 %v5493_v37  ;;  %vm3122_vm8 = vmor %vm3120_vm2, %vm3121_vm6  ;;  %v3139_v40 = vand.u32 2147483647, %v5493_v37  ;;  %v3141_v41 = vand.u32 2147483648, %v5493_v37  ;;  %vm3165_vm12 = vweird.f32 %v3110_v7 }
 0xd63   : > { %v3117_v33 = vsub.f32 1.0, %v3116_v19  ;;  %v3088_v60 = vsub.f32 0.0, %v3075_v29  ;;  %vm5515_vm13 = vcmp.eq.f32.partialorder %v3169_v43, 8.507059e+37  ;;  %v3172_v47 = vor.u32 1.1754944e-38, %v3171_v35 }
 0xd64   : > { %vm3135_vm15 = vweird.f32 %v5493_v37  ;;  %vm5521_vm9 = vcmp.eq.f32.partialorder %v3139_v40, 8.507059e+37  ;;  %v3142_v24 = vor.u32 1.1754944e-38, %v3141_v41 }
 0xd65   : > { %v4024_v59 = vpop.eup %4023  ;;  %v3118_v4 = vmul.f32 %v4022_v11, %v3117_v33  ;;  %v3101_v45 = vmul.f32 1.442695, %v3088_v60 }
 0xd66   : > { %v4026_v22 = vpop.eup %4025  ;;  %v5500_v13 = vadd.f32 1.0, %v4024_v59 }
 0xd67   : > { %v4028_v50 = vpop.eup %4027  ;;  %v3119_v51 = vadd.f32 %v4022_v11, %v3118_v4  ;;  %v3161_v54 = vmul.f32 %v4026_v22, %v3110_v7  ;;  %vm3166_vm0 = vweird.f32 %v4026_v22 }
 0xd68   : > { %4031 = vrcp.f32 %v5500_v13  ;;  %v3077_v58 = vpop.f32.mrf.mxu3  ;;  %v4030_v39 = vpop.eup %4029  ;;  %v5504_v48 = vadd.f32 1.0, %v4028_v50  ;;  %vm3167_vm14 = vmor %vm3165_vm12, %vm3166_vm0  ;;  %v3186_v9 = vand.u32 2147483648, %v5500_v13  ;;  %v3184_v49 = vand.u32 2147483647, %v5500_v13 }
 0xd69   : > { %v3123_v5 = vsel %vm3122_vm8, %v4022_v11, %v3119_v51  ;;  %v3162_v46 = vsub.f32 1.0, %v3161_v54  ;;  %4033 = vpow2.f32 %v3101_v45  ;;  %v3131_v32 = vmul.f32 %v4030_v39, %v5493_v37 }
 0xd6a   : > { %v3128_v52 = vsel %vm3125_vm10, %v3127_v0, %v3123_v5  ;;  %4035 = vrcp.f32 %v5504_v48  ;;  %v3078_v3 = vadd.f32 %v3077_v58, %v5485_v15  ;;  %vm3136_vm3 = vweird.f32 %v4030_v39 }
 0xd6b   : > { %v3235_v17 = vmax.f32 %v3128_v52, 1e-05  ;;  %v3163_v28 = vmul.f32 %v4026_v22, %v3162_v46  ;;  %v3132_v53 = vsub.f32 1.0, %v3131_v32  ;;  %vm3137_vm11 = vmor %vm3135_vm15, %vm3136_vm3  ;;  %vm3180_vm4 = vweird.f32 %v5500_v13 }
 0xd6c   : > { %v3089_v27 = vsub.f32 0.0, %v3078_v3  ;;  %v3187_v14 = vor.u32 1.1754944e-38, %v3186_v9  ;;  %v3156_v18 = vand.u32 2147483648, %v5504_v48  ;;  %v3154_v33 = vand.u32 2147483647, %v5504_v48 }
 0xd6d   : > { %v3243_v23 = vmin.f32 %v3235_v17, 0.99999  ;;  %v3164_v38 = vadd.f32 %v4026_v22, %v3163_v28  ;;  %v3133_v55 = vmul.f32 %v4030_v39, %v3132_v53  ;;  %vm3185_vm2 = vcmp.eq.f32.partialorder %v3184_v49, 8.507059e+37 }
 0xd6e   : > { %v4032_v1 = vpop.eup %4031  ;;  %v3103_v16 = vmul.f32 1.442695, %v3089_v27  ;;  %vm3150_vm10 = vweird.f32 %v5504_v48  ;;  %vm3155_vm0 = vcmp.eq.f32.partialorder %v3154_v33, 8.507059e+37 }
 0xd6f   : > { %v4034_v20 = vpop.eup %4033  ;;  %3252 = vst.msk [vmem:[%s5513_s19] sm:$0xff] %vm3251_vm7, %v3243_v23  ;;  %v3168_v21 = vsel %vm3167_vm14, %v4026_v22, %v3164_v38  ;;  %v3176_v56 = vmul.f32 %v4032_v1, %v5500_v13  ;;  %v3134_v57 = vadd.f32 %v4030_v39, %v3133_v55  ;;  %vm3181_vm1 = vweird.f32 %v4032_v1 }
 0xd70   : > { %v3173_v42 = vsel %vm5515_vm13, %v3172_v47, %v3168_v21  ;;  %v5531_v63 = vadd.f32 1.0, %v4034_v20  ;;  %v3080_v61 = vpop.f32.mrf.mxu3  ;;  %v4036_v26 = vpop.eup %4035  ;;  %vm3182_vm5 = vmor %vm3180_vm4, %vm3181_vm1  ;;  %v3157_v13 = vor.u32 1.1754944e-38, %v3156_v18 }
 0xd71   : > { %v3238_v36 = vmax.f32 %v3173_v42, 1e-05  ;;  %v3177_v12 = vsub.f32 1.0, %v3176_v56  ;;  %v3081_v62 = vadd.f32 %v3080_v61, %v5485_v15  ;;  %v3138_v34 = vsel %vm3137_vm11, %v4030_v39, %v3134_v57 }
 0xd72   : > { %v3146_v6 = vmul.f32 %v4036_v26, %v5504_v48  ;;  %4037 = vrcp.f32 %v5531_v63  ;;  %v3143_v10 = vsel %vm5521_vm9, %v3142_v24, %v3138_v34  ;;  %vm3151_vm6 = vweird.f32 %v4036_v26 }
 0xd73   : > { %v3246_v8 = vmin.f32 %v3238_v36, 0.99999  ;;  %v3178_v7 = vmul.f32 %v4032_v1, %v3177_v12  ;;  %v3236_v44 = vmax.f32 %v3143_v10, 1e-05  ;;  %4039 = vpow2.f32 %v3103_v16  ;;  %vm3152_vm8 = vmor %vm3150_vm10, %vm3151_vm6 }
 0xd74   : > { %v3147_v11 = vsub.f32 1.0, %v3146_v6  ;;  %v3090_v19 = vsub.f32 0.0, %v3081_v62  ;;  %v3201_v58 = vand.u32 2147483648, %v5531_v63  ;;  %v3199_v46 = vand.u32 2147483647, %v5531_v63 }
 0xd75   : > { %3255 = vst.msk [vmem:[%s5513_s19 + $0x18] sm:$0xff] %vm3251_vm7, %v3246_v8  ;;  %v3179_v15 = vadd.f32 %v4032_v1, %v3178_v7  ;;  %v3244_v37 = vmin.f32 %v3236_v44, 0.99999  ;;  %vm3195_vm13 = vweird.f32 %v5531_v63 }
 0xd76   : > { %v3148_v29 = vmul.f32 %v4036_v26, %v3147_v11  ;;  %v3105_v2 = vmul.f32 1.442695, %v3090_v19  ;;  %v3202_v40 = vor.u32 1.1754944e-38, %v3201_v58  ;;  %vm3200_vm15 = vcmp.eq.f32.partialorder %v3199_v46, 8.507059e+37 }
 0xd77   : > { %v3183_v25 = vsel %vm3182_vm5, %v4032_v1, %v3179_v15  ;;  %3253 = vst.msk [vmem:[%s5513_s19 + $0x8] sm:$0xff] %vm3251_vm7, %v3244_v37 }
 0xd78   : > { %v4038_v60 = vpop.eup %4037  ;;  %v3188_v59 = vsel %vm3185_vm2, %v3187_v14, %v3183_v25  ;;  %v3149_v4 = vadd.f32 %v4036_v26, %v3148_v29  ;;  %4041 = vpow2.f32 %v3105_v2 }
 0xd79   : > { %v3239_v22 = vmax.f32 %v3188_v59, 1e-05  ;;  %v3191_v45 = vmul.f32 %v4038_v60, %v5531_v63  ;;  %v4040_v51 = vpop.eup %4039  ;;  %vm3196_vm12 = vweird.f32 %v4038_v60 }
 0xd7a   : > { %v3153_v50 = vsel %vm3152_vm8, %v4036_v26, %v3149_v4  ;;  %v3113_v39 = vadd.f32 1.0, %v4040_v51  ;;  %vm3197_vm14 = vmor %vm3195_vm13, %vm3196_vm12 }
 0xd7b   : > { %v3247_v54 = vmin.f32 %v3239_v22, 0.99999  ;;  %v3158_v0 = vsel %vm3155_vm0, %v3157_v13, %v3153_v50  ;;  %v3192_v43 = vsub.f32 1.0, %v3191_v45 }
 0xd7c   : > { %v3237_v35 = vmax.f32 %v3158_v0, 1e-05  ;;  %4043 = vrcp.f32 %v3113_v39  ;;  %v3214_v1 = vand.u32 2147483647, %v3113_v39  ;;  %v3216_v55 = vand.u32 2147483648, %v3113_v39 }
 0xd7d   : > { %3256 = vst.msk [vmem:[%s5513_s19 + $0x20] sm:$0xff] %vm3251_vm7, %v3247_v54  ;;  %v3193_v5 = vmul.f32 %v4038_v60, %v3192_v43  ;;  %vm3210_vm9 = vweird.f32 %v3113_v39 }
 0xd7e   : > { %v3245_v48 = vmin.f32 %v3237_v35, 0.99999  ;;  %v4042_v52 = vpop.eup %4041  ;;  %vm3215_vm1 = vcmp.eq.f32.partialorder %v3214_v1, 8.507059e+37  ;;  %v3217_v56 = vor.u32 1.1754944e-38, %v3216_v55 }
 0xd7f   : > { %v3194_v32 = vadd.f32 %v4038_v60, %v3193_v5  ;;  %v3114_v41 = vadd.f32 1.0, %v4042_v52 }
 0xd80   : > { %3254 = vst.msk [vmem:[%s5513_s19 + $0x10] sm:$0xff] %vm3251_vm7, %v3245_v48 }
 0xd81   : > { %v3198_v17 = vsel %vm3197_vm14, %v4038_v60, %v3194_v32  ;;  %4045 = vrcp.f32 %v3114_v41  ;;  %v3231_v27 = vand.u32 2147483648, %v3114_v41  ;;  %v3229_v9 = vand.u32 2147483647, %v3114_v41 }
 0xd82   : > { %v3203_v28 = vsel %vm3200_vm15, %v3202_v40, %v3198_v17  ;;  %v4044_v53 = vpop.eup %4043  ;;  %vm3225_vm5 = vweird.f32 %v3114_v41 }
 0xd83   : > { %v3240_v30 = vmax.f32 %v3203_v28, 1e-05  ;;  %v3206_v38 = vmul.f32 %v4044_v53, %v3113_v39  ;;  %vm3211_vm3 = vweird.f32 %v4044_v53  ;;  %v3232_v36 = vor.u32 1.1754944e-38, %v3231_v27 }
 0xd84   : > { %vm3212_vm11 = vmor %vm3210_vm9, %vm3211_vm3  ;;  %vm3230_vm2 = vcmp.eq.f32.partialorder %v3229_v9, 8.507059e+37 }
 0xd85   : > { %v3248_v23 = vmin.f32 %v3240_v30, 0.99999  ;;  %v3207_v47 = vsub.f32 1.0, %v3206_v38 }
 0xd87   : > { %3257 = vst.msk [vmem:[%s5513_s19 + $0x28] sm:$0xff] %vm3251_vm7, %v3248_v23  ;;  %v4046_v3 = vpop.eup %4045  ;;  %v3208_v31 = vmul.f32 %v4044_v53, %v3207_v47 }
 0xd88   : > { %v3221_v20 = vmul.f32 %v4046_v3, %v3114_v41  ;;  %vm3226_vm4 = vweird.f32 %v4046_v3 }
 0xd89   : > { %v3209_v21 = vadd.f32 %v4044_v53, %v3208_v31  ;;  %vm3227_vm6 = vmor %vm3225_vm5, %vm3226_vm4 }
 0xd8a   : > { %v3222_v24 = vsub.f32 1.0, %v3221_v20 }
 0xd8b   : > { %v3213_v42 = vsel %vm3212_vm11, %v4044_v53, %v3209_v21 }
 0xd8c   : > { %v3223_v57 = vmul.f32 %v4046_v3, %v3222_v24  ;;  %v3218_v63 = vsel %vm3215_vm1, %v3217_v56, %v3213_v42 }
 0xd8d   : > { %v3241_v61 = vmax.f32 %v3218_v63, 1e-05 }
 0xd8e   : > { %v3224_v26 = vadd.f32 %v4046_v3, %v3223_v57 }
 0xd8f   : > { %v3249_v12 = vmin.f32 %v3241_v61, 0.99999 }
 0xd90   : > { %v3228_v16 = vsel %vm3227_vm6, %v4046_v3, %v3224_v26 }
 0xd91   : > { %v3233_v62 = vsel %vm3230_vm2, %v3232_v36, %v3228_v16  ;;  %3258 = vst.msk [vmem:[%s5513_s19 + $0x30] sm:$0xff] %vm3251_vm7, %v3249_v12 }
 0xd92   : > { %v3242_v34 = vmax.f32 %v3233_v62, 1e-05 }
 0xd94   : > { %v3250_v49 = vmin.f32 %v3242_v34, 0.99999 }
 0xd96   : > { %3259 = vst.msk [vmem:[%s5513_s19 + $0x38] sm:$0xff] %vm3251_vm7, %v3250_v49 }
 0xd97 PF: > { %p18_p4 = scmp.ge.s32.totalorder %s4306_s8, 4   ;;  %s5682_s15 = smov %s4209_s16 }
 0xd98   : > { %s5683_s16 = smov %s4213_s17  ;;  %s5684_s17 = smov %s4319_s12 }
 0xd99   : > { %s5685_s18 = smov %s4306_s8  ;;  %20 = sbr.rel (!%p18_p4) target bundleno = 8 (0x8), region = 97 }
 0xd9e   :  { %3281 = vsyncpa [#allocation3], 1 }
 0xd9f   :  { %3283 = vsyncpa [#allocation3 + $0x1], 1 }
 0xda0   :  { %3284 = vsyncpa [#allocation5], 1 }
 0xda1   :  { %3286 = vsyncpa [#allocation5 + $0x1], 1 }
 0xda2   :  { %3287 = vsyncpa [#allocation8], 1 }

</bundles_post_ra>
